<compile_context>
chip_gen: v6e
topology: v6e:2x2x1
jax: 0.10.0
libtpu: 0.0.40
codegen_flags: <defaults>
</compile_context>

<pallas_src>
import functools
import math

import jax
import jax.numpy as jnp
from jax.experimental import pallas as pl
from jax.experimental.pallas import tpu as pltpu


# ---------------------------------------------------------------------------
# Pallas kernel: one grid step = one time chunk; BOTH directions advance TT
# recurrence steps with all operands VMEM-resident.
# PyTorch gate ordering in weight_ih / weight_hh / biases is [i, f, g, o].
# ---------------------------------------------------------------------------
def _bilstm_chunk_kernel(gx_f_ref, gx_b_ref, whh_f_ref, whh_b_ref,
                         out_f_ref, out_b_ref,
                         h_f, c_f, h_b, c_b):
    TT = gx_f_ref.shape[0]

    # Initialize carried state at the first time chunk only.
    @pl.when(pl.program_id(0) == 0)
    def _init():
        h_f[...] = jnp.zeros_like(h_f)
        c_f[...] = jnp.zeros_like(c_f)
        h_b[...] = jnp.zeros_like(h_b)
        c_b[...] = jnp.zeros_like(c_b)

    # Recurrent weights: loaded once per chunk, reused for all TT steps.
    whh_f = whh_f_ref[...]          # (4, H, H), mm_dtype
    whh_b = whh_b_ref[...]          # (4, H, H), mm_dtype
    mm_dtype = whh_f.dtype

    def one_dir_step(gx_ref, whh, h_scr, c_scr, out_ref, t_local):
        h_prev = h_scr[...]                           # (B, H) f32
        c_prev = c_scr[...]                           # (B, H) f32
        h_mm = h_prev.astype(mm_dtype)
        gx_t = gx_ref[t_local].astype(jnp.float32)    # (4, B, H)

        # Four lane-aligned per-gate matmuls; only these stay on the serial
        # critical path (input projection was hoisted out of the recurrence).
        gates = [gx_t[k] + jnp.dot(h_mm, whh[k],
                                   preferred_element_type=jnp.float32)
                 for k in range(4)]
        i_g = jax.nn.sigmoid(gates[0])
        f_g = jax.nn.sigmoid(gates[1])
        g_g = jnp.tanh(gates[2])
        o_g = jax.nn.sigmoid(gates[3])

        c_new = f_g * c_prev + i_g * g_g
        h_new = o_g * jnp.tanh(c_new)
        c_scr[...] = c_new
        h_scr[...] = h_new
        out_ref[t_local] = h_new.astype(out_ref.dtype)

    def step(s, carry):
        # Two independent recurrence chains per iteration -> VLIW interleaving
        # (fwd matmul overlaps bwd sigmoid/tanh and vice versa) on a single TC.
        one_dir_step(gx_f_ref, whh_f, h_f, c_f, out_f_ref, s)
        one_dir_step(gx_b_ref, whh_b, h_b, c_b, out_b_ref, TT - 1 - s)
        return carry

    unroll = math.gcd(TT, 8)   # partial unroll: scheduler visibility w/o vreg blowup
    jax.lax.fori_loop(0, TT, step, 0, unroll=unroll)


def _choose_time_chunk(T, B, H, mm_bytes, budget_bytes=16 * 2**20):
    """Largest divisor of T whose per-chunk pipelined blocks fit the VMEM budget
    (double-buffered by Pallas -> keep the single-buffered estimate conservative)."""
    def chunk_bytes(tt):
        gx = 2 * tt * 4 * B * H * mm_bytes      # both directions' gates_x chunks
        out = 2 * tt * B * H * 4                # both directions' f32 output chunks
        return gx + out

    best = 1
    for tt in range(1, T + 1):
        if T % tt == 0 and chunk_bytes(tt) <= budget_bytes:
            best = tt
    return best


# ---------------------------------------------------------------------------
# Forward: equivalent of subjLSTM.forward on equal-length sequences.
#   inputs: (B, T, E)  ->  outputs: (B, T, hidden_dim)
# ---------------------------------------------------------------------------
@functools.partial(jax.jit, static_argnames=("mm_dtype",))
def subj_lstm_forward(inputs_bte, params, *, mm_dtype=jnp.bfloat16):
    x = inputs_bte.astype(jnp.float32)
    B, T, E = x.shape
    H4 = params["w_ih_f"].shape[0]
    H = H4 // 4

    def dir_operands(w_ih, w_hh, b_ih, b_hh):
        w_ih4 = w_ih.reshape(4, H, E).astype(jnp.float32)
        bias4 = (b_ih + b_hh).reshape(4, H).astype(jnp.float32)
        # Hoisted, fully time-parallel input projection, emitted directly in the
        # lane-aligned (T, 4, B, H) layout (no separate x transpose in HBM).
        gx = jnp.einsum("bte,khe->tkbh", x, w_ih4) + bias4[None, :, None, :]
        whh_t = jnp.transpose(w_hh.reshape(4, H, H), (0, 2, 1))   # (4, H_in, H_out)
        return gx.astype(mm_dtype), whh_t.astype(mm_dtype)

    gx_f, whh_f = dir_operands(params["w_ih_f"], params["w_hh_f"],
                               params["b_ih_f"], params["b_hh_f"])
    gx_b, whh_b = dir_operands(params["w_ih_b"], params["w_hh_b"],
                               params["b_ih_b"], params["b_hh_b"])

    mm_bytes = jnp.dtype(mm_dtype).itemsize
    TT = _choose_time_chunk(T, B, H, mm_bytes)
    n_chunks = T // TT

    out_f, out_b = pl.pallas_call(
        _bilstm_chunk_kernel,
        out_shape=(jax.ShapeDtypeStruct((T, B, H), jnp.float32),
                   jax.ShapeDtypeStruct((T, B, H), jnp.float32)),
        grid_spec=pltpu.PrefetchScalarGridSpec(
            num_scalar_prefetch=0,
            grid=(n_chunks,),          # sequential time-chunk axis (carried h/c state)
            in_specs=[
                # forward direction streams chunk g; backward streams chunk n-1-g
                # (the time reversal lives entirely in the index_map).
                pl.BlockSpec((TT, 4, B, H), lambda g: (g, 0, 0, 0)),
                pl.BlockSpec((TT, 4, B, H), lambda g: (n_chunks - 1 - g, 0, 0, 0)),
                pl.BlockSpec((4, H, H), lambda g: (0, 0, 0)),
                pl.BlockSpec((4, H, H), lambda g: (0, 0, 0)),
            ],
            out_specs=[
                pl.BlockSpec((TT, B, H), lambda g: (g, 0, 0)),
                pl.BlockSpec((TT, B, H), lambda g: (n_chunks - 1 - g, 0, 0)),
            ],
            scratch_shapes=[pltpu.VMEM((B, H), jnp.float32)] * 4,   # h_f, c_f, h_b, c_b
        ),
        compiler_params=pltpu.CompilerParams(
            dimension_semantics=("arbitrary",),          # sequential dependence over time
            vmem_limit_bytes=48 * 1024 * 1024,           # explicit; safe on v7x's 64 MiB
        ),
    )(gx_f, gx_b, whh_f, whh_b)

    # (T,B,H) + (T,B,H) -> (B,T,2H).
    # NOTE: when H % 128 == 0 this concat/transpose can be folded into the out_specs
    # (direction -> lane-offset H-wide block of a (T,B,2H) output); kept outside here so
    # the tiny-H demo stays within the "block == full array extent" tiling exemption.
    out = jnp.concatenate([out_f, out_b], axis=-1)
    return jnp.transpose(out, (1, 0, 2))


# ---------------------------------------------------------------------------
# Parameter init (deterministic, mirrors nn.LSTM shapes + xavier_normal_ gain).
# ---------------------------------------------------------------------------
def init_subj_lstm_params(key, embedding_dim, hidden_dim, gain=1.0):
    H = hidden_dim // 2
    ks = jax.random.split(key, 8)

    def xavier(k, shape):
        fan_out, fan_in = shape
        std = gain * (2.0 / (fan_in + fan_out)) ** 0.5
        return std * jax.random.normal(k, shape, dtype=jnp.float32)

    def bias_init(k, shape):
        bound = 1.0 / (H ** 0.5)
        return jax.random.uniform(k, shape, jnp.float32, -bound, bound)

    return {
        # forward direction
        "w_ih_f": xavier(ks[0], (4 * H, embedding_dim)),
        "w_hh_f": xavier(ks[1], (4 * H, H)),
        "b_ih_f": bias_init(ks[2], (4 * H,)),
        "b_hh_f": bias_init(ks[3], (4 * H,)),
        # backward (reverse) direction
        "w_ih_b": xavier(ks[4], (4 * H, embedding_dim)),
        "w_hh_b": xavier(ks[5], (4 * H, H)),
        "b_ih_b": bias_init(ks[6], (4 * H,)),
        "b_hh_b": bias_init(ks[7], (4 * H,)),
    }


# ---------------------------------------------------------------------------
# Pure-JAX reference (lax.scan) for correctness checking.
# ---------------------------------------------------------------------------
def _ref_direction(x_tbe, w_ih, w_hh, b_ih, b_hh):
    H = w_hh.shape[1]
    B = x_tbe.shape[1]
    b = b_ih + b_hh

    def step(carry, x_t):
        h, c = carry
        gates = x_t @ w_ih.T + h @ w_hh.T + b
        i = jax.nn.sigmoid(gates[:, 0 * H:1 * H])
        f = jax.nn.sigmoid(gates[:, 1 * H:2 * H])
        g = jnp.tanh(gates[:, 2 * H:3 * H])
        o = jax.nn.sigmoid(gates[:, 3 * H:4 * H])
        c_new = f * c + i * g
        h_new = o * jnp.tanh(c_new)
        return (h_new, c_new), h_new

    init = (jnp.zeros((B, H), jnp.float32), jnp.zeros((B, H), jnp.float32))
    _, out = jax.lax.scan(step, init, x_tbe)
    return out


def subj_lstm_reference(inputs_bte, params):
    x_tbe = jnp.transpose(inputs_bte, (1, 0, 2)).astype(jnp.float32)
    out_f = _ref_direction(x_tbe, params["w_ih_f"], params["w_hh_f"],
                           params["b_ih_f"], params["b_hh_f"])
    out_b = _ref_direction(x_tbe[::-1], params["w_ih_b"], params["w_hh_b"],
                           params["b_ih_b"], params["b_hh_b"])[::-1]
    return jnp.transpose(jnp.concatenate([out_f, out_b], axis=-1), (1, 0, 2))


if __name__ == "__main__":
    # Small shapes consistent with the module: batch=2, seq=8,
    # embedding_dim=32, hidden_dim=32 (so each direction has H=16).
    B, T, E, HIDDEN = 2, 8, 32, 32

    key = jax.random.PRNGKey(0)
    k_x, k_p = jax.random.split(key)

    inputs = jax.random.normal(k_x, (B, T, E), dtype=jnp.float32)
    params = init_subj_lstm_params(k_p, embedding_dim=E, hidden_dim=HIDDEN, gain=1.0)

    ref = jax.block_until_ready(subj_lstm_reference(inputs, params))

    # Exact-math path (f32 matmul operands): tight check against the reference.
    out_f32 = jax.block_until_ready(
        subj_lstm_forward(inputs, params, mm_dtype=jnp.float32))
    assert out_f32.shape == (B, T, HIDDEN), out_f32.shape
    assert jnp.allclose(out_f32, ref, atol=1e-4, rtol=1e-4), "f32 mismatch vs reference"

    # Production path (bf16 matmul operands, f32 gate/state math): loose sanity check.
    out_bf16 = jax.block_until_ready(
        subj_lstm_forward(inputs, params, mm_dtype=jnp.bfloat16))
    assert out_bf16.shape == (B, T, HIDDEN), out_bf16.shape
    bf16_err = float(jnp.max(jnp.abs(out_bf16 - ref)))
    assert bf16_err < 2e-1, f"bf16 path diverged from reference (max abs err {bf16_err})"

    print("KERNEL_OK")
</pallas_src>

<mosaic_0001>
module attributes {stable_mosaic.version = 11 : i64} {
  func.func @_bilstm_chunk_kernel(%arg0: i32, %arg1: memref<8x4x2x16xf32, #tpu.memory_space<vmem>>, %arg2: memref<8x4x2x16xf32, #tpu.memory_space<vmem>>, %arg3: memref<4x16x16xf32, #tpu.memory_space<vmem>>, %arg4: memref<4x16x16xf32, #tpu.memory_space<vmem>>, %arg5: memref<8x2x16xf32, #tpu.memory_space<vmem>>, %arg6: memref<8x2x16xf32, #tpu.memory_space<vmem>>, %arg7: memref<2x16xf32, #tpu.memory_space<vmem>>, %arg8: memref<2x16xf32, #tpu.memory_space<vmem>>, %arg9: memref<2x16xf32, #tpu.memory_space<vmem>>, %arg10: memref<2x16xf32, #tpu.memory_space<vmem>>) attributes {dimension_semantics = [#tpu.dimension_semantics<arbitrary>], iteration_bounds = array<i64: 1>, scalar_prefetch = 0 : i64, scratch_operands = 4 : i64, tpu.core_type = #tpu.core_type<tc>, window_params = [{transform_indices = @transform_0, window_bounds = array<i64: 8, 4, 2, 16>}, {transform_indices = @transform_1, window_bounds = array<i64: 8, 4, 2, 16>}, {pipeline_mode = #tpu.pipeline_mode<synchronous>, transform_indices = @transform_2, window_bounds = array<i64: 4, 16, 16>}, {pipeline_mode = #tpu.pipeline_mode<synchronous>, transform_indices = @transform_3, window_bounds = array<i64: 4, 16, 16>}, {transform_indices = @transform_4, window_bounds = array<i64: 8, 2, 16>}, {transform_indices = @transform_5, window_bounds = array<i64: 8, 2, 16>}]} {
    %c0_i32 = arith.constant 0 : i32
    %0 = arith.cmpi eq, %arg0, %c0_i32 : i32
    %1 = arith.extui %0 : i1 to i32
    %c0_i32_0 = arith.constant 0 : i32
    %2 = arith.cmpi ne, %1, %c0_i32_0 : i32
    scf.if %2 {
      %cst_334 = arith.constant 0.000000e+00 : f32
      %909 = vector.broadcast %cst_334 : f32 to vector<2x16xf32>
      %c0_335 = arith.constant 0 : index
      %c0_336 = arith.constant 0 : index
      %910 = vector.load %arg7[%c0_335, %c0_336] : memref<2x16xf32, #tpu.memory_space<vmem>>, vector<2x16xf32>
      tpu.vector_store %arg7[%c0_335, %c0_336], %909 {strides = array<i32>} : memref<2x16xf32, #tpu.memory_space<vmem>>, vector<2x16xf32>,
      %cst_337 = arith.constant 0.000000e+00 : f32
      %911 = vector.broadcast %cst_337 : f32 to vector<2x16xf32>
      %c0_338 = arith.constant 0 : index
      %c0_339 = arith.constant 0 : index
      %912 = vector.load %arg8[%c0_338, %c0_339] : memref<2x16xf32, #tpu.memory_space<vmem>>, vector<2x16xf32>
      tpu.vector_store %arg8[%c0_338, %c0_339], %911 {strides = array<i32>} : memref<2x16xf32, #tpu.memory_space<vmem>>, vector<2x16xf32>,
      %cst_340 = arith.constant 0.000000e+00 : f32
      %913 = vector.broadcast %cst_340 : f32 to vector<2x16xf32>
      %c0_341 = arith.constant 0 : index
      %c0_342 = arith.constant 0 : index
      %914 = vector.load %arg9[%c0_341, %c0_342] : memref<2x16xf32, #tpu.memory_space<vmem>>, vector<2x16xf32>
      tpu.vector_store %arg9[%c0_341, %c0_342], %913 {strides = array<i32>} : memref<2x16xf32, #tpu.memory_space<vmem>>, vector<2x16xf32>,
      %cst_343 = arith.constant 0.000000e+00 : f32
      %915 = vector.broadcast %cst_343 : f32 to vector<2x16xf32>
      %c0_344 = arith.constant 0 : index
      %c0_345 = arith.constant 0 : index
      %916 = vector.load %arg10[%c0_344, %c0_345] : memref<2x16xf32, #tpu.memory_space<vmem>>, vector<2x16xf32>
      tpu.vector_store %arg10[%c0_344, %c0_345], %915 {strides = array<i32>} : memref<2x16xf32, #tpu.memory_space<vmem>>, vector<2x16xf32>,
    } else {
    }
    %c0 = arith.constant 0 : index
    %c0_1 = arith.constant 0 : index
    %c0_2 = arith.constant 0 : index
    %3 = vector.load %arg3[%c0, %c0_1, %c0_2] : memref<4x16x16xf32, #tpu.memory_space<vmem>>, vector<4x16x16xf32>
    %c0_3 = arith.constant 0 : index
    %c0_4 = arith.constant 0 : index
    %c0_5 = arith.constant 0 : index
    %4 = vector.load %arg4[%c0_3, %c0_4, %c0_5] : memref<4x16x16xf32, #tpu.memory_space<vmem>>, vector<4x16x16xf32>
    %c0_i32_6 = arith.constant 0 : i32
    %c0_7 = arith.constant 0 : index
    %c0_8 = arith.constant 0 : index
    %5 = vector.load %arg7[%c0_7, %c0_8] : memref<2x16xf32, #tpu.memory_space<vmem>>, vector<2x16xf32>
    %c0_9 = arith.constant 0 : index
    %c0_10 = arith.constant 0 : index
    %6 = vector.load %arg8[%c0_9, %c0_10] : memref<2x16xf32, #tpu.memory_space<vmem>>, vector<2x16xf32>
    %7 = arith.index_cast %c0_i32_6 : i32 to index
    %c0_11 = arith.constant 0 : index
    %c0_12 = arith.constant 0 : index
    %c0_13 = arith.constant 0 : index
    %8 = vector.load %arg1[%7, %c0_11, %c0_12, %c0_13] : memref<8x4x2x16xf32, #tpu.memory_space<vmem>>, vector<1x4x2x16xf32>
    %9 = vector.shape_cast %8 : vector<1x4x2x16xf32> to vector<4x2x16xf32>
    %10 = vector.extract_strided_slice %9 {offsets = [0, 0, 0], sizes = [1, 2, 16], strides = [1, 1, 1]} : vector<4x2x16xf32> to vector<1x2x16xf32>
    %11 = vector.shape_cast %10 : vector<1x2x16xf32> to vector<2x16xf32>
    %12 = vector.extract_strided_slice %3 {offsets = [0, 0, 0], sizes = [1, 16, 16], strides = [1, 1, 1]} : vector<4x16x16xf32> to vector<1x16x16xf32>
    %13 = vector.shape_cast %12 : vector<1x16x16xf32> to vector<16x16xf32>
    %cst = arith.constant dense<0.000000e+00> : vector<2x16xf32>
    %14 = tpu.matmul %5, %13, %cst {dimension_numbers = #tpu.dot_dimension_numbers<[1], [0], [0], [1], [0, 0, 1, 1], [], []>} : vector<2x16xf32>, vector<16x16xf32>, vector<2x16xf32> -> vector<2x16xf32>
    %15 = arith.addf %11, %14 : vector<2x16xf32>
    %16 = vector.extract_strided_slice %9 {offsets = [1, 0, 0], sizes = [1, 2, 16], strides = [1, 1, 1]} : vector<4x2x16xf32> to vector<1x2x16xf32>
    %17 = vector.shape_cast %16 : vector<1x2x16xf32> to vector<2x16xf32>
    %18 = vector.extract_strided_slice %3 {offsets = [1, 0, 0], sizes = [1, 16, 16], strides = [1, 1, 1]} : vector<4x16x16xf32> to vector<1x16x16xf32>
    %19 = vector.shape_cast %18 : vector<1x16x16xf32> to vector<16x16xf32>
    %cst_14 = arith.constant dense<0.000000e+00> : vector<2x16xf32>
    %20 = tpu.matmul %5, %19, %cst_14 {dimension_numbers = #tpu.dot_dimension_numbers<[1], [0], [0], [1], [0, 0, 1, 1], [], []>} : vector<2x16xf32>, vector<16x16xf32>, vector<2x16xf32> -> vector<2x16xf32>
    %21 = arith.addf %17, %20 : vector<2x16xf32>
    %22 = vector.extract_strided_slice %9 {offsets = [2, 0, 0], sizes = [1, 2, 16], strides = [1, 1, 1]} : vector<4x2x16xf32> to vector<1x2x16xf32>
    %23 = vector.shape_cast %22 : vector<1x2x16xf32> to vector<2x16xf32>
    %24 = vector.extract_strided_slice %3 {offsets = [2, 0, 0], sizes = [1, 16, 16], strides = [1, 1, 1]} : vector<4x16x16xf32> to vector<1x16x16xf32>
    %25 = vector.shape_cast %24 : vector<1x16x16xf32> to vector<16x16xf32>
    %cst_15 = arith.constant dense<0.000000e+00> : vector<2x16xf32>
    %26 = tpu.matmul %5, %25, %cst_15 {dimension_numbers = #tpu.dot_dimension_numbers<[1], [0], [0], [1], [0, 0, 1, 1], [], []>} : vector<2x16xf32>, vector<16x16xf32>, vector<2x16xf32> -> vector<2x16xf32>
    %27 = arith.addf %23, %26 : vector<2x16xf32>
    %28 = vector.extract_strided_slice %9 {offsets = [3, 0, 0], sizes = [1, 2, 16], strides = [1, 1, 1]} : vector<4x2x16xf32> to vector<1x2x16xf32>
    %29 = vector.shape_cast %28 : vector<1x2x16xf32> to vector<2x16xf32>
    %30 = vector.extract_strided_slice %3 {offsets = [3, 0, 0], sizes = [1, 16, 16], strides = [1, 1, 1]} : vector<4x16x16xf32> to vector<1x16x16xf32>
    %31 = vector.shape_cast %30 : vector<1x16x16xf32> to vector<16x16xf32>
    %cst_16 = arith.constant dense<0.000000e+00> : vector<2x16xf32>
    %32 = tpu.matmul %5, %31, %cst_16 {dimension_numbers = #tpu.dot_dimension_numbers<[1], [0], [0], [1], [0, 0, 1, 1], [], []>} : vector<2x16xf32>, vector<16x16xf32>, vector<2x16xf32> -> vector<2x16xf32>
    %33 = arith.addf %29, %32 : vector<2x16xf32>
    %34 = arith.negf %15 : vector<2x16xf32>
    %35 = math.exp %34 : vector<2x16xf32>
    %cst_17 = arith.constant 1.000000e+00 : f32
    %36 = vector.broadcast %cst_17 : f32 to vector<2x16xf32>
    %37 = arith.addf %36, %35 : vector<2x16xf32>
    %38 = arith.divf %36, %37 : vector<2x16xf32>
    %39 = arith.negf %21 : vector<2x16xf32>
    %40 = math.exp %39 : vector<2x16xf32>
    %cst_18 = arith.constant 1.000000e+00 : f32
    %41 = vector.broadcast %cst_18 : f32 to vector<2x16xf32>
    %42 = arith.addf %41, %40 : vector<2x16xf32>
    %43 = arith.divf %41, %42 : vector<2x16xf32>
    %44 = math.tanh %27 : vector<2x16xf32>
    %45 = arith.negf %33 : vector<2x16xf32>
    %46 = math.exp %45 : vector<2x16xf32>
    %cst_19 = arith.constant 1.000000e+00 : f32
    %47 = vector.broadcast %cst_19 : f32 to vector<2x16xf32>
    %48 = arith.addf %47, %46 : vector<2x16xf32>
    %49 = arith.divf %47, %48 : vector<2x16xf32>
    %50 = arith.mulf %43, %6 : vector<2x16xf32>
    %51 = arith.mulf %38, %44 : vector<2x16xf32>
    %52 = arith.addf %50, %51 : vector<2x16xf32>
    %53 = math.tanh %52 : vector<2x16xf32>
    %54 = arith.mulf %49, %53 : vector<2x16xf32>
    %c0_20 = arith.constant 0 : index
    %c0_21 = arith.constant 0 : index
    %55 = vector.load %arg8[%c0_20, %c0_21] : memref<2x16xf32, #tpu.memory_space<vmem>>, vector<2x16xf32>
    tpu.vector_store %arg8[%c0_20, %c0_21], %52 {strides = array<i32>} : memref<2x16xf32, #tpu.memory_space<vmem>>, vector<2x16xf32>,
    %c0_22 = arith.constant 0 : index
    %c0_23 = arith.constant 0 : index
    %56 = vector.load %arg7[%c0_22, %c0_23] : memref<2x16xf32, #tpu.memory_space<vmem>>, vector<2x16xf32>
    tpu.vector_store %arg7[%c0_22, %c0_23], %54 {strides = array<i32>} : memref<2x16xf32, #tpu.memory_space<vmem>>, vector<2x16xf32>,
    %57 = arith.index_cast %c0_i32_6 : i32 to index
    %c0_24 = arith.constant 0 : index
    %c0_25 = arith.constant 0 : index
    %58 = vector.load %arg5[%57, %c0_24, %c0_25] : memref<8x2x16xf32, #tpu.memory_space<vmem>>, vector<1x2x16xf32>
    %59 = vector.shape_cast %58 : vector<1x2x16xf32> to vector<2x16xf32>
    %60 = vector.shape_cast %54 : vector<2x16xf32> to vector<1x2x16xf32>
    tpu.vector_store %arg5[%57, %c0_24, %c0_25], %60 {strides = array<i32>} : memref<8x2x16xf32, #tpu.memory_space<vmem>>, vector<1x2x16xf32>,
    %c7_i32 = arith.constant 7 : i32
    %61 = arith.subi %c7_i32, %c0_i32_6 : i32
    %c0_26 = arith.constant 0 : index
    %c0_27 = arith.constant 0 : index
    %62 = vector.load %arg9[%c0_26, %c0_27] : memref<2x16xf32, #tpu.memory_space<vmem>>, vector<2x16xf32>
    %c0_28 = arith.constant 0 : index
    %c0_29 = arith.constant 0 : index
    %63 = vector.load %arg10[%c0_28, %c0_29] : memref<2x16xf32, #tpu.memory_space<vmem>>, vector<2x16xf32>
    %64 = arith.index_cast %61 : i32 to index
    %c0_30 = arith.constant 0 : index
    %c0_31 = arith.constant 0 : index
    %c0_32 = arith.constant 0 : index
    %65 = vector.load %arg2[%64, %c0_30, %c0_31, %c0_32] : memref<8x4x2x16xf32, #tpu.memory_space<vmem>>, vector<1x4x2x16xf32>
    %66 = vector.shape_cast %65 : vector<1x4x2x16xf32> to vector<4x2x16xf32>
    %67 = vector.extract_strided_slice %66 {offsets = [0, 0, 0], sizes = [1, 2, 16], strides = [1, 1, 1]} : vector<4x2x16xf32> to vector<1x2x16xf32>
    %68 = vector.shape_cast %67 : vector<1x2x16xf32> to vector<2x16xf32>
    %69 = vector.extract_strided_slice %4 {offsets = [0, 0, 0], sizes = [1, 16, 16], strides = [1, 1, 1]} : vector<4x16x16xf32> to vector<1x16x16xf32>
    %70 = vector.shape_cast %69 : vector<1x16x16xf32> to vector<16x16xf32>
    %cst_33 = arith.constant dense<0.000000e+00> : vector<2x16xf32>
    %71 = tpu.matmul %62, %70, %cst_33 {dimension_numbers = #tpu.dot_dimension_numbers<[1], [0], [0], [1], [0, 0, 1, 1], [], []>} : vector<2x16xf32>, vector<16x16xf32>, vector<2x16xf32> -> vector<2x16xf32>
    %72 = arith.addf %68, %71 : vector<2x16xf32>
    %73 = vector.extract_strided_slice %66 {offsets = [1, 0, 0], sizes = [1, 2, 16], strides = [1, 1, 1]} : vector<4x2x16xf32> to vector<1x2x16xf32>
    %74 = vector.shape_cast %73 : vector<1x2x16xf32> to vector<2x16xf32>
    %75 = vector.extract_strided_slice %4 {offsets = [1, 0, 0], sizes = [1, 16, 16], strides = [1, 1, 1]} : vector<4x16x16xf32> to vector<1x16x16xf32>
    %76 = vector.shape_cast %75 : vector<1x16x16xf32> to vector<16x16xf32>
    %cst_34 = arith.constant dense<0.000000e+00> : vector<2x16xf32>
    %77 = tpu.matmul %62, %76, %cst_34 {dimension_numbers = #tpu.dot_dimension_numbers<[1], [0], [0], [1], [0, 0, 1, 1], [], []>} : vector<2x16xf32>, vector<16x16xf32>, vector<2x16xf32> -> vector<2x16xf32>
    %78 = arith.addf %74, %77 : vector<2x16xf32>
    %79 = vector.extract_strided_slice %66 {offsets = [2, 0, 0], sizes = [1, 2, 16], strides = [1, 1, 1]} : vector<4x2x16xf32> to vector<1x2x16xf32>
    %80 = vector.shape_cast %79 : vector<1x2x16xf32> to vector<2x16xf32>
    %81 = vector.extract_strided_slice %4 {offsets = [2, 0, 0], sizes = [1, 16, 16], strides = [1, 1, 1]} : vector<4x16x16xf32> to vector<1x16x16xf32>
    %82 = vector.shape_cast %81 : vector<1x16x16xf32> to vector<16x16xf32>
    %cst_35 = arith.constant dense<0.000000e+00> : vector<2x16xf32>
    %83 = tpu.matmul %62, %82, %cst_35 {dimension_numbers = #tpu.dot_dimension_numbers<[1], [0], [0], [1], [0, 0, 1, 1], [], []>} : vector<2x16xf32>, vector<16x16xf32>, vector<2x16xf32> -> vector<2x16xf32>
    %84 = arith.addf %80, %83 : vector<2x16xf32>
    %85 = vector.extract_strided_slice %66 {offsets = [3, 0, 0], sizes = [1, 2, 16], strides = [1, 1, 1]} : vector<4x2x16xf32> to vector<1x2x16xf32>
    %86 = vector.shape_cast %85 : vector<1x2x16xf32> to vector<2x16xf32>
    %87 = vector.extract_strided_slice %4 {offsets = [3, 0, 0], sizes = [1, 16, 16], strides = [1, 1, 1]} : vector<4x16x16xf32> to vector<1x16x16xf32>
    %88 = vector.shape_cast %87 : vector<1x16x16xf32> to vector<16x16xf32>
    %cst_36 = arith.constant dense<0.000000e+00> : vector<2x16xf32>
    %89 = tpu.matmul %62, %88, %cst_36 {dimension_numbers = #tpu.dot_dimension_numbers<[1], [0], [0], [1], [0, 0, 1, 1], [], []>} : vector<2x16xf32>, vector<16x16xf32>, vector<2x16xf32> -> vector<2x16xf32>
    %90 = arith.addf %86, %89 : vector<2x16xf32>
    %91 = arith.negf %72 : vector<2x16xf32>
    %92 = math.exp %91 : vector<2x16xf32>
    %cst_37 = arith.constant 1.000000e+00 : f32
    %93 = vector.broadcast %cst_37 : f32 to vector<2x16xf32>
    %94 = arith.addf %93, %92 : vector<2x16xf32>
    %95 = arith.divf %93, %94 : vector<2x16xf32>
    %96 = arith.negf %78 : vector<2x16xf32>
    %97 = math.exp %96 : vector<2x16xf32>
    %cst_38 = arith.constant 1.000000e+00 : f32
    %98 = vector.broadcast %cst_38 : f32 to vector<2x16xf32>
    %99 = arith.addf %98, %97 : vector<2x16xf32>
    %100 = arith.divf %98, %99 : vector<2x16xf32>
    %101 = math.tanh %84 : vector<2x16xf32>
    %102 = arith.negf %90 : vector<2x16xf32>
    %103 = math.exp %102 : vector<2x16xf32>
    %cst_39 = arith.constant 1.000000e+00 : f32
    %104 = vector.broadcast %cst_39 : f32 to vector<2x16xf32>
    %105 = arith.addf %104, %103 : vector<2x16xf32>
    %106 = arith.divf %104, %105 : vector<2x16xf32>
    %107 = arith.mulf %100, %63 : vector<2x16xf32>
    %108 = arith.mulf %95, %101 : vector<2x16xf32>
    %109 = arith.addf %107, %108 : vector<2x16xf32>
    %110 = math.tanh %109 : vector<2x16xf32>
    %111 = arith.mulf %106, %110 : vector<2x16xf32>
    %c0_40 = arith.constant 0 : index
    %c0_41 = arith.constant 0 : index
    %112 = vector.load %arg10[%c0_40, %c0_41] : memref<2x16xf32, #tpu.memory_space<vmem>>, vector<2x16xf32>
    tpu.vector_store %arg10[%c0_40, %c0_41], %109 {strides = array<i32>} : memref<2x16xf32, #tpu.memory_space<vmem>>, vector<2x16xf32>,
    %c0_42 = arith.constant 0 : index
    %c0_43 = arith.constant 0 : index
    %113 = vector.load %arg9[%c0_42, %c0_43] : memref<2x16xf32, #tpu.memory_space<vmem>>, vector<2x16xf32>
    tpu.vector_store %arg9[%c0_42, %c0_43], %111 {strides = array<i32>} : memref<2x16xf32, #tpu.memory_space<vmem>>, vector<2x16xf32>,
    %114 = arith.index_cast %61 : i32 to index
    %c0_44 = arith.constant 0 : index
    %c0_45 = arith.constant 0 : index
    %115 = vector.load %arg6[%114, %c0_44, %c0_45] : memref<8x2x16xf32, #tpu.memory_space<vmem>>, vector<1x2x16xf32>
    %116 = vector.shape_cast %115 : vector<1x2x16xf32> to vector<2x16xf32>
    %117 = vector.shape_cast %111 : vector<2x16xf32> to vector<1x2x16xf32>
    tpu.vector_store %arg6[%114, %c0_44, %c0_45], %117 {strides = array<i32>} : memref<8x2x16xf32, #tpu.memory_space<vmem>>, vector<1x2x16xf32>,
    %c1_i32 = arith.constant 1 : i32
    %c0_46 = arith.constant 0 : index
    %c0_47 = arith.constant 0 : index
    %118 = vector.load %arg7[%c0_46, %c0_47] : memref<2x16xf32, #tpu.memory_space<vmem>>, vector<2x16xf32>
    %c0_48 = arith.constant 0 : index
    %c0_49 = arith.constant 0 : index
    %119 = vector.load %arg8[%c0_48, %c0_49] : memref<2x16xf32, #tpu.memory_space<vmem>>, vector<2x16xf32>
    %120 = arith.index_cast %c1_i32 : i32 to index
    %c0_50 = arith.constant 0 : index
    %c0_51 = arith.constant 0 : index
    %c0_52 = arith.constant 0 : index
    %121 = vector.load %arg1[%120, %c0_50, %c0_51, %c0_52] : memref<8x4x2x16xf32, #tpu.memory_space<vmem>>, vector<1x4x2x16xf32>
    %122 = vector.shape_cast %121 : vector<1x4x2x16xf32> to vector<4x2x16xf32>
    %123 = vector.extract_strided_slice %122 {offsets = [0, 0, 0], sizes = [1, 2, 16], strides = [1, 1, 1]} : vector<4x2x16xf32> to vector<1x2x16xf32>
    %124 = vector.shape_cast %123 : vector<1x2x16xf32> to vector<2x16xf32>
    %125 = vector.extract_strided_slice %3 {offsets = [0, 0, 0], sizes = [1, 16, 16], strides = [1, 1, 1]} : vector<4x16x16xf32> to vector<1x16x16xf32>
    %126 = vector.shape_cast %125 : vector<1x16x16xf32> to vector<16x16xf32>
    %cst_53 = arith.constant dense<0.000000e+00> : vector<2x16xf32>
    %127 = tpu.matmul %118, %126, %cst_53 {dimension_numbers = #tpu.dot_dimension_numbers<[1], [0], [0], [1], [0, 0, 1, 1], [], []>} : vector<2x16xf32>, vector<16x16xf32>, vector<2x16xf32> -> vector<2x16xf32>
    %128 = arith.addf %124, %127 : vector<2x16xf32>
    %129 = vector.extract_strided_slice %122 {offsets = [1, 0, 0], sizes = [1, 2, 16], strides = [1, 1, 1]} : vector<4x2x16xf32> to vector<1x2x16xf32>
    %130 = vector.shape_cast %129 : vector<1x2x16xf32> to vector<2x16xf32>
    %131 = vector.extract_strided_slice %3 {offsets = [1, 0, 0], sizes = [1, 16, 16], strides = [1, 1, 1]} : vector<4x16x16xf32> to vector<1x16x16xf32>
    %132 = vector.shape_cast %131 : vector<1x16x16xf32> to vector<16x16xf32>
    %cst_54 = arith.constant dense<0.000000e+00> : vector<2x16xf32>
    %133 = tpu.matmul %118, %132, %cst_54 {dimension_numbers = #tpu.dot_dimension_numbers<[1], [0], [0], [1], [0, 0, 1, 1], [], []>} : vector<2x16xf32>, vector<16x16xf32>, vector<2x16xf32> -> vector<2x16xf32>
    %134 = arith.addf %130, %133 : vector<2x16xf32>
    %135 = vector.extract_strided_slice %122 {offsets = [2, 0, 0], sizes = [1, 2, 16], strides = [1, 1, 1]} : vector<4x2x16xf32> to vector<1x2x16xf32>
    %136 = vector.shape_cast %135 : vector<1x2x16xf32> to vector<2x16xf32>
    %137 = vector.extract_strided_slice %3 {offsets = [2, 0, 0], sizes = [1, 16, 16], strides = [1, 1, 1]} : vector<4x16x16xf32> to vector<1x16x16xf32>
    %138 = vector.shape_cast %137 : vector<1x16x16xf32> to vector<16x16xf32>
    %cst_55 = arith.constant dense<0.000000e+00> : vector<2x16xf32>
    %139 = tpu.matmul %118, %138, %cst_55 {dimension_numbers = #tpu.dot_dimension_numbers<[1], [0], [0], [1], [0, 0, 1, 1], [], []>} : vector<2x16xf32>, vector<16x16xf32>, vector<2x16xf32> -> vector<2x16xf32>
    %140 = arith.addf %136, %139 : vector<2x16xf32>
    %141 = vector.extract_strided_slice %122 {offsets = [3, 0, 0], sizes = [1, 2, 16], strides = [1, 1, 1]} : vector<4x2x16xf32> to vector<1x2x16xf32>
    %142 = vector.shape_cast %141 : vector<1x2x16xf32> to vector<2x16xf32>
    %143 = vector.extract_strided_slice %3 {offsets = [3, 0, 0], sizes = [1, 16, 16], strides = [1, 1, 1]} : vector<4x16x16xf32> to vector<1x16x16xf32>
    %144 = vector.shape_cast %143 : vector<1x16x16xf32> to vector<16x16xf32>
    %cst_56 = arith.constant dense<0.000000e+00> : vector<2x16xf32>
    %145 = tpu.matmul %118, %144, %cst_56 {dimension_numbers = #tpu.dot_dimension_numbers<[1], [0], [0], [1], [0, 0, 1, 1], [], []>} : vector<2x16xf32>, vector<16x16xf32>, vector<2x16xf32> -> vector<2x16xf32>
    %146 = arith.addf %142, %145 : vector<2x16xf32>
    %147 = arith.negf %128 : vector<2x16xf32>
    %148 = math.exp %147 : vector<2x16xf32>
    %cst_57 = arith.constant 1.000000e+00 : f32
    %149 = vector.broadcast %cst_57 : f32 to vector<2x16xf32>
    %150 = arith.addf %149, %148 : vector<2x16xf32>
    %151 = arith.divf %149, %150 : vector<2x16xf32>
    %152 = arith.negf %134 : vector<2x16xf32>
    %153 = math.exp %152 : vector<2x16xf32>
    %cst_58 = arith.constant 1.000000e+00 : f32
    %154 = vector.broadcast %cst_58 : f32 to vector<2x16xf32>
    %155 = arith.addf %154, %153 : vector<2x16xf32>
    %156 = arith.divf %154, %155 : vector<2x16xf32>
    %157 = math.tanh %140 : vector<2x16xf32>
    %158 = arith.negf %146 : vector<2x16xf32>
    %159 = math.exp %158 : vector<2x16xf32>
    %cst_59 = arith.constant 1.000000e+00 : f32
    %160 = vector.broadcast %cst_59 : f32 to vector<2x16xf32>
    %161 = arith.addf %160, %159 : vector<2x16xf32>
    %162 = arith.divf %160, %161 : vector<2x16xf32>
    %163 = arith.mulf %156, %119 : vector<2x16xf32>
    %164 = arith.mulf %151, %157 : vector<2x16xf32>
    %165 = arith.addf %163, %164 : vector<2x16xf32>
    %166 = math.tanh %165 : vector<2x16xf32>
    %167 = arith.mulf %162, %166 : vector<2x16xf32>
    %c0_60 = arith.constant 0 : index
    %c0_61 = arith.constant 0 : index
    %168 = vector.load %arg8[%c0_60, %c0_61] : memref<2x16xf32, #tpu.memory_space<vmem>>, vector<2x16xf32>
    tpu.vector_store %arg8[%c0_60, %c0_61], %165 {strides = array<i32>} : memref<2x16xf32, #tpu.memory_space<vmem>>, vector<2x16xf32>,
    %c0_62 = arith.constant 0 : index
    %c0_63 = arith.constant 0 : index
    %169 = vector.load %arg7[%c0_62, %c0_63] : memref<2x16xf32, #tpu.memory_space<vmem>>, vector<2x16xf32>
    tpu.vector_store %arg7[%c0_62, %c0_63], %167 {strides = array<i32>} : memref<2x16xf32, #tpu.memory_space<vmem>>, vector<2x16xf32>,
    %170 = arith.index_cast %c1_i32 : i32 to index
    %c0_64 = arith.constant 0 : index
    %c0_65 = arith.constant 0 : index
    %171 = vector.load %arg5[%170, %c0_64, %c0_65] : memref<8x2x16xf32, #tpu.memory_space<vmem>>, vector<1x2x16xf32>
    %172 = vector.shape_cast %171 : vector<1x2x16xf32> to vector<2x16xf32>
    %173 = vector.shape_cast %167 : vector<2x16xf32> to vector<1x2x16xf32>
    tpu.vector_store %arg5[%170, %c0_64, %c0_65], %173 {strides = array<i32>} : memref<8x2x16xf32, #tpu.memory_space<vmem>>, vector<1x2x16xf32>,
    %c7_i32_66 = arith.constant 7 : i32
    %174 = arith.subi %c7_i32_66, %c1_i32 : i32
    %c0_67 = arith.constant 0 : index
    %c0_68 = arith.constant 0 : index
    %175 = vector.load %arg9[%c0_67, %c0_68] : memref<2x16xf32, #tpu.memory_space<vmem>>, vector<2x16xf32>
    %c0_69 = arith.constant 0 : index
    %c0_70 = arith.constant 0 : index
    %176 = vector.load %arg10[%c0_69, %c0_70] : memref<2x16xf32, #tpu.memory_space<vmem>>, vector<2x16xf32>
    %177 = arith.index_cast %174 : i32 to index
    %c0_71 = arith.constant 0 : index
    %c0_72 = arith.constant 0 : index
    %c0_73 = arith.constant 0 : index
    %178 = vector.load %arg2[%177, %c0_71, %c0_72, %c0_73] : memref<8x4x2x16xf32, #tpu.memory_space<vmem>>, vector<1x4x2x16xf32>
    %179 = vector.shape_cast %178 : vector<1x4x2x16xf32> to vector<4x2x16xf32>
    %180 = vector.extract_strided_slice %179 {offsets = [0, 0, 0], sizes = [1, 2, 16], strides = [1, 1, 1]} : vector<4x2x16xf32> to vector<1x2x16xf32>
    %181 = vector.shape_cast %180 : vector<1x2x16xf32> to vector<2x16xf32>
    %182 = vector.extract_strided_slice %4 {offsets = [0, 0, 0], sizes = [1, 16, 16], strides = [1, 1, 1]} : vector<4x16x16xf32> to vector<1x16x16xf32>
    %183 = vector.shape_cast %182 : vector<1x16x16xf32> to vector<16x16xf32>
    %cst_74 = arith.constant dense<0.000000e+00> : vector<2x16xf32>
    %184 = tpu.matmul %175, %183, %cst_74 {dimension_numbers = #tpu.dot_dimension_numbers<[1], [0], [0], [1], [0, 0, 1, 1], [], []>} : vector<2x16xf32>, vector<16x16xf32>, vector<2x16xf32> -> vector<2x16xf32>
    %185 = arith.addf %181, %184 : vector<2x16xf32>
    %186 = vector.extract_strided_slice %179 {offsets = [1, 0, 0], sizes = [1, 2, 16], strides = [1, 1, 1]} : vector<4x2x16xf32> to vector<1x2x16xf32>
    %187 = vector.shape_cast %186 : vector<1x2x16xf32> to vector<2x16xf32>
    %188 = vector.extract_strided_slice %4 {offsets = [1, 0, 0], sizes = [1, 16, 16], strides = [1, 1, 1]} : vector<4x16x16xf32> to vector<1x16x16xf32>
    %189 = vector.shape_cast %188 : vector<1x16x16xf32> to vector<16x16xf32>
    %cst_75 = arith.constant dense<0.000000e+00> : vector<2x16xf32>
    %190 = tpu.matmul %175, %189, %cst_75 {dimension_numbers = #tpu.dot_dimension_numbers<[1], [0], [0], [1], [0, 0, 1, 1], [], []>} : vector<2x16xf32>, vector<16x16xf32>, vector<2x16xf32> -> vector<2x16xf32>
    %191 = arith.addf %187, %190 : vector<2x16xf32>
    %192 = vector.extract_strided_slice %179 {offsets = [2, 0, 0], sizes = [1, 2, 16], strides = [1, 1, 1]} : vector<4x2x16xf32> to vector<1x2x16xf32>
    %193 = vector.shape_cast %192 : vector<1x2x16xf32> to vector<2x16xf32>
    %194 = vector.extract_strided_slice %4 {offsets = [2, 0, 0], sizes = [1, 16, 16], strides = [1, 1, 1]} : vector<4x16x16xf32> to vector<1x16x16xf32>
    %195 = vector.shape_cast %194 : vector<1x16x16xf32> to vector<16x16xf32>
    %cst_76 = arith.constant dense<0.000000e+00> : vector<2x16xf32>
    %196 = tpu.matmul %175, %195, %cst_76 {dimension_numbers = #tpu.dot_dimension_numbers<[1], [0], [0], [1], [0, 0, 1, 1], [], []>} : vector<2x16xf32>, vector<16x16xf32>, vector<2x16xf32> -> vector<2x16xf32>
    %197 = arith.addf %193, %196 : vector<2x16xf32>
    %198 = vector.extract_strided_slice %179 {offsets = [3, 0, 0], sizes = [1, 2, 16], strides = [1, 1, 1]} : vector<4x2x16xf32> to vector<1x2x16xf32>
    %199 = vector.shape_cast %198 : vector<1x2x16xf32> to vector<2x16xf32>
    %200 = vector.extract_strided_slice %4 {offsets = [3, 0, 0], sizes = [1, 16, 16], strides = [1, 1, 1]} : vector<4x16x16xf32> to vector<1x16x16xf32>
    %201 = vector.shape_cast %200 : vector<1x16x16xf32> to vector<16x16xf32>
    %cst_77 = arith.constant dense<0.000000e+00> : vector<2x16xf32>
    %202 = tpu.matmul %175, %201, %cst_77 {dimension_numbers = #tpu.dot_dimension_numbers<[1], [0], [0], [1], [0, 0, 1, 1], [], []>} : vector<2x16xf32>, vector<16x16xf32>, vector<2x16xf32> -> vector<2x16xf32>
    %203 = arith.addf %199, %202 : vector<2x16xf32>
    %204 = arith.negf %185 : vector<2x16xf32>
    %205 = math.exp %204 : vector<2x16xf32>
    %cst_78 = arith.constant 1.000000e+00 : f32
    %206 = vector.broadcast %cst_78 : f32 to vector<2x16xf32>
    %207 = arith.addf %206, %205 : vector<2x16xf32>
    %208 = arith.divf %206, %207 : vector<2x16xf32>
    %209 = arith.negf %191 : vector<2x16xf32>
    %210 = math.exp %209 : vector<2x16xf32>
    %cst_79 = arith.constant 1.000000e+00 : f32
    %211 = vector.broadcast %cst_79 : f32 to vector<2x16xf32>
    %212 = arith.addf %211, %210 : vector<2x16xf32>
    %213 = arith.divf %211, %212 : vector<2x16xf32>
    %214 = math.tanh %197 : vector<2x16xf32>
    %215 = arith.negf %203 : vector<2x16xf32>
    %216 = math.exp %215 : vector<2x16xf32>
    %cst_80 = arith.constant 1.000000e+00 : f32
    %217 = vector.broadcast %cst_80 : f32 to vector<2x16xf32>
    %218 = arith.addf %217, %216 : vector<2x16xf32>
    %219 = arith.divf %217, %218 : vector<2x16xf32>
    %220 = arith.mulf %213, %176 : vector<2x16xf32>
    %221 = arith.mulf %208, %214 : vector<2x16xf32>
    %222 = arith.addf %220, %221 : vector<2x16xf32>
    %223 = math.tanh %222 : vector<2x16xf32>
    %224 = arith.mulf %219, %223 : vector<2x16xf32>
    %c0_81 = arith.constant 0 : index
    %c0_82 = arith.constant 0 : index
    %225 = vector.load %arg10[%c0_81, %c0_82] : memref<2x16xf32, #tpu.memory_space<vmem>>, vector<2x16xf32>
    tpu.vector_store %arg10[%c0_81, %c0_82], %222 {strides = array<i32>} : memref<2x16xf32, #tpu.memory_space<vmem>>, vector<2x16xf32>,
    %c0_83 = arith.constant 0 : index
    %c0_84 = arith.constant 0 : index
    %226 = vector.load %arg9[%c0_83, %c0_84] : memref<2x16xf32, #tpu.memory_space<vmem>>, vector<2x16xf32>
    tpu.vector_store %arg9[%c0_83, %c0_84], %224 {strides = array<i32>} : memref<2x16xf32, #tpu.memory_space<vmem>>, vector<2x16xf32>,
    %227 = arith.index_cast %174 : i32 to index
    %c0_85 = arith.constant 0 : index
    %c0_86 = arith.constant 0 : index
    %228 = vector.load %arg6[%227, %c0_85, %c0_86] : memref<8x2x16xf32, #tpu.memory_space<vmem>>, vector<1x2x16xf32>
    %229 = vector.shape_cast %228 : vector<1x2x16xf32> to vector<2x16xf32>
    %230 = vector.shape_cast %224 : vector<2x16xf32> to vector<1x2x16xf32>
    tpu.vector_store %arg6[%227, %c0_85, %c0_86], %230 {strides = array<i32>} : memref<8x2x16xf32, #tpu.memory_space<vmem>>, vector<1x2x16xf32>,
    %c2_i32 = arith.constant 2 : i32
    %c0_87 = arith.constant 0 : index
    %c0_88 = arith.constant 0 : index
    %231 = vector.load %arg7[%c0_87, %c0_88] : memref<2x16xf32, #tpu.memory_space<vmem>>, vector<2x16xf32>
    %c0_89 = arith.constant 0 : index
    %c0_90 = arith.constant 0 : index
    %232 = vector.load %arg8[%c0_89, %c0_90] : memref<2x16xf32, #tpu.memory_space<vmem>>, vector<2x16xf32>
    %233 = arith.index_cast %c2_i32 : i32 to index
    %c0_91 = arith.constant 0 : index
    %c0_92 = arith.constant 0 : index
    %c0_93 = arith.constant 0 : index
    %234 = vector.load %arg1[%233, %c0_91, %c0_92, %c0_93] : memref<8x4x2x16xf32, #tpu.memory_space<vmem>>, vector<1x4x2x16xf32>
    %235 = vector.shape_cast %234 : vector<1x4x2x16xf32> to vector<4x2x16xf32>
    %236 = vector.extract_strided_slice %235 {offsets = [0, 0, 0], sizes = [1, 2, 16], strides = [1, 1, 1]} : vector<4x2x16xf32> to vector<1x2x16xf32>
    %237 = vector.shape_cast %236 : vector<1x2x16xf32> to vector<2x16xf32>
    %238 = vector.extract_strided_slice %3 {offsets = [0, 0, 0], sizes = [1, 16, 16], strides = [1, 1, 1]} : vector<4x16x16xf32> to vector<1x16x16xf32>
    %239 = vector.shape_cast %238 : vector<1x16x16xf32> to vector<16x16xf32>
    %cst_94 = arith.constant dense<0.000000e+00> : vector<2x16xf32>
    %240 = tpu.matmul %231, %239, %cst_94 {dimension_numbers = #tpu.dot_dimension_numbers<[1], [0], [0], [1], [0, 0, 1, 1], [], []>} : vector<2x16xf32>, vector<16x16xf32>, vector<2x16xf32> -> vector<2x16xf32>
    %241 = arith.addf %237, %240 : vector<2x16xf32>
    %242 = vector.extract_strided_slice %235 {offsets = [1, 0, 0], sizes = [1, 2, 16], strides = [1, 1, 1]} : vector<4x2x16xf32> to vector<1x2x16xf32>
    %243 = vector.shape_cast %242 : vector<1x2x16xf32> to vector<2x16xf32>
    %244 = vector.extract_strided_slice %3 {offsets = [1, 0, 0], sizes = [1, 16, 16], strides = [1, 1, 1]} : vector<4x16x16xf32> to vector<1x16x16xf32>
    %245 = vector.shape_cast %244 : vector<1x16x16xf32> to vector<16x16xf32>
    %cst_95 = arith.constant dense<0.000000e+00> : vector<2x16xf32>
    %246 = tpu.matmul %231, %245, %cst_95 {dimension_numbers = #tpu.dot_dimension_numbers<[1], [0], [0], [1], [0, 0, 1, 1], [], []>} : vector<2x16xf32>, vector<16x16xf32>, vector<2x16xf32> -> vector<2x16xf32>
    %247 = arith.addf %243, %246 : vector<2x16xf32>
    %248 = vector.extract_strided_slice %235 {offsets = [2, 0, 0], sizes = [1, 2, 16], strides = [1, 1, 1]} : vector<4x2x16xf32> to vector<1x2x16xf32>
    %249 = vector.shape_cast %248 : vector<1x2x16xf32> to vector<2x16xf32>
    %250 = vector.extract_strided_slice %3 {offsets = [2, 0, 0], sizes = [1, 16, 16], strides = [1, 1, 1]} : vector<4x16x16xf32> to vector<1x16x16xf32>
    %251 = vector.shape_cast %250 : vector<1x16x16xf32> to vector<16x16xf32>
    %cst_96 = arith.constant dense<0.000000e+00> : vector<2x16xf32>
    %252 = tpu.matmul %231, %251, %cst_96 {dimension_numbers = #tpu.dot_dimension_numbers<[1], [0], [0], [1], [0, 0, 1, 1], [], []>} : vector<2x16xf32>, vector<16x16xf32>, vector<2x16xf32> -> vector<2x16xf32>
    %253 = arith.addf %249, %252 : vector<2x16xf32>
    %254 = vector.extract_strided_slice %235 {offsets = [3, 0, 0], sizes = [1, 2, 16], strides = [1, 1, 1]} : vector<4x2x16xf32> to vector<1x2x16xf32>
    %255 = vector.shape_cast %254 : vector<1x2x16xf32> to vector<2x16xf32>
    %256 = vector.extract_strided_slice %3 {offsets = [3, 0, 0], sizes = [1, 16, 16], strides = [1, 1, 1]} : vector<4x16x16xf32> to vector<1x16x16xf32>
    %257 = vector.shape_cast %256 : vector<1x16x16xf32> to vector<16x16xf32>
    %cst_97 = arith.constant dense<0.000000e+00> : vector<2x16xf32>
    %258 = tpu.matmul %231, %257, %cst_97 {dimension_numbers = #tpu.dot_dimension_numbers<[1], [0], [0], [1], [0, 0, 1, 1], [], []>} : vector<2x16xf32>, vector<16x16xf32>, vector<2x16xf32> -> vector<2x16xf32>
    %259 = arith.addf %255, %258 : vector<2x16xf32>
    %260 = arith.negf %241 : vector<2x16xf32>
    %261 = math.exp %260 : vector<2x16xf32>
    %cst_98 = arith.constant 1.000000e+00 : f32
    %262 = vector.broadcast %cst_98 : f32 to vector<2x16xf32>
    %263 = arith.addf %262, %261 : vector<2x16xf32>
    %264 = arith.divf %262, %263 : vector<2x16xf32>
    %265 = arith.negf %247 : vector<2x16xf32>
    %266 = math.exp %265 : vector<2x16xf32>
    %cst_99 = arith.constant 1.000000e+00 : f32
    %267 = vector.broadcast %cst_99 : f32 to vector<2x16xf32>
    %268 = arith.addf %267, %266 : vector<2x16xf32>
    %269 = arith.divf %267, %268 : vector<2x16xf32>
    %270 = math.tanh %253 : vector<2x16xf32>
    %271 = arith.negf %259 : vector<2x16xf32>
    %272 = math.exp %271 : vector<2x16xf32>
    %cst_100 = arith.constant 1.000000e+00 : f32
    %273 = vector.broadcast %cst_100 : f32 to vector<2x16xf32>
    %274 = arith.addf %273, %272 : vector<2x16xf32>
    %275 = arith.divf %273, %274 : vector<2x16xf32>
    %276 = arith.mulf %269, %232 : vector<2x16xf32>
    %277 = arith.mulf %264, %270 : vector<2x16xf32>
    %278 = arith.addf %276, %277 : vector<2x16xf32>
    %279 = math.tanh %278 : vector<2x16xf32>
    %280 = arith.mulf %275, %279 : vector<2x16xf32>
    %c0_101 = arith.constant 0 : index
    %c0_102 = arith.constant 0 : index
    %281 = vector.load %arg8[%c0_101, %c0_102] : memref<2x16xf32, #tpu.memory_space<vmem>>, vector<2x16xf32>
    tpu.vector_store %arg8[%c0_101, %c0_102], %278 {strides = array<i32>} : memref<2x16xf32, #tpu.memory_space<vmem>>, vector<2x16xf32>,
    %c0_103 = arith.constant 0 : index
    %c0_104 = arith.constant 0 : index
    %282 = vector.load %arg7[%c0_103, %c0_104] : memref<2x16xf32, #tpu.memory_space<vmem>>, vector<2x16xf32>
    tpu.vector_store %arg7[%c0_103, %c0_104], %280 {strides = array<i32>} : memref<2x16xf32, #tpu.memory_space<vmem>>, vector<2x16xf32>,
    %283 = arith.index_cast %c2_i32 : i32 to index
    %c0_105 = arith.constant 0 : index
    %c0_106 = arith.constant 0 : index
    %284 = vector.load %arg5[%283, %c0_105, %c0_106] : memref<8x2x16xf32, #tpu.memory_space<vmem>>, vector<1x2x16xf32>
    %285 = vector.shape_cast %284 : vector<1x2x16xf32> to vector<2x16xf32>
    %286 = vector.shape_cast %280 : vector<2x16xf32> to vector<1x2x16xf32>
    tpu.vector_store %arg5[%283, %c0_105, %c0_106], %286 {strides = array<i32>} : memref<8x2x16xf32, #tpu.memory_space<vmem>>, vector<1x2x16xf32>,
    %c7_i32_107 = arith.constant 7 : i32
    %287 = arith.subi %c7_i32_107, %c2_i32 : i32
    %c0_108 = arith.constant 0 : index
    %c0_109 = arith.constant 0 : index
    %288 = vector.load %arg9[%c0_108, %c0_109] : memref<2x16xf32, #tpu.memory_space<vmem>>, vector<2x16xf32>
    %c0_110 = arith.constant 0 : index
    %c0_111 = arith.constant 0 : index
    %289 = vector.load %arg10[%c0_110, %c0_111] : memref<2x16xf32, #tpu.memory_space<vmem>>, vector<2x16xf32>
    %290 = arith.index_cast %287 : i32 to index
    %c0_112 = arith.constant 0 : index
    %c0_113 = arith.constant 0 : index
    %c0_114 = arith.constant 0 : index
    %291 = vector.load %arg2[%290, %c0_112, %c0_113, %c0_114] : memref<8x4x2x16xf32, #tpu.memory_space<vmem>>, vector<1x4x2x16xf32>
    %292 = vector.shape_cast %291 : vector<1x4x2x16xf32> to vector<4x2x16xf32>
    %293 = vector.extract_strided_slice %292 {offsets = [0, 0, 0], sizes = [1, 2, 16], strides = [1, 1, 1]} : vector<4x2x16xf32> to vector<1x2x16xf32>
    %294 = vector.shape_cast %293 : vector<1x2x16xf32> to vector<2x16xf32>
    %295 = vector.extract_strided_slice %4 {offsets = [0, 0, 0], sizes = [1, 16, 16], strides = [1, 1, 1]} : vector<4x16x16xf32> to vector<1x16x16xf32>
    %296 = vector.shape_cast %295 : vector<1x16x16xf32> to vector<16x16xf32>
    %cst_115 = arith.constant dense<0.000000e+00> : vector<2x16xf32>
    %297 = tpu.matmul %288, %296, %cst_115 {dimension_numbers = #tpu.dot_dimension_numbers<[1], [0], [0], [1], [0, 0, 1, 1], [], []>} : vector<2x16xf32>, vector<16x16xf32>, vector<2x16xf32> -> vector<2x16xf32>
    %298 = arith.addf %294, %297 : vector<2x16xf32>
    %299 = vector.extract_strided_slice %292 {offsets = [1, 0, 0], sizes = [1, 2, 16], strides = [1, 1, 1]} : vector<4x2x16xf32> to vector<1x2x16xf32>
    %300 = vector.shape_cast %299 : vector<1x2x16xf32> to vector<2x16xf32>
    %301 = vector.extract_strided_slice %4 {offsets = [1, 0, 0], sizes = [1, 16, 16], strides = [1, 1, 1]} : vector<4x16x16xf32> to vector<1x16x16xf32>
    %302 = vector.shape_cast %301 : vector<1x16x16xf32> to vector<16x16xf32>
    %cst_116 = arith.constant dense<0.000000e+00> : vector<2x16xf32>
    %303 = tpu.matmul %288, %302, %cst_116 {dimension_numbers = #tpu.dot_dimension_numbers<[1], [0], [0], [1], [0, 0, 1, 1], [], []>} : vector<2x16xf32>, vector<16x16xf32>, vector<2x16xf32> -> vector<2x16xf32>
    %304 = arith.addf %300, %303 : vector<2x16xf32>
    %305 = vector.extract_strided_slice %292 {offsets = [2, 0, 0], sizes = [1, 2, 16], strides = [1, 1, 1]} : vector<4x2x16xf32> to vector<1x2x16xf32>
    %306 = vector.shape_cast %305 : vector<1x2x16xf32> to vector<2x16xf32>
    %307 = vector.extract_strided_slice %4 {offsets = [2, 0, 0], sizes = [1, 16, 16], strides = [1, 1, 1]} : vector<4x16x16xf32> to vector<1x16x16xf32>
    %308 = vector.shape_cast %307 : vector<1x16x16xf32> to vector<16x16xf32>
    %cst_117 = arith.constant dense<0.000000e+00> : vector<2x16xf32>
    %309 = tpu.matmul %288, %308, %cst_117 {dimension_numbers = #tpu.dot_dimension_numbers<[1], [0], [0], [1], [0, 0, 1, 1], [], []>} : vector<2x16xf32>, vector<16x16xf32>, vector<2x16xf32> -> vector<2x16xf32>
    %310 = arith.addf %306, %309 : vector<2x16xf32>
    %311 = vector.extract_strided_slice %292 {offsets = [3, 0, 0], sizes = [1, 2, 16], strides = [1, 1, 1]} : vector<4x2x16xf32> to vector<1x2x16xf32>
    %312 = vector.shape_cast %311 : vector<1x2x16xf32> to vector<2x16xf32>
    %313 = vector.extract_strided_slice %4 {offsets = [3, 0, 0], sizes = [1, 16, 16], strides = [1, 1, 1]} : vector<4x16x16xf32> to vector<1x16x16xf32>
    %314 = vector.shape_cast %313 : vector<1x16x16xf32> to vector<16x16xf32>
    %cst_118 = arith.constant dense<0.000000e+00> : vector<2x16xf32>
    %315 = tpu.matmul %288, %314, %cst_118 {dimension_numbers = #tpu.dot_dimension_numbers<[1], [0], [0], [1], [0, 0, 1, 1], [], []>} : vector<2x16xf32>, vector<16x16xf32>, vector<2x16xf32> -> vector<2x16xf32>
    %316 = arith.addf %312, %315 : vector<2x16xf32>
    %317 = arith.negf %298 : vector<2x16xf32>
    %318 = math.exp %317 : vector<2x16xf32>
    %cst_119 = arith.constant 1.000000e+00 : f32
    %319 = vector.broadcast %cst_119 : f32 to vector<2x16xf32>
    %320 = arith.addf %319, %318 : vector<2x16xf32>
    %321 = arith.divf %319, %320 : vector<2x16xf32>
    %322 = arith.negf %304 : vector<2x16xf32>
    %323 = math.exp %322 : vector<2x16xf32>
    %cst_120 = arith.constant 1.000000e+00 : f32
    %324 = vector.broadcast %cst_120 : f32 to vector<2x16xf32>
    %325 = arith.addf %324, %323 : vector<2x16xf32>
    %326 = arith.divf %324, %325 : vector<2x16xf32>
    %327 = math.tanh %310 : vector<2x16xf32>
    %328 = arith.negf %316 : vector<2x16xf32>
    %329 = math.exp %328 : vector<2x16xf32>
    %cst_121 = arith.constant 1.000000e+00 : f32
    %330 = vector.broadcast %cst_121 : f32 to vector<2x16xf32>
    %331 = arith.addf %330, %329 : vector<2x16xf32>
    %332 = arith.divf %330, %331 : vector<2x16xf32>
    %333 = arith.mulf %326, %289 : vector<2x16xf32>
    %334 = arith.mulf %321, %327 : vector<2x16xf32>
    %335 = arith.addf %333, %334 : vector<2x16xf32>
    %336 = math.tanh %335 : vector<2x16xf32>
    %337 = arith.mulf %332, %336 : vector<2x16xf32>
    %c0_122 = arith.constant 0 : index
    %c0_123 = arith.constant 0 : index
    %338 = vector.load %arg10[%c0_122, %c0_123] : memref<2x16xf32, #tpu.memory_space<vmem>>, vector<2x16xf32>
    tpu.vector_store %arg10[%c0_122, %c0_123], %335 {strides = array<i32>} : memref<2x16xf32, #tpu.memory_space<vmem>>, vector<2x16xf32>,
    %c0_124 = arith.constant 0 : index
    %c0_125 = arith.constant 0 : index
    %339 = vector.load %arg9[%c0_124, %c0_125] : memref<2x16xf32, #tpu.memory_space<vmem>>, vector<2x16xf32>
    tpu.vector_store %arg9[%c0_124, %c0_125], %337 {strides = array<i32>} : memref<2x16xf32, #tpu.memory_space<vmem>>, vector<2x16xf32>,
    %340 = arith.index_cast %287 : i32 to index
    %c0_126 = arith.constant 0 : index
    %c0_127 = arith.constant 0 : index
    %341 = vector.load %arg6[%340, %c0_126, %c0_127] : memref<8x2x16xf32, #tpu.memory_space<vmem>>, vector<1x2x16xf32>
    %342 = vector.shape_cast %341 : vector<1x2x16xf32> to vector<2x16xf32>
    %343 = vector.shape_cast %337 : vector<2x16xf32> to vector<1x2x16xf32>
    tpu.vector_store %arg6[%340, %c0_126, %c0_127], %343 {strides = array<i32>} : memref<8x2x16xf32, #tpu.memory_space<vmem>>, vector<1x2x16xf32>,
    %c3_i32 = arith.constant 3 : i32
    %c0_128 = arith.constant 0 : index
    %c0_129 = arith.constant 0 : index
    %344 = vector.load %arg7[%c0_128, %c0_129] : memref<2x16xf32, #tpu.memory_space<vmem>>, vector<2x16xf32>
    %c0_130 = arith.constant 0 : index
    %c0_131 = arith.constant 0 : index
    %345 = vector.load %arg8[%c0_130, %c0_131] : memref<2x16xf32, #tpu.memory_space<vmem>>, vector<2x16xf32>
    %346 = arith.index_cast %c3_i32 : i32 to index
    %c0_132 = arith.constant 0 : index
    %c0_133 = arith.constant 0 : index
    %c0_134 = arith.constant 0 : index
    %347 = vector.load %arg1[%346, %c0_132, %c0_133, %c0_134] : memref<8x4x2x16xf32, #tpu.memory_space<vmem>>, vector<1x4x2x16xf32>
    %348 = vector.shape_cast %347 : vector<1x4x2x16xf32> to vector<4x2x16xf32>
    %349 = vector.extract_strided_slice %348 {offsets = [0, 0, 0], sizes = [1, 2, 16], strides = [1, 1, 1]} : vector<4x2x16xf32> to vector<1x2x16xf32>
    %350 = vector.shape_cast %349 : vector<1x2x16xf32> to vector<2x16xf32>
    %351 = vector.extract_strided_slice %3 {offsets = [0, 0, 0], sizes = [1, 16, 16], strides = [1, 1, 1]} : vector<4x16x16xf32> to vector<1x16x16xf32>
    %352 = vector.shape_cast %351 : vector<1x16x16xf32> to vector<16x16xf32>
    %cst_135 = arith.constant dense<0.000000e+00> : vector<2x16xf32>
    %353 = tpu.matmul %344, %352, %cst_135 {dimension_numbers = #tpu.dot_dimension_numbers<[1], [0], [0], [1], [0, 0, 1, 1], [], []>} : vector<2x16xf32>, vector<16x16xf32>, vector<2x16xf32> -> vector<2x16xf32>
    %354 = arith.addf %350, %353 : vector<2x16xf32>
    %355 = vector.extract_strided_slice %348 {offsets = [1, 0, 0], sizes = [1, 2, 16], strides = [1, 1, 1]} : vector<4x2x16xf32> to vector<1x2x16xf32>
    %356 = vector.shape_cast %355 : vector<1x2x16xf32> to vector<2x16xf32>
    %357 = vector.extract_strided_slice %3 {offsets = [1, 0, 0], sizes = [1, 16, 16], strides = [1, 1, 1]} : vector<4x16x16xf32> to vector<1x16x16xf32>
    %358 = vector.shape_cast %357 : vector<1x16x16xf32> to vector<16x16xf32>
    %cst_136 = arith.constant dense<0.000000e+00> : vector<2x16xf32>
    %359 = tpu.matmul %344, %358, %cst_136 {dimension_numbers = #tpu.dot_dimension_numbers<[1], [0], [0], [1], [0, 0, 1, 1], [], []>} : vector<2x16xf32>, vector<16x16xf32>, vector<2x16xf32> -> vector<2x16xf32>
    %360 = arith.addf %356, %359 : vector<2x16xf32>
    %361 = vector.extract_strided_slice %348 {offsets = [2, 0, 0], sizes = [1, 2, 16], strides = [1, 1, 1]} : vector<4x2x16xf32> to vector<1x2x16xf32>
    %362 = vector.shape_cast %361 : vector<1x2x16xf32> to vector<2x16xf32>
    %363 = vector.extract_strided_slice %3 {offsets = [2, 0, 0], sizes = [1, 16, 16], strides = [1, 1, 1]} : vector<4x16x16xf32> to vector<1x16x16xf32>
    %364 = vector.shape_cast %363 : vector<1x16x16xf32> to vector<16x16xf32>
    %cst_137 = arith.constant dense<0.000000e+00> : vector<2x16xf32>
    %365 = tpu.matmul %344, %364, %cst_137 {dimension_numbers = #tpu.dot_dimension_numbers<[1], [0], [0], [1], [0, 0, 1, 1], [], []>} : vector<2x16xf32>, vector<16x16xf32>, vector<2x16xf32> -> vector<2x16xf32>
    %366 = arith.addf %362, %365 : vector<2x16xf32>
    %367 = vector.extract_strided_slice %348 {offsets = [3, 0, 0], sizes = [1, 2, 16], strides = [1, 1, 1]} : vector<4x2x16xf32> to vector<1x2x16xf32>
    %368 = vector.shape_cast %367 : vector<1x2x16xf32> to vector<2x16xf32>
    %369 = vector.extract_strided_slice %3 {offsets = [3, 0, 0], sizes = [1, 16, 16], strides = [1, 1, 1]} : vector<4x16x16xf32> to vector<1x16x16xf32>
    %370 = vector.shape_cast %369 : vector<1x16x16xf32> to vector<16x16xf32>
    %cst_138 = arith.constant dense<0.000000e+00> : vector<2x16xf32>
    %371 = tpu.matmul %344, %370, %cst_138 {dimension_numbers = #tpu.dot_dimension_numbers<[1], [0], [0], [1], [0, 0, 1, 1], [], []>} : vector<2x16xf32>, vector<16x16xf32>, vector<2x16xf32> -> vector<2x16xf32>
    %372 = arith.addf %368, %371 : vector<2x16xf32>
    %373 = arith.negf %354 : vector<2x16xf32>
    %374 = math.exp %373 : vector<2x16xf32>
    %cst_139 = arith.constant 1.000000e+00 : f32
    %375 = vector.broadcast %cst_139 : f32 to vector<2x16xf32>
    %376 = arith.addf %375, %374 : vector<2x16xf32>
    %377 = arith.divf %375, %376 : vector<2x16xf32>
    %378 = arith.negf %360 : vector<2x16xf32>
    %379 = math.exp %378 : vector<2x16xf32>
    %cst_140 = arith.constant 1.000000e+00 : f32
    %380 = vector.broadcast %cst_140 : f32 to vector<2x16xf32>
    %381 = arith.addf %380, %379 : vector<2x16xf32>
    %382 = arith.divf %380, %381 : vector<2x16xf32>
    %383 = math.tanh %366 : vector<2x16xf32>
    %384 = arith.negf %372 : vector<2x16xf32>
    %385 = math.exp %384 : vector<2x16xf32>
    %cst_141 = arith.constant 1.000000e+00 : f32
    %386 = vector.broadcast %cst_141 : f32 to vector<2x16xf32>
    %387 = arith.addf %386, %385 : vector<2x16xf32>
    %388 = arith.divf %386, %387 : vector<2x16xf32>
    %389 = arith.mulf %382, %345 : vector<2x16xf32>
    %390 = arith.mulf %377, %383 : vector<2x16xf32>
    %391 = arith.addf %389, %390 : vector<2x16xf32>
    %392 = math.tanh %391 : vector<2x16xf32>
    %393 = arith.mulf %388, %392 : vector<2x16xf32>
    %c0_142 = arith.constant 0 : index
    %c0_143 = arith.constant 0 : index
    %394 = vector.load %arg8[%c0_142, %c0_143] : memref<2x16xf32, #tpu.memory_space<vmem>>, vector<2x16xf32>
    tpu.vector_store %arg8[%c0_142, %c0_143], %391 {strides = array<i32>} : memref<2x16xf32, #tpu.memory_space<vmem>>, vector<2x16xf32>,
    %c0_144 = arith.constant 0 : index
    %c0_145 = arith.constant 0 : index
    %395 = vector.load %arg7[%c0_144, %c0_145] : memref<2x16xf32, #tpu.memory_space<vmem>>, vector<2x16xf32>
    tpu.vector_store %arg7[%c0_144, %c0_145], %393 {strides = array<i32>} : memref<2x16xf32, #tpu.memory_space<vmem>>, vector<2x16xf32>,
    %396 = arith.index_cast %c3_i32 : i32 to index
    %c0_146 = arith.constant 0 : index
    %c0_147 = arith.constant 0 : index
    %397 = vector.load %arg5[%396, %c0_146, %c0_147] : memref<8x2x16xf32, #tpu.memory_space<vmem>>, vector<1x2x16xf32>
    %398 = vector.shape_cast %397 : vector<1x2x16xf32> to vector<2x16xf32>
    %399 = vector.shape_cast %393 : vector<2x16xf32> to vector<1x2x16xf32>
    tpu.vector_store %arg5[%396, %c0_146, %c0_147], %399 {strides = array<i32>} : memref<8x2x16xf32, #tpu.memory_space<vmem>>, vector<1x2x16xf32>,
    %c7_i32_148 = arith.constant 7 : i32
    %400 = arith.subi %c7_i32_148, %c3_i32 : i32
    %c0_149 = arith.constant 0 : index
    %c0_150 = arith.constant 0 : index
    %401 = vector.load %arg9[%c0_149, %c0_150] : memref<2x16xf32, #tpu.memory_space<vmem>>, vector<2x16xf32>
    %c0_151 = arith.constant 0 : index
    %c0_152 = arith.constant 0 : index
    %402 = vector.load %arg10[%c0_151, %c0_152] : memref<2x16xf32, #tpu.memory_space<vmem>>, vector<2x16xf32>
    %403 = arith.index_cast %400 : i32 to index
    %c0_153 = arith.constant 0 : index
    %c0_154 = arith.constant 0 : index
    %c0_155 = arith.constant 0 : index
    %404 = vector.load %arg2[%403, %c0_153, %c0_154, %c0_155] : memref<8x4x2x16xf32, #tpu.memory_space<vmem>>, vector<1x4x2x16xf32>
    %405 = vector.shape_cast %404 : vector<1x4x2x16xf32> to vector<4x2x16xf32>
    %406 = vector.extract_strided_slice %405 {offsets = [0, 0, 0], sizes = [1, 2, 16], strides = [1, 1, 1]} : vector<4x2x16xf32> to vector<1x2x16xf32>
    %407 = vector.shape_cast %406 : vector<1x2x16xf32> to vector<2x16xf32>
    %408 = vector.extract_strided_slice %4 {offsets = [0, 0, 0], sizes = [1, 16, 16], strides = [1, 1, 1]} : vector<4x16x16xf32> to vector<1x16x16xf32>
    %409 = vector.shape_cast %408 : vector<1x16x16xf32> to vector<16x16xf32>
    %cst_156 = arith.constant dense<0.000000e+00> : vector<2x16xf32>
    %410 = tpu.matmul %401, %409, %cst_156 {dimension_numbers = #tpu.dot_dimension_numbers<[1], [0], [0], [1], [0, 0, 1, 1], [], []>} : vector<2x16xf32>, vector<16x16xf32>, vector<2x16xf32> -> vector<2x16xf32>
    %411 = arith.addf %407, %410 : vector<2x16xf32>
    %412 = vector.extract_strided_slice %405 {offsets = [1, 0, 0], sizes = [1, 2, 16], strides = [1, 1, 1]} : vector<4x2x16xf32> to vector<1x2x16xf32>
    %413 = vector.shape_cast %412 : vector<1x2x16xf32> to vector<2x16xf32>
    %414 = vector.extract_strided_slice %4 {offsets = [1, 0, 0], sizes = [1, 16, 16], strides = [1, 1, 1]} : vector<4x16x16xf32> to vector<1x16x16xf32>
    %415 = vector.shape_cast %414 : vector<1x16x16xf32> to vector<16x16xf32>
    %cst_157 = arith.constant dense<0.000000e+00> : vector<2x16xf32>
    %416 = tpu.matmul %401, %415, %cst_157 {dimension_numbers = #tpu.dot_dimension_numbers<[1], [0], [0], [1], [0, 0, 1, 1], [], []>} : vector<2x16xf32>, vector<16x16xf32>, vector<2x16xf32> -> vector<2x16xf32>
    %417 = arith.addf %413, %416 : vector<2x16xf32>
    %418 = vector.extract_strided_slice %405 {offsets = [2, 0, 0], sizes = [1, 2, 16], strides = [1, 1, 1]} : vector<4x2x16xf32> to vector<1x2x16xf32>
    %419 = vector.shape_cast %418 : vector<1x2x16xf32> to vector<2x16xf32>
    %420 = vector.extract_strided_slice %4 {offsets = [2, 0, 0], sizes = [1, 16, 16], strides = [1, 1, 1]} : vector<4x16x16xf32> to vector<1x16x16xf32>
    %421 = vector.shape_cast %420 : vector<1x16x16xf32> to vector<16x16xf32>
    %cst_158 = arith.constant dense<0.000000e+00> : vector<2x16xf32>
    %422 = tpu.matmul %401, %421, %cst_158 {dimension_numbers = #tpu.dot_dimension_numbers<[1], [0], [0], [1], [0, 0, 1, 1], [], []>} : vector<2x16xf32>, vector<16x16xf32>, vector<2x16xf32> -> vector<2x16xf32>
    %423 = arith.addf %419, %422 : vector<2x16xf32>
    %424 = vector.extract_strided_slice %405 {offsets = [3, 0, 0], sizes = [1, 2, 16], strides = [1, 1, 1]} : vector<4x2x16xf32> to vector<1x2x16xf32>
    %425 = vector.shape_cast %424 : vector<1x2x16xf32> to vector<2x16xf32>
    %426 = vector.extract_strided_slice %4 {offsets = [3, 0, 0], sizes = [1, 16, 16], strides = [1, 1, 1]} : vector<4x16x16xf32> to vector<1x16x16xf32>
    %427 = vector.shape_cast %426 : vector<1x16x16xf32> to vector<16x16xf32>
    %cst_159 = arith.constant dense<0.000000e+00> : vector<2x16xf32>
    %428 = tpu.matmul %401, %427, %cst_159 {dimension_numbers = #tpu.dot_dimension_numbers<[1], [0], [0], [1], [0, 0, 1, 1], [], []>} : vector<2x16xf32>, vector<16x16xf32>, vector<2x16xf32> -> vector<2x16xf32>
    %429 = arith.addf %425, %428 : vector<2x16xf32>
    %430 = arith.negf %411 : vector<2x16xf32>
    %431 = math.exp %430 : vector<2x16xf32>
    %cst_160 = arith.constant 1.000000e+00 : f32
    %432 = vector.broadcast %cst_160 : f32 to vector<2x16xf32>
    %433 = arith.addf %432, %431 : vector<2x16xf32>
    %434 = arith.divf %432, %433 : vector<2x16xf32>
    %435 = arith.negf %417 : vector<2x16xf32>
    %436 = math.exp %435 : vector<2x16xf32>
    %cst_161 = arith.constant 1.000000e+00 : f32
    %437 = vector.broadcast %cst_161 : f32 to vector<2x16xf32>
    %438 = arith.addf %437, %436 : vector<2x16xf32>
    %439 = arith.divf %437, %438 : vector<2x16xf32>
    %440 = math.tanh %423 : vector<2x16xf32>
    %441 = arith.negf %429 : vector<2x16xf32>
    %442 = math.exp %441 : vector<2x16xf32>
    %cst_162 = arith.constant 1.000000e+00 : f32
    %443 = vector.broadcast %cst_162 : f32 to vector<2x16xf32>
    %444 = arith.addf %443, %442 : vector<2x16xf32>
    %445 = arith.divf %443, %444 : vector<2x16xf32>
    %446 = arith.mulf %439, %402 : vector<2x16xf32>
    %447 = arith.mulf %434, %440 : vector<2x16xf32>
    %448 = arith.addf %446, %447 : vector<2x16xf32>
    %449 = math.tanh %448 : vector<2x16xf32>
    %450 = arith.mulf %445, %449 : vector<2x16xf32>
    %c0_163 = arith.constant 0 : index
    %c0_164 = arith.constant 0 : index
    %451 = vector.load %arg10[%c0_163, %c0_164] : memref<2x16xf32, #tpu.memory_space<vmem>>, vector<2x16xf32>
    tpu.vector_store %arg10[%c0_163, %c0_164], %448 {strides = array<i32>} : memref<2x16xf32, #tpu.memory_space<vmem>>, vector<2x16xf32>,
    %c0_165 = arith.constant 0 : index
    %c0_166 = arith.constant 0 : index
    %452 = vector.load %arg9[%c0_165, %c0_166] : memref<2x16xf32, #tpu.memory_space<vmem>>, vector<2x16xf32>
    tpu.vector_store %arg9[%c0_165, %c0_166], %450 {strides = array<i32>} : memref<2x16xf32, #tpu.memory_space<vmem>>, vector<2x16xf32>,
    %453 = arith.index_cast %400 : i32 to index
    %c0_167 = arith.constant 0 : index
    %c0_168 = arith.constant 0 : index
    %454 = vector.load %arg6[%453, %c0_167, %c0_168] : memref<8x2x16xf32, #tpu.memory_space<vmem>>, vector<1x2x16xf32>
    %455 = vector.shape_cast %454 : vector<1x2x16xf32> to vector<2x16xf32>
    %456 = vector.shape_cast %450 : vector<2x16xf32> to vector<1x2x16xf32>
    tpu.vector_store %arg6[%453, %c0_167, %c0_168], %456 {strides = array<i32>} : memref<8x2x16xf32, #tpu.memory_space<vmem>>, vector<1x2x16xf32>,
    %c4_i32 = arith.constant 4 : i32
    %c0_169 = arith.constant 0 : index
    %c0_170 = arith.constant 0 : index
    %457 = vector.load %arg7[%c0_169, %c0_170] : memref<2x16xf32, #tpu.memory_space<vmem>>, vector<2x16xf32>
    %c0_171 = arith.constant 0 : index
    %c0_172 = arith.constant 0 : index
    %458 = vector.load %arg8[%c0_171, %c0_172] : memref<2x16xf32, #tpu.memory_space<vmem>>, vector<2x16xf32>
    %459 = arith.index_cast %c4_i32 : i32 to index
    %c0_173 = arith.constant 0 : index
    %c0_174 = arith.constant 0 : index
    %c0_175 = arith.constant 0 : index
    %460 = vector.load %arg1[%459, %c0_173, %c0_174, %c0_175] : memref<8x4x2x16xf32, #tpu.memory_space<vmem>>, vector<1x4x2x16xf32>
    %461 = vector.shape_cast %460 : vector<1x4x2x16xf32> to vector<4x2x16xf32>
    %462 = vector.extract_strided_slice %461 {offsets = [0, 0, 0], sizes = [1, 2, 16], strides = [1, 1, 1]} : vector<4x2x16xf32> to vector<1x2x16xf32>
    %463 = vector.shape_cast %462 : vector<1x2x16xf32> to vector<2x16xf32>
    %464 = vector.extract_strided_slice %3 {offsets = [0, 0, 0], sizes = [1, 16, 16], strides = [1, 1, 1]} : vector<4x16x16xf32> to vector<1x16x16xf32>
    %465 = vector.shape_cast %464 : vector<1x16x16xf32> to vector<16x16xf32>
    %cst_176 = arith.constant dense<0.000000e+00> : vector<2x16xf32>
    %466 = tpu.matmul %457, %465, %cst_176 {dimension_numbers = #tpu.dot_dimension_numbers<[1], [0], [0], [1], [0, 0, 1, 1], [], []>} : vector<2x16xf32>, vector<16x16xf32>, vector<2x16xf32> -> vector<2x16xf32>
    %467 = arith.addf %463, %466 : vector<2x16xf32>
    %468 = vector.extract_strided_slice %461 {offsets = [1, 0, 0], sizes = [1, 2, 16], strides = [1, 1, 1]} : vector<4x2x16xf32> to vector<1x2x16xf32>
    %469 = vector.shape_cast %468 : vector<1x2x16xf32> to vector<2x16xf32>
    %470 = vector.extract_strided_slice %3 {offsets = [1, 0, 0], sizes = [1, 16, 16], strides = [1, 1, 1]} : vector<4x16x16xf32> to vector<1x16x16xf32>
    %471 = vector.shape_cast %470 : vector<1x16x16xf32> to vector<16x16xf32>
    %cst_177 = arith.constant dense<0.000000e+00> : vector<2x16xf32>
    %472 = tpu.matmul %457, %471, %cst_177 {dimension_numbers = #tpu.dot_dimension_numbers<[1], [0], [0], [1], [0, 0, 1, 1], [], []>} : vector<2x16xf32>, vector<16x16xf32>, vector<2x16xf32> -> vector<2x16xf32>
    %473 = arith.addf %469, %472 : vector<2x16xf32>
    %474 = vector.extract_strided_slice %461 {offsets = [2, 0, 0], sizes = [1, 2, 16], strides = [1, 1, 1]} : vector<4x2x16xf32> to vector<1x2x16xf32>
    %475 = vector.shape_cast %474 : vector<1x2x16xf32> to vector<2x16xf32>
    %476 = vector.extract_strided_slice %3 {offsets = [2, 0, 0], sizes = [1, 16, 16], strides = [1, 1, 1]} : vector<4x16x16xf32> to vector<1x16x16xf32>
    %477 = vector.shape_cast %476 : vector<1x16x16xf32> to vector<16x16xf32>
    %cst_178 = arith.constant dense<0.000000e+00> : vector<2x16xf32>
    %478 = tpu.matmul %457, %477, %cst_178 {dimension_numbers = #tpu.dot_dimension_numbers<[1], [0], [0], [1], [0, 0, 1, 1], [], []>} : vector<2x16xf32>, vector<16x16xf32>, vector<2x16xf32> -> vector<2x16xf32>
    %479 = arith.addf %475, %478 : vector<2x16xf32>
    %480 = vector.extract_strided_slice %461 {offsets = [3, 0, 0], sizes = [1, 2, 16], strides = [1, 1, 1]} : vector<4x2x16xf32> to vector<1x2x16xf32>
    %481 = vector.shape_cast %480 : vector<1x2x16xf32> to vector<2x16xf32>
    %482 = vector.extract_strided_slice %3 {offsets = [3, 0, 0], sizes = [1, 16, 16], strides = [1, 1, 1]} : vector<4x16x16xf32> to vector<1x16x16xf32>
    %483 = vector.shape_cast %482 : vector<1x16x16xf32> to vector<16x16xf32>
    %cst_179 = arith.constant dense<0.000000e+00> : vector<2x16xf32>
    %484 = tpu.matmul %457, %483, %cst_179 {dimension_numbers = #tpu.dot_dimension_numbers<[1], [0], [0], [1], [0, 0, 1, 1], [], []>} : vector<2x16xf32>, vector<16x16xf32>, vector<2x16xf32> -> vector<2x16xf32>
    %485 = arith.addf %481, %484 : vector<2x16xf32>
    %486 = arith.negf %467 : vector<2x16xf32>
    %487 = math.exp %486 : vector<2x16xf32>
    %cst_180 = arith.constant 1.000000e+00 : f32
    %488 = vector.broadcast %cst_180 : f32 to vector<2x16xf32>
    %489 = arith.addf %488, %487 : vector<2x16xf32>
    %490 = arith.divf %488, %489 : vector<2x16xf32>
    %491 = arith.negf %473 : vector<2x16xf32>
    %492 = math.exp %491 : vector<2x16xf32>
    %cst_181 = arith.constant 1.000000e+00 : f32
    %493 = vector.broadcast %cst_181 : f32 to vector<2x16xf32>
    %494 = arith.addf %493, %492 : vector<2x16xf32>
    %495 = arith.divf %493, %494 : vector<2x16xf32>
    %496 = math.tanh %479 : vector<2x16xf32>
    %497 = arith.negf %485 : vector<2x16xf32>
    %498 = math.exp %497 : vector<2x16xf32>
    %cst_182 = arith.constant 1.000000e+00 : f32
    %499 = vector.broadcast %cst_182 : f32 to vector<2x16xf32>
    %500 = arith.addf %499, %498 : vector<2x16xf32>
    %501 = arith.divf %499, %500 : vector<2x16xf32>
    %502 = arith.mulf %495, %458 : vector<2x16xf32>
    %503 = arith.mulf %490, %496 : vector<2x16xf32>
    %504 = arith.addf %502, %503 : vector<2x16xf32>
    %505 = math.tanh %504 : vector<2x16xf32>
    %506 = arith.mulf %501, %505 : vector<2x16xf32>
    %c0_183 = arith.constant 0 : index
    %c0_184 = arith.constant 0 : index
    %507 = vector.load %arg8[%c0_183, %c0_184] : memref<2x16xf32, #tpu.memory_space<vmem>>, vector<2x16xf32>
    tpu.vector_store %arg8[%c0_183, %c0_184], %504 {strides = array<i32>} : memref<2x16xf32, #tpu.memory_space<vmem>>, vector<2x16xf32>,
    %c0_185 = arith.constant 0 : index
    %c0_186 = arith.constant 0 : index
    %508 = vector.load %arg7[%c0_185, %c0_186] : memref<2x16xf32, #tpu.memory_space<vmem>>, vector<2x16xf32>
    tpu.vector_store %arg7[%c0_185, %c0_186], %506 {strides = array<i32>} : memref<2x16xf32, #tpu.memory_space<vmem>>, vector<2x16xf32>,
    %509 = arith.index_cast %c4_i32 : i32 to index
    %c0_187 = arith.constant 0 : index
    %c0_188 = arith.constant 0 : index
    %510 = vector.load %arg5[%509, %c0_187, %c0_188] : memref<8x2x16xf32, #tpu.memory_space<vmem>>, vector<1x2x16xf32>
    %511 = vector.shape_cast %510 : vector<1x2x16xf32> to vector<2x16xf32>
    %512 = vector.shape_cast %506 : vector<2x16xf32> to vector<1x2x16xf32>
    tpu.vector_store %arg5[%509, %c0_187, %c0_188], %512 {strides = array<i32>} : memref<8x2x16xf32, #tpu.memory_space<vmem>>, vector<1x2x16xf32>,
    %c7_i32_189 = arith.constant 7 : i32
    %513 = arith.subi %c7_i32_189, %c4_i32 : i32
    %c0_190 = arith.constant 0 : index
    %c0_191 = arith.constant 0 : index
    %514 = vector.load %arg9[%c0_190, %c0_191] : memref<2x16xf32, #tpu.memory_space<vmem>>, vector<2x16xf32>
    %c0_192 = arith.constant 0 : index
    %c0_193 = arith.constant 0 : index
    %515 = vector.load %arg10[%c0_192, %c0_193] : memref<2x16xf32, #tpu.memory_space<vmem>>, vector<2x16xf32>
    %516 = arith.index_cast %513 : i32 to index
    %c0_194 = arith.constant 0 : index
    %c0_195 = arith.constant 0 : index
    %c0_196 = arith.constant 0 : index
    %517 = vector.load %arg2[%516, %c0_194, %c0_195, %c0_196] : memref<8x4x2x16xf32, #tpu.memory_space<vmem>>, vector<1x4x2x16xf32>
    %518 = vector.shape_cast %517 : vector<1x4x2x16xf32> to vector<4x2x16xf32>
    %519 = vector.extract_strided_slice %518 {offsets = [0, 0, 0], sizes = [1, 2, 16], strides = [1, 1, 1]} : vector<4x2x16xf32> to vector<1x2x16xf32>
    %520 = vector.shape_cast %519 : vector<1x2x16xf32> to vector<2x16xf32>
    %521 = vector.extract_strided_slice %4 {offsets = [0, 0, 0], sizes = [1, 16, 16], strides = [1, 1, 1]} : vector<4x16x16xf32> to vector<1x16x16xf32>
    %522 = vector.shape_cast %521 : vector<1x16x16xf32> to vector<16x16xf32>
    %cst_197 = arith.constant dense<0.000000e+00> : vector<2x16xf32>
    %523 = tpu.matmul %514, %522, %cst_197 {dimension_numbers = #tpu.dot_dimension_numbers<[1], [0], [0], [1], [0, 0, 1, 1], [], []>} : vector<2x16xf32>, vector<16x16xf32>, vector<2x16xf32> -> vector<2x16xf32>
    %524 = arith.addf %520, %523 : vector<2x16xf32>
    %525 = vector.extract_strided_slice %518 {offsets = [1, 0, 0], sizes = [1, 2, 16], strides = [1, 1, 1]} : vector<4x2x16xf32> to vector<1x2x16xf32>
    %526 = vector.shape_cast %525 : vector<1x2x16xf32> to vector<2x16xf32>
    %527 = vector.extract_strided_slice %4 {offsets = [1, 0, 0], sizes = [1, 16, 16], strides = [1, 1, 1]} : vector<4x16x16xf32> to vector<1x16x16xf32>
    %528 = vector.shape_cast %527 : vector<1x16x16xf32> to vector<16x16xf32>
    %cst_198 = arith.constant dense<0.000000e+00> : vector<2x16xf32>
    %529 = tpu.matmul %514, %528, %cst_198 {dimension_numbers = #tpu.dot_dimension_numbers<[1], [0], [0], [1], [0, 0, 1, 1], [], []>} : vector<2x16xf32>, vector<16x16xf32>, vector<2x16xf32> -> vector<2x16xf32>
    %530 = arith.addf %526, %529 : vector<2x16xf32>
    %531 = vector.extract_strided_slice %518 {offsets = [2, 0, 0], sizes = [1, 2, 16], strides = [1, 1, 1]} : vector<4x2x16xf32> to vector<1x2x16xf32>
    %532 = vector.shape_cast %531 : vector<1x2x16xf32> to vector<2x16xf32>
    %533 = vector.extract_strided_slice %4 {offsets = [2, 0, 0], sizes = [1, 16, 16], strides = [1, 1, 1]} : vector<4x16x16xf32> to vector<1x16x16xf32>
    %534 = vector.shape_cast %533 : vector<1x16x16xf32> to vector<16x16xf32>
    %cst_199 = arith.constant dense<0.000000e+00> : vector<2x16xf32>
    %535 = tpu.matmul %514, %534, %cst_199 {dimension_numbers = #tpu.dot_dimension_numbers<[1], [0], [0], [1], [0, 0, 1, 1], [], []>} : vector<2x16xf32>, vector<16x16xf32>, vector<2x16xf32> -> vector<2x16xf32>
    %536 = arith.addf %532, %535 : vector<2x16xf32>
    %537 = vector.extract_strided_slice %518 {offsets = [3, 0, 0], sizes = [1, 2, 16], strides = [1, 1, 1]} : vector<4x2x16xf32> to vector<1x2x16xf32>
    %538 = vector.shape_cast %537 : vector<1x2x16xf32> to vector<2x16xf32>
    %539 = vector.extract_strided_slice %4 {offsets = [3, 0, 0], sizes = [1, 16, 16], strides = [1, 1, 1]} : vector<4x16x16xf32> to vector<1x16x16xf32>
    %540 = vector.shape_cast %539 : vector<1x16x16xf32> to vector<16x16xf32>
    %cst_200 = arith.constant dense<0.000000e+00> : vector<2x16xf32>
    %541 = tpu.matmul %514, %540, %cst_200 {dimension_numbers = #tpu.dot_dimension_numbers<[1], [0], [0], [1], [0, 0, 1, 1], [], []>} : vector<2x16xf32>, vector<16x16xf32>, vector<2x16xf32> -> vector<2x16xf32>
    %542 = arith.addf %538, %541 : vector<2x16xf32>
    %543 = arith.negf %524 : vector<2x16xf32>
    %544 = math.exp %543 : vector<2x16xf32>
    %cst_201 = arith.constant 1.000000e+00 : f32
    %545 = vector.broadcast %cst_201 : f32 to vector<2x16xf32>
    %546 = arith.addf %545, %544 : vector<2x16xf32>
    %547 = arith.divf %545, %546 : vector<2x16xf32>
    %548 = arith.negf %530 : vector<2x16xf32>
    %549 = math.exp %548 : vector<2x16xf32>
    %cst_202 = arith.constant 1.000000e+00 : f32
    %550 = vector.broadcast %cst_202 : f32 to vector<2x16xf32>
    %551 = arith.addf %550, %549 : vector<2x16xf32>
    %552 = arith.divf %550, %551 : vector<2x16xf32>
    %553 = math.tanh %536 : vector<2x16xf32>
    %554 = arith.negf %542 : vector<2x16xf32>
    %555 = math.exp %554 : vector<2x16xf32>
    %cst_203 = arith.constant 1.000000e+00 : f32
    %556 = vector.broadcast %cst_203 : f32 to vector<2x16xf32>
    %557 = arith.addf %556, %555 : vector<2x16xf32>
    %558 = arith.divf %556, %557 : vector<2x16xf32>
    %559 = arith.mulf %552, %515 : vector<2x16xf32>
    %560 = arith.mulf %547, %553 : vector<2x16xf32>
    %561 = arith.addf %559, %560 : vector<2x16xf32>
    %562 = math.tanh %561 : vector<2x16xf32>
    %563 = arith.mulf %558, %562 : vector<2x16xf32>
    %c0_204 = arith.constant 0 : index
    %c0_205 = arith.constant 0 : index
    %564 = vector.load %arg10[%c0_204, %c0_205] : memref<2x16xf32, #tpu.memory_space<vmem>>, vector<2x16xf32>
    tpu.vector_store %arg10[%c0_204, %c0_205], %561 {strides = array<i32>} : memref<2x16xf32, #tpu.memory_space<vmem>>, vector<2x16xf32>,
    %c0_206 = arith.constant 0 : index
    %c0_207 = arith.constant 0 : index
    %565 = vector.load %arg9[%c0_206, %c0_207] : memref<2x16xf32, #tpu.memory_space<vmem>>, vector<2x16xf32>
    tpu.vector_store %arg9[%c0_206, %c0_207], %563 {strides = array<i32>} : memref<2x16xf32, #tpu.memory_space<vmem>>, vector<2x16xf32>,
    %566 = arith.index_cast %513 : i32 to index
    %c0_208 = arith.constant 0 : index
    %c0_209 = arith.constant 0 : index
    %567 = vector.load %arg6[%566, %c0_208, %c0_209] : memref<8x2x16xf32, #tpu.memory_space<vmem>>, vector<1x2x16xf32>
    %568 = vector.shape_cast %567 : vector<1x2x16xf32> to vector<2x16xf32>
    %569 = vector.shape_cast %563 : vector<2x16xf32> to vector<1x2x16xf32>
    tpu.vector_store %arg6[%566, %c0_208, %c0_209], %569 {strides = array<i32>} : memref<8x2x16xf32, #tpu.memory_space<vmem>>, vector<1x2x16xf32>,
    %c5_i32 = arith.constant 5 : i32
    %c0_210 = arith.constant 0 : index
    %c0_211 = arith.constant 0 : index
    %570 = vector.load %arg7[%c0_210, %c0_211] : memref<2x16xf32, #tpu.memory_space<vmem>>, vector<2x16xf32>
    %c0_212 = arith.constant 0 : index
    %c0_213 = arith.constant 0 : index
    %571 = vector.load %arg8[%c0_212, %c0_213] : memref<2x16xf32, #tpu.memory_space<vmem>>, vector<2x16xf32>
    %572 = arith.index_cast %c5_i32 : i32 to index
    %c0_214 = arith.constant 0 : index
    %c0_215 = arith.constant 0 : index
    %c0_216 = arith.constant 0 : index
    %573 = vector.load %arg1[%572, %c0_214, %c0_215, %c0_216] : memref<8x4x2x16xf32, #tpu.memory_space<vmem>>, vector<1x4x2x16xf32>
    %574 = vector.shape_cast %573 : vector<1x4x2x16xf32> to vector<4x2x16xf32>
    %575 = vector.extract_strided_slice %574 {offsets = [0, 0, 0], sizes = [1, 2, 16], strides = [1, 1, 1]} : vector<4x2x16xf32> to vector<1x2x16xf32>
    %576 = vector.shape_cast %575 : vector<1x2x16xf32> to vector<2x16xf32>
    %577 = vector.extract_strided_slice %3 {offsets = [0, 0, 0], sizes = [1, 16, 16], strides = [1, 1, 1]} : vector<4x16x16xf32> to vector<1x16x16xf32>
    %578 = vector.shape_cast %577 : vector<1x16x16xf32> to vector<16x16xf32>
    %cst_217 = arith.constant dense<0.000000e+00> : vector<2x16xf32>
    %579 = tpu.matmul %570, %578, %cst_217 {dimension_numbers = #tpu.dot_dimension_numbers<[1], [0], [0], [1], [0, 0, 1, 1], [], []>} : vector<2x16xf32>, vector<16x16xf32>, vector<2x16xf32> -> vector<2x16xf32>
    %580 = arith.addf %576, %579 : vector<2x16xf32>
    %581 = vector.extract_strided_slice %574 {offsets = [1, 0, 0], sizes = [1, 2, 16], strides = [1, 1, 1]} : vector<4x2x16xf32> to vector<1x2x16xf32>
    %582 = vector.shape_cast %581 : vector<1x2x16xf32> to vector<2x16xf32>
    %583 = vector.extract_strided_slice %3 {offsets = [1, 0, 0], sizes = [1, 16, 16], strides = [1, 1, 1]} : vector<4x16x16xf32> to vector<1x16x16xf32>
    %584 = vector.shape_cast %583 : vector<1x16x16xf32> to vector<16x16xf32>
    %cst_218 = arith.constant dense<0.000000e+00> : vector<2x16xf32>
    %585 = tpu.matmul %570, %584, %cst_218 {dimension_numbers = #tpu.dot_dimension_numbers<[1], [0], [0], [1], [0, 0, 1, 1], [], []>} : vector<2x16xf32>, vector<16x16xf32>, vector<2x16xf32> -> vector<2x16xf32>
    %586 = arith.addf %582, %585 : vector<2x16xf32>
    %587 = vector.extract_strided_slice %574 {offsets = [2, 0, 0], sizes = [1, 2, 16], strides = [1, 1, 1]} : vector<4x2x16xf32> to vector<1x2x16xf32>
    %588 = vector.shape_cast %587 : vector<1x2x16xf32> to vector<2x16xf32>
    %589 = vector.extract_strided_slice %3 {offsets = [2, 0, 0], sizes = [1, 16, 16], strides = [1, 1, 1]} : vector<4x16x16xf32> to vector<1x16x16xf32>
    %590 = vector.shape_cast %589 : vector<1x16x16xf32> to vector<16x16xf32>
    %cst_219 = arith.constant dense<0.000000e+00> : vector<2x16xf32>
    %591 = tpu.matmul %570, %590, %cst_219 {dimension_numbers = #tpu.dot_dimension_numbers<[1], [0], [0], [1], [0, 0, 1, 1], [], []>} : vector<2x16xf32>, vector<16x16xf32>, vector<2x16xf32> -> vector<2x16xf32>
    %592 = arith.addf %588, %591 : vector<2x16xf32>
    %593 = vector.extract_strided_slice %574 {offsets = [3, 0, 0], sizes = [1, 2, 16], strides = [1, 1, 1]} : vector<4x2x16xf32> to vector<1x2x16xf32>
    %594 = vector.shape_cast %593 : vector<1x2x16xf32> to vector<2x16xf32>
    %595 = vector.extract_strided_slice %3 {offsets = [3, 0, 0], sizes = [1, 16, 16], strides = [1, 1, 1]} : vector<4x16x16xf32> to vector<1x16x16xf32>
    %596 = vector.shape_cast %595 : vector<1x16x16xf32> to vector<16x16xf32>
    %cst_220 = arith.constant dense<0.000000e+00> : vector<2x16xf32>
    %597 = tpu.matmul %570, %596, %cst_220 {dimension_numbers = #tpu.dot_dimension_numbers<[1], [0], [0], [1], [0, 0, 1, 1], [], []>} : vector<2x16xf32>, vector<16x16xf32>, vector<2x16xf32> -> vector<2x16xf32>
    %598 = arith.addf %594, %597 : vector<2x16xf32>
    %599 = arith.negf %580 : vector<2x16xf32>
    %600 = math.exp %599 : vector<2x16xf32>
    %cst_221 = arith.constant 1.000000e+00 : f32
    %601 = vector.broadcast %cst_221 : f32 to vector<2x16xf32>
    %602 = arith.addf %601, %600 : vector<2x16xf32>
    %603 = arith.divf %601, %602 : vector<2x16xf32>
    %604 = arith.negf %586 : vector<2x16xf32>
    %605 = math.exp %604 : vector<2x16xf32>
    %cst_222 = arith.constant 1.000000e+00 : f32
    %606 = vector.broadcast %cst_222 : f32 to vector<2x16xf32>
    %607 = arith.addf %606, %605 : vector<2x16xf32>
    %608 = arith.divf %606, %607 : vector<2x16xf32>
    %609 = math.tanh %592 : vector<2x16xf32>
    %610 = arith.negf %598 : vector<2x16xf32>
    %611 = math.exp %610 : vector<2x16xf32>
    %cst_223 = arith.constant 1.000000e+00 : f32
    %612 = vector.broadcast %cst_223 : f32 to vector<2x16xf32>
    %613 = arith.addf %612, %611 : vector<2x16xf32>
    %614 = arith.divf %612, %613 : vector<2x16xf32>
    %615 = arith.mulf %608, %571 : vector<2x16xf32>
    %616 = arith.mulf %603, %609 : vector<2x16xf32>
    %617 = arith.addf %615, %616 : vector<2x16xf32>
    %618 = math.tanh %617 : vector<2x16xf32>
    %619 = arith.mulf %614, %618 : vector<2x16xf32>
    %c0_224 = arith.constant 0 : index
    %c0_225 = arith.constant 0 : index
    %620 = vector.load %arg8[%c0_224, %c0_225] : memref<2x16xf32, #tpu.memory_space<vmem>>, vector<2x16xf32>
    tpu.vector_store %arg8[%c0_224, %c0_225], %617 {strides = array<i32>} : memref<2x16xf32, #tpu.memory_space<vmem>>, vector<2x16xf32>,
    %c0_226 = arith.constant 0 : index
    %c0_227 = arith.constant 0 : index
    %621 = vector.load %arg7[%c0_226, %c0_227] : memref<2x16xf32, #tpu.memory_space<vmem>>, vector<2x16xf32>
    tpu.vector_store %arg7[%c0_226, %c0_227], %619 {strides = array<i32>} : memref<2x16xf32, #tpu.memory_space<vmem>>, vector<2x16xf32>,
    %622 = arith.index_cast %c5_i32 : i32 to index
    %c0_228 = arith.constant 0 : index
    %c0_229 = arith.constant 0 : index
    %623 = vector.load %arg5[%622, %c0_228, %c0_229] : memref<8x2x16xf32, #tpu.memory_space<vmem>>, vector<1x2x16xf32>
    %624 = vector.shape_cast %623 : vector<1x2x16xf32> to vector<2x16xf32>
    %625 = vector.shape_cast %619 : vector<2x16xf32> to vector<1x2x16xf32>
    tpu.vector_store %arg5[%622, %c0_228, %c0_229], %625 {strides = array<i32>} : memref<8x2x16xf32, #tpu.memory_space<vmem>>, vector<1x2x16xf32>,
    %c7_i32_230 = arith.constant 7 : i32
    %626 = arith.subi %c7_i32_230, %c5_i32 : i32
    %c0_231 = arith.constant 0 : index
    %c0_232 = arith.constant 0 : index
    %627 = vector.load %arg9[%c0_231, %c0_232] : memref<2x16xf32, #tpu.memory_space<vmem>>, vector<2x16xf32>
    %c0_233 = arith.constant 0 : index
    %c0_234 = arith.constant 0 : index
    %628 = vector.load %arg10[%c0_233, %c0_234] : memref<2x16xf32, #tpu.memory_space<vmem>>, vector<2x16xf32>
    %629 = arith.index_cast %626 : i32 to index
    %c0_235 = arith.constant 0 : index
    %c0_236 = arith.constant 0 : index
    %c0_237 = arith.constant 0 : index
    %630 = vector.load %arg2[%629, %c0_235, %c0_236, %c0_237] : memref<8x4x2x16xf32, #tpu.memory_space<vmem>>, vector<1x4x2x16xf32>
    %631 = vector.shape_cast %630 : vector<1x4x2x16xf32> to vector<4x2x16xf32>
    %632 = vector.extract_strided_slice %631 {offsets = [0, 0, 0], sizes = [1, 2, 16], strides = [1, 1, 1]} : vector<4x2x16xf32> to vector<1x2x16xf32>
    %633 = vector.shape_cast %632 : vector<1x2x16xf32> to vector<2x16xf32>
    %634 = vector.extract_strided_slice %4 {offsets = [0, 0, 0], sizes = [1, 16, 16], strides = [1, 1, 1]} : vector<4x16x16xf32> to vector<1x16x16xf32>
    %635 = vector.shape_cast %634 : vector<1x16x16xf32> to vector<16x16xf32>
    %cst_238 = arith.constant dense<0.000000e+00> : vector<2x16xf32>
    %636 = tpu.matmul %627, %635, %cst_238 {dimension_numbers = #tpu.dot_dimension_numbers<[1], [0], [0], [1], [0, 0, 1, 1], [], []>} : vector<2x16xf32>, vector<16x16xf32>, vector<2x16xf32> -> vector<2x16xf32>
    %637 = arith.addf %633, %636 : vector<2x16xf32>
    %638 = vector.extract_strided_slice %631 {offsets = [1, 0, 0], sizes = [1, 2, 16], strides = [1, 1, 1]} : vector<4x2x16xf32> to vector<1x2x16xf32>
    %639 = vector.shape_cast %638 : vector<1x2x16xf32> to vector<2x16xf32>
    %640 = vector.extract_strided_slice %4 {offsets = [1, 0, 0], sizes = [1, 16, 16], strides = [1, 1, 1]} : vector<4x16x16xf32> to vector<1x16x16xf32>
    %641 = vector.shape_cast %640 : vector<1x16x16xf32> to vector<16x16xf32>
    %cst_239 = arith.constant dense<0.000000e+00> : vector<2x16xf32>
    %642 = tpu.matmul %627, %641, %cst_239 {dimension_numbers = #tpu.dot_dimension_numbers<[1], [0], [0], [1], [0, 0, 1, 1], [], []>} : vector<2x16xf32>, vector<16x16xf32>, vector<2x16xf32> -> vector<2x16xf32>
    %643 = arith.addf %639, %642 : vector<2x16xf32>
    %644 = vector.extract_strided_slice %631 {offsets = [2, 0, 0], sizes = [1, 2, 16], strides = [1, 1, 1]} : vector<4x2x16xf32> to vector<1x2x16xf32>
    %645 = vector.shape_cast %644 : vector<1x2x16xf32> to vector<2x16xf32>
    %646 = vector.extract_strided_slice %4 {offsets = [2, 0, 0], sizes = [1, 16, 16], strides = [1, 1, 1]} : vector<4x16x16xf32> to vector<1x16x16xf32>
    %647 = vector.shape_cast %646 : vector<1x16x16xf32> to vector<16x16xf32>
    %cst_240 = arith.constant dense<0.000000e+00> : vector<2x16xf32>
    %648 = tpu.matmul %627, %647, %cst_240 {dimension_numbers = #tpu.dot_dimension_numbers<[1], [0], [0], [1], [0, 0, 1, 1], [], []>} : vector<2x16xf32>, vector<16x16xf32>, vector<2x16xf32> -> vector<2x16xf32>
    %649 = arith.addf %645, %648 : vector<2x16xf32>
    %650 = vector.extract_strided_slice %631 {offsets = [3, 0, 0], sizes = [1, 2, 16], strides = [1, 1, 1]} : vector<4x2x16xf32> to vector<1x2x16xf32>
    %651 = vector.shape_cast %650 : vector<1x2x16xf32> to vector<2x16xf32>
    %652 = vector.extract_strided_slice %4 {offsets = [3, 0, 0], sizes = [1, 16, 16], strides = [1, 1, 1]} : vector<4x16x16xf32> to vector<1x16x16xf32>
    %653 = vector.shape_cast %652 : vector<1x16x16xf32> to vector<16x16xf32>
    %cst_241 = arith.constant dense<0.000000e+00> : vector<2x16xf32>
    %654 = tpu.matmul %627, %653, %cst_241 {dimension_numbers = #tpu.dot_dimension_numbers<[1], [0], [0], [1], [0, 0, 1, 1], [], []>} : vector<2x16xf32>, vector<16x16xf32>, vector<2x16xf32> -> vector<2x16xf32>
    %655 = arith.addf %651, %654 : vector<2x16xf32>
    %656 = arith.negf %637 : vector<2x16xf32>
    %657 = math.exp %656 : vector<2x16xf32>
    %cst_242 = arith.constant 1.000000e+00 : f32
    %658 = vector.broadcast %cst_242 : f32 to vector<2x16xf32>
    %659 = arith.addf %658, %657 : vector<2x16xf32>
    %660 = arith.divf %658, %659 : vector<2x16xf32>
    %661 = arith.negf %643 : vector<2x16xf32>
    %662 = math.exp %661 : vector<2x16xf32>
    %cst_243 = arith.constant 1.000000e+00 : f32
    %663 = vector.broadcast %cst_243 : f32 to vector<2x16xf32>
    %664 = arith.addf %663, %662 : vector<2x16xf32>
    %665 = arith.divf %663, %664 : vector<2x16xf32>
    %666 = math.tanh %649 : vector<2x16xf32>
    %667 = arith.negf %655 : vector<2x16xf32>
    %668 = math.exp %667 : vector<2x16xf32>
    %cst_244 = arith.constant 1.000000e+00 : f32
    %669 = vector.broadcast %cst_244 : f32 to vector<2x16xf32>
    %670 = arith.addf %669, %668 : vector<2x16xf32>
    %671 = arith.divf %669, %670 : vector<2x16xf32>
    %672 = arith.mulf %665, %628 : vector<2x16xf32>
    %673 = arith.mulf %660, %666 : vector<2x16xf32>
    %674 = arith.addf %672, %673 : vector<2x16xf32>
    %675 = math.tanh %674 : vector<2x16xf32>
    %676 = arith.mulf %671, %675 : vector<2x16xf32>
    %c0_245 = arith.constant 0 : index
    %c0_246 = arith.constant 0 : index
    %677 = vector.load %arg10[%c0_245, %c0_246] : memref<2x16xf32, #tpu.memory_space<vmem>>, vector<2x16xf32>
    tpu.vector_store %arg10[%c0_245, %c0_246], %674 {strides = array<i32>} : memref<2x16xf32, #tpu.memory_space<vmem>>, vector<2x16xf32>,
    %c0_247 = arith.constant 0 : index
    %c0_248 = arith.constant 0 : index
    %678 = vector.load %arg9[%c0_247, %c0_248] : memref<2x16xf32, #tpu.memory_space<vmem>>, vector<2x16xf32>
    tpu.vector_store %arg9[%c0_247, %c0_248], %676 {strides = array<i32>} : memref<2x16xf32, #tpu.memory_space<vmem>>, vector<2x16xf32>,
    %679 = arith.index_cast %626 : i32 to index
    %c0_249 = arith.constant 0 : index
    %c0_250 = arith.constant 0 : index
    %680 = vector.load %arg6[%679, %c0_249, %c0_250] : memref<8x2x16xf32, #tpu.memory_space<vmem>>, vector<1x2x16xf32>
    %681 = vector.shape_cast %680 : vector<1x2x16xf32> to vector<2x16xf32>
    %682 = vector.shape_cast %676 : vector<2x16xf32> to vector<1x2x16xf32>
    tpu.vector_store %arg6[%679, %c0_249, %c0_250], %682 {strides = array<i32>} : memref<8x2x16xf32, #tpu.memory_space<vmem>>, vector<1x2x16xf32>,
    %c6_i32 = arith.constant 6 : i32
    %c0_251 = arith.constant 0 : index
    %c0_252 = arith.constant 0 : index
    %683 = vector.load %arg7[%c0_251, %c0_252] : memref<2x16xf32, #tpu.memory_space<vmem>>, vector<2x16xf32>
    %c0_253 = arith.constant 0 : index
    %c0_254 = arith.constant 0 : index
    %684 = vector.load %arg8[%c0_253, %c0_254] : memref<2x16xf32, #tpu.memory_space<vmem>>, vector<2x16xf32>
    %685 = arith.index_cast %c6_i32 : i32 to index
    %c0_255 = arith.constant 0 : index
    %c0_256 = arith.constant 0 : index
    %c0_257 = arith.constant 0 : index
    %686 = vector.load %arg1[%685, %c0_255, %c0_256, %c0_257] : memref<8x4x2x16xf32, #tpu.memory_space<vmem>>, vector<1x4x2x16xf32>
    %687 = vector.shape_cast %686 : vector<1x4x2x16xf32> to vector<4x2x16xf32>
    %688 = vector.extract_strided_slice %687 {offsets = [0, 0, 0], sizes = [1, 2, 16], strides = [1, 1, 1]} : vector<4x2x16xf32> to vector<1x2x16xf32>
    %689 = vector.shape_cast %688 : vector<1x2x16xf32> to vector<2x16xf32>
    %690 = vector.extract_strided_slice %3 {offsets = [0, 0, 0], sizes = [1, 16, 16], strides = [1, 1, 1]} : vector<4x16x16xf32> to vector<1x16x16xf32>
    %691 = vector.shape_cast %690 : vector<1x16x16xf32> to vector<16x16xf32>
    %cst_258 = arith.constant dense<0.000000e+00> : vector<2x16xf32>
    %692 = tpu.matmul %683, %691, %cst_258 {dimension_numbers = #tpu.dot_dimension_numbers<[1], [0], [0], [1], [0, 0, 1, 1], [], []>} : vector<2x16xf32>, vector<16x16xf32>, vector<2x16xf32> -> vector<2x16xf32>
    %693 = arith.addf %689, %692 : vector<2x16xf32>
    %694 = vector.extract_strided_slice %687 {offsets = [1, 0, 0], sizes = [1, 2, 16], strides = [1, 1, 1]} : vector<4x2x16xf32> to vector<1x2x16xf32>
    %695 = vector.shape_cast %694 : vector<1x2x16xf32> to vector<2x16xf32>
    %696 = vector.extract_strided_slice %3 {offsets = [1, 0, 0], sizes = [1, 16, 16], strides = [1, 1, 1]} : vector<4x16x16xf32> to vector<1x16x16xf32>
    %697 = vector.shape_cast %696 : vector<1x16x16xf32> to vector<16x16xf32>
    %cst_259 = arith.constant dense<0.000000e+00> : vector<2x16xf32>
    %698 = tpu.matmul %683, %697, %cst_259 {dimension_numbers = #tpu.dot_dimension_numbers<[1], [0], [0], [1], [0, 0, 1, 1], [], []>} : vector<2x16xf32>, vector<16x16xf32>, vector<2x16xf32> -> vector<2x16xf32>
    %699 = arith.addf %695, %698 : vector<2x16xf32>
    %700 = vector.extract_strided_slice %687 {offsets = [2, 0, 0], sizes = [1, 2, 16], strides = [1, 1, 1]} : vector<4x2x16xf32> to vector<1x2x16xf32>
    %701 = vector.shape_cast %700 : vector<1x2x16xf32> to vector<2x16xf32>
    %702 = vector.extract_strided_slice %3 {offsets = [2, 0, 0], sizes = [1, 16, 16], strides = [1, 1, 1]} : vector<4x16x16xf32> to vector<1x16x16xf32>
    %703 = vector.shape_cast %702 : vector<1x16x16xf32> to vector<16x16xf32>
    %cst_260 = arith.constant dense<0.000000e+00> : vector<2x16xf32>
    %704 = tpu.matmul %683, %703, %cst_260 {dimension_numbers = #tpu.dot_dimension_numbers<[1], [0], [0], [1], [0, 0, 1, 1], [], []>} : vector<2x16xf32>, vector<16x16xf32>, vector<2x16xf32> -> vector<2x16xf32>
    %705 = arith.addf %701, %704 : vector<2x16xf32>
    %706 = vector.extract_strided_slice %687 {offsets = [3, 0, 0], sizes = [1, 2, 16], strides = [1, 1, 1]} : vector<4x2x16xf32> to vector<1x2x16xf32>
    %707 = vector.shape_cast %706 : vector<1x2x16xf32> to vector<2x16xf32>
    %708 = vector.extract_strided_slice %3 {offsets = [3, 0, 0], sizes = [1, 16, 16], strides = [1, 1, 1]} : vector<4x16x16xf32> to vector<1x16x16xf32>
    %709 = vector.shape_cast %708 : vector<1x16x16xf32> to vector<16x16xf32>
    %cst_261 = arith.constant dense<0.000000e+00> : vector<2x16xf32>
    %710 = tpu.matmul %683, %709, %cst_261 {dimension_numbers = #tpu.dot_dimension_numbers<[1], [0], [0], [1], [0, 0, 1, 1], [], []>} : vector<2x16xf32>, vector<16x16xf32>, vector<2x16xf32> -> vector<2x16xf32>
    %711 = arith.addf %707, %710 : vector<2x16xf32>
    %712 = arith.negf %693 : vector<2x16xf32>
    %713 = math.exp %712 : vector<2x16xf32>
    %cst_262 = arith.constant 1.000000e+00 : f32
    %714 = vector.broadcast %cst_262 : f32 to vector<2x16xf32>
    %715 = arith.addf %714, %713 : vector<2x16xf32>
    %716 = arith.divf %714, %715 : vector<2x16xf32>
    %717 = arith.negf %699 : vector<2x16xf32>
    %718 = math.exp %717 : vector<2x16xf32>
    %cst_263 = arith.constant 1.000000e+00 : f32
    %719 = vector.broadcast %cst_263 : f32 to vector<2x16xf32>
    %720 = arith.addf %719, %718 : vector<2x16xf32>
    %721 = arith.divf %719, %720 : vector<2x16xf32>
    %722 = math.tanh %705 : vector<2x16xf32>
    %723 = arith.negf %711 : vector<2x16xf32>
    %724 = math.exp %723 : vector<2x16xf32>
    %cst_264 = arith.constant 1.000000e+00 : f32
    %725 = vector.broadcast %cst_264 : f32 to vector<2x16xf32>
    %726 = arith.addf %725, %724 : vector<2x16xf32>
    %727 = arith.divf %725, %726 : vector<2x16xf32>
    %728 = arith.mulf %721, %684 : vector<2x16xf32>
    %729 = arith.mulf %716, %722 : vector<2x16xf32>
    %730 = arith.addf %728, %729 : vector<2x16xf32>
    %731 = math.tanh %730 : vector<2x16xf32>
    %732 = arith.mulf %727, %731 : vector<2x16xf32>
    %c0_265 = arith.constant 0 : index
    %c0_266 = arith.constant 0 : index
    %733 = vector.load %arg8[%c0_265, %c0_266] : memref<2x16xf32, #tpu.memory_space<vmem>>, vector<2x16xf32>
    tpu.vector_store %arg8[%c0_265, %c0_266], %730 {strides = array<i32>} : memref<2x16xf32, #tpu.memory_space<vmem>>, vector<2x16xf32>,
    %c0_267 = arith.constant 0 : index
    %c0_268 = arith.constant 0 : index
    %734 = vector.load %arg7[%c0_267, %c0_268] : memref<2x16xf32, #tpu.memory_space<vmem>>, vector<2x16xf32>
    tpu.vector_store %arg7[%c0_267, %c0_268], %732 {strides = array<i32>} : memref<2x16xf32, #tpu.memory_space<vmem>>, vector<2x16xf32>,
    %735 = arith.index_cast %c6_i32 : i32 to index
    %c0_269 = arith.constant 0 : index
    %c0_270 = arith.constant 0 : index
    %736 = vector.load %arg5[%735, %c0_269, %c0_270] : memref<8x2x16xf32, #tpu.memory_space<vmem>>, vector<1x2x16xf32>
    %737 = vector.shape_cast %736 : vector<1x2x16xf32> to vector<2x16xf32>
    %738 = vector.shape_cast %732 : vector<2x16xf32> to vector<1x2x16xf32>
    tpu.vector_store %arg5[%735, %c0_269, %c0_270], %738 {strides = array<i32>} : memref<8x2x16xf32, #tpu.memory_space<vmem>>, vector<1x2x16xf32>,
    %c7_i32_271 = arith.constant 7 : i32
    %739 = arith.subi %c7_i32_271, %c6_i32 : i32
    %c0_272 = arith.constant 0 : index
    %c0_273 = arith.constant 0 : index
    %740 = vector.load %arg9[%c0_272, %c0_273] : memref<2x16xf32, #tpu.memory_space<vmem>>, vector<2x16xf32>
    %c0_274 = arith.constant 0 : index
    %c0_275 = arith.constant 0 : index
    %741 = vector.load %arg10[%c0_274, %c0_275] : memref<2x16xf32, #tpu.memory_space<vmem>>, vector<2x16xf32>
    %742 = arith.index_cast %739 : i32 to index
    %c0_276 = arith.constant 0 : index
    %c0_277 = arith.constant 0 : index
    %c0_278 = arith.constant 0 : index
    %743 = vector.load %arg2[%742, %c0_276, %c0_277, %c0_278] : memref<8x4x2x16xf32, #tpu.memory_space<vmem>>, vector<1x4x2x16xf32>
    %744 = vector.shape_cast %743 : vector<1x4x2x16xf32> to vector<4x2x16xf32>
    %745 = vector.extract_strided_slice %744 {offsets = [0, 0, 0], sizes = [1, 2, 16], strides = [1, 1, 1]} : vector<4x2x16xf32> to vector<1x2x16xf32>
    %746 = vector.shape_cast %745 : vector<1x2x16xf32> to vector<2x16xf32>
    %747 = vector.extract_strided_slice %4 {offsets = [0, 0, 0], sizes = [1, 16, 16], strides = [1, 1, 1]} : vector<4x16x16xf32> to vector<1x16x16xf32>
    %748 = vector.shape_cast %747 : vector<1x16x16xf32> to vector<16x16xf32>
    %cst_279 = arith.constant dense<0.000000e+00> : vector<2x16xf32>
    %749 = tpu.matmul %740, %748, %cst_279 {dimension_numbers = #tpu.dot_dimension_numbers<[1], [0], [0], [1], [0, 0, 1, 1], [], []>} : vector<2x16xf32>, vector<16x16xf32>, vector<2x16xf32> -> vector<2x16xf32>
    %750 = arith.addf %746, %749 : vector<2x16xf32>
    %751 = vector.extract_strided_slice %744 {offsets = [1, 0, 0], sizes = [1, 2, 16], strides = [1, 1, 1]} : vector<4x2x16xf32> to vector<1x2x16xf32>
    %752 = vector.shape_cast %751 : vector<1x2x16xf32> to vector<2x16xf32>
    %753 = vector.extract_strided_slice %4 {offsets = [1, 0, 0], sizes = [1, 16, 16], strides = [1, 1, 1]} : vector<4x16x16xf32> to vector<1x16x16xf32>
    %754 = vector.shape_cast %753 : vector<1x16x16xf32> to vector<16x16xf32>
    %cst_280 = arith.constant dense<0.000000e+00> : vector<2x16xf32>
    %755 = tpu.matmul %740, %754, %cst_280 {dimension_numbers = #tpu.dot_dimension_numbers<[1], [0], [0], [1], [0, 0, 1, 1], [], []>} : vector<2x16xf32>, vector<16x16xf32>, vector<2x16xf32> -> vector<2x16xf32>
    %756 = arith.addf %752, %755 : vector<2x16xf32>
    %757 = vector.extract_strided_slice %744 {offsets = [2, 0, 0], sizes = [1, 2, 16], strides = [1, 1, 1]} : vector<4x2x16xf32> to vector<1x2x16xf32>
    %758 = vector.shape_cast %757 : vector<1x2x16xf32> to vector<2x16xf32>
    %759 = vector.extract_strided_slice %4 {offsets = [2, 0, 0], sizes = [1, 16, 16], strides = [1, 1, 1]} : vector<4x16x16xf32> to vector<1x16x16xf32>
    %760 = vector.shape_cast %759 : vector<1x16x16xf32> to vector<16x16xf32>
    %cst_281 = arith.constant dense<0.000000e+00> : vector<2x16xf32>
    %761 = tpu.matmul %740, %760, %cst_281 {dimension_numbers = #tpu.dot_dimension_numbers<[1], [0], [0], [1], [0, 0, 1, 1], [], []>} : vector<2x16xf32>, vector<16x16xf32>, vector<2x16xf32> -> vector<2x16xf32>
    %762 = arith.addf %758, %761 : vector<2x16xf32>
    %763 = vector.extract_strided_slice %744 {offsets = [3, 0, 0], sizes = [1, 2, 16], strides = [1, 1, 1]} : vector<4x2x16xf32> to vector<1x2x16xf32>
    %764 = vector.shape_cast %763 : vector<1x2x16xf32> to vector<2x16xf32>
    %765 = vector.extract_strided_slice %4 {offsets = [3, 0, 0], sizes = [1, 16, 16], strides = [1, 1, 1]} : vector<4x16x16xf32> to vector<1x16x16xf32>
    %766 = vector.shape_cast %765 : vector<1x16x16xf32> to vector<16x16xf32>
    %cst_282 = arith.constant dense<0.000000e+00> : vector<2x16xf32>
    %767 = tpu.matmul %740, %766, %cst_282 {dimension_numbers = #tpu.dot_dimension_numbers<[1], [0], [0], [1], [0, 0, 1, 1], [], []>} : vector<2x16xf32>, vector<16x16xf32>, vector<2x16xf32> -> vector<2x16xf32>
    %768 = arith.addf %764, %767 : vector<2x16xf32>
    %769 = arith.negf %750 : vector<2x16xf32>
    %770 = math.exp %769 : vector<2x16xf32>
    %cst_283 = arith.constant 1.000000e+00 : f32
    %771 = vector.broadcast %cst_283 : f32 to vector<2x16xf32>
    %772 = arith.addf %771, %770 : vector<2x16xf32>
    %773 = arith.divf %771, %772 : vector<2x16xf32>
    %774 = arith.negf %756 : vector<2x16xf32>
    %775 = math.exp %774 : vector<2x16xf32>
    %cst_284 = arith.constant 1.000000e+00 : f32
    %776 = vector.broadcast %cst_284 : f32 to vector<2x16xf32>
    %777 = arith.addf %776, %775 : vector<2x16xf32>
    %778 = arith.divf %776, %777 : vector<2x16xf32>
    %779 = math.tanh %762 : vector<2x16xf32>
    %780 = arith.negf %768 : vector<2x16xf32>
    %781 = math.exp %780 : vector<2x16xf32>
    %cst_285 = arith.constant 1.000000e+00 : f32
    %782 = vector.broadcast %cst_285 : f32 to vector<2x16xf32>
    %783 = arith.addf %782, %781 : vector<2x16xf32>
    %784 = arith.divf %782, %783 : vector<2x16xf32>
    %785 = arith.mulf %778, %741 : vector<2x16xf32>
    %786 = arith.mulf %773, %779 : vector<2x16xf32>
    %787 = arith.addf %785, %786 : vector<2x16xf32>
    %788 = math.tanh %787 : vector<2x16xf32>
    %789 = arith.mulf %784, %788 : vector<2x16xf32>
    %c0_286 = arith.constant 0 : index
    %c0_287 = arith.constant 0 : index
    %790 = vector.load %arg10[%c0_286, %c0_287] : memref<2x16xf32, #tpu.memory_space<vmem>>, vector<2x16xf32>
    tpu.vector_store %arg10[%c0_286, %c0_287], %787 {strides = array<i32>} : memref<2x16xf32, #tpu.memory_space<vmem>>, vector<2x16xf32>,
    %c0_288 = arith.constant 0 : index
    %c0_289 = arith.constant 0 : index
    %791 = vector.load %arg9[%c0_288, %c0_289] : memref<2x16xf32, #tpu.memory_space<vmem>>, vector<2x16xf32>
    tpu.vector_store %arg9[%c0_288, %c0_289], %789 {strides = array<i32>} : memref<2x16xf32, #tpu.memory_space<vmem>>, vector<2x16xf32>,
    %792 = arith.index_cast %739 : i32 to index
    %c0_290 = arith.constant 0 : index
    %c0_291 = arith.constant 0 : index
    %793 = vector.load %arg6[%792, %c0_290, %c0_291] : memref<8x2x16xf32, #tpu.memory_space<vmem>>, vector<1x2x16xf32>
    %794 = vector.shape_cast %793 : vector<1x2x16xf32> to vector<2x16xf32>
    %795 = vector.shape_cast %789 : vector<2x16xf32> to vector<1x2x16xf32>
    tpu.vector_store %arg6[%792, %c0_290, %c0_291], %795 {strides = array<i32>} : memref<8x2x16xf32, #tpu.memory_space<vmem>>, vector<1x2x16xf32>,
    %c7_i32_292 = arith.constant 7 : i32
    %c0_293 = arith.constant 0 : index
    %c0_294 = arith.constant 0 : index
    %796 = vector.load %arg7[%c0_293, %c0_294] : memref<2x16xf32, #tpu.memory_space<vmem>>, vector<2x16xf32>
    %c0_295 = arith.constant 0 : index
    %c0_296 = arith.constant 0 : index
    %797 = vector.load %arg8[%c0_295, %c0_296] : memref<2x16xf32, #tpu.memory_space<vmem>>, vector<2x16xf32>
    %798 = arith.index_cast %c7_i32_292 : i32 to index
    %c0_297 = arith.constant 0 : index
    %c0_298 = arith.constant 0 : index
    %c0_299 = arith.constant 0 : index
    %799 = vector.load %arg1[%798, %c0_297, %c0_298, %c0_299] : memref<8x4x2x16xf32, #tpu.memory_space<vmem>>, vector<1x4x2x16xf32>
    %800 = vector.shape_cast %799 : vector<1x4x2x16xf32> to vector<4x2x16xf32>
    %801 = vector.extract_strided_slice %800 {offsets = [0, 0, 0], sizes = [1, 2, 16], strides = [1, 1, 1]} : vector<4x2x16xf32> to vector<1x2x16xf32>
    %802 = vector.shape_cast %801 : vector<1x2x16xf32> to vector<2x16xf32>
    %803 = vector.extract_strided_slice %3 {offsets = [0, 0, 0], sizes = [1, 16, 16], strides = [1, 1, 1]} : vector<4x16x16xf32> to vector<1x16x16xf32>
    %804 = vector.shape_cast %803 : vector<1x16x16xf32> to vector<16x16xf32>
    %cst_300 = arith.constant dense<0.000000e+00> : vector<2x16xf32>
    %805 = tpu.matmul %796, %804, %cst_300 {dimension_numbers = #tpu.dot_dimension_numbers<[1], [0], [0], [1], [0, 0, 1, 1], [], []>} : vector<2x16xf32>, vector<16x16xf32>, vector<2x16xf32> -> vector<2x16xf32>
    %806 = arith.addf %802, %805 : vector<2x16xf32>
    %807 = vector.extract_strided_slice %800 {offsets = [1, 0, 0], sizes = [1, 2, 16], strides = [1, 1, 1]} : vector<4x2x16xf32> to vector<1x2x16xf32>
    %808 = vector.shape_cast %807 : vector<1x2x16xf32> to vector<2x16xf32>
    %809 = vector.extract_strided_slice %3 {offsets = [1, 0, 0], sizes = [1, 16, 16], strides = [1, 1, 1]} : vector<4x16x16xf32> to vector<1x16x16xf32>
    %810 = vector.shape_cast %809 : vector<1x16x16xf32> to vector<16x16xf32>
    %cst_301 = arith.constant dense<0.000000e+00> : vector<2x16xf32>
    %811 = tpu.matmul %796, %810, %cst_301 {dimension_numbers = #tpu.dot_dimension_numbers<[1], [0], [0], [1], [0, 0, 1, 1], [], []>} : vector<2x16xf32>, vector<16x16xf32>, vector<2x16xf32> -> vector<2x16xf32>
    %812 = arith.addf %808, %811 : vector<2x16xf32>
    %813 = vector.extract_strided_slice %800 {offsets = [2, 0, 0], sizes = [1, 2, 16], strides = [1, 1, 1]} : vector<4x2x16xf32> to vector<1x2x16xf32>
    %814 = vector.shape_cast %813 : vector<1x2x16xf32> to vector<2x16xf32>
    %815 = vector.extract_strided_slice %3 {offsets = [2, 0, 0], sizes = [1, 16, 16], strides = [1, 1, 1]} : vector<4x16x16xf32> to vector<1x16x16xf32>
    %816 = vector.shape_cast %815 : vector<1x16x16xf32> to vector<16x16xf32>
    %cst_302 = arith.constant dense<0.000000e+00> : vector<2x16xf32>
    %817 = tpu.matmul %796, %816, %cst_302 {dimension_numbers = #tpu.dot_dimension_numbers<[1], [0], [0], [1], [0, 0, 1, 1], [], []>} : vector<2x16xf32>, vector<16x16xf32>, vector<2x16xf32> -> vector<2x16xf32>
    %818 = arith.addf %814, %817 : vector<2x16xf32>
    %819 = vector.extract_strided_slice %800 {offsets = [3, 0, 0], sizes = [1, 2, 16], strides = [1, 1, 1]} : vector<4x2x16xf32> to vector<1x2x16xf32>
    %820 = vector.shape_cast %819 : vector<1x2x16xf32> to vector<2x16xf32>
    %821 = vector.extract_strided_slice %3 {offsets = [3, 0, 0], sizes = [1, 16, 16], strides = [1, 1, 1]} : vector<4x16x16xf32> to vector<1x16x16xf32>
    %822 = vector.shape_cast %821 : vector<1x16x16xf32> to vector<16x16xf32>
    %cst_303 = arith.constant dense<0.000000e+00> : vector<2x16xf32>
    %823 = tpu.matmul %796, %822, %cst_303 {dimension_numbers = #tpu.dot_dimension_numbers<[1], [0], [0], [1], [0, 0, 1, 1], [], []>} : vector<2x16xf32>, vector<16x16xf32>, vector<2x16xf32> -> vector<2x16xf32>
    %824 = arith.addf %820, %823 : vector<2x16xf32>
    %825 = arith.negf %806 : vector<2x16xf32>
    %826 = math.exp %825 : vector<2x16xf32>
    %cst_304 = arith.constant 1.000000e+00 : f32
    %827 = vector.broadcast %cst_304 : f32 to vector<2x16xf32>
    %828 = arith.addf %827, %826 : vector<2x16xf32>
    %829 = arith.divf %827, %828 : vector<2x16xf32>
    %830 = arith.negf %812 : vector<2x16xf32>
    %831 = math.exp %830 : vector<2x16xf32>
    %cst_305 = arith.constant 1.000000e+00 : f32
    %832 = vector.broadcast %cst_305 : f32 to vector<2x16xf32>
    %833 = arith.addf %832, %831 : vector<2x16xf32>
    %834 = arith.divf %832, %833 : vector<2x16xf32>
    %835 = math.tanh %818 : vector<2x16xf32>
    %836 = arith.negf %824 : vector<2x16xf32>
    %837 = math.exp %836 : vector<2x16xf32>
    %cst_306 = arith.constant 1.000000e+00 : f32
    %838 = vector.broadcast %cst_306 : f32 to vector<2x16xf32>
    %839 = arith.addf %838, %837 : vector<2x16xf32>
    %840 = arith.divf %838, %839 : vector<2x16xf32>
    %841 = arith.mulf %834, %797 : vector<2x16xf32>
    %842 = arith.mulf %829, %835 : vector<2x16xf32>
    %843 = arith.addf %841, %842 : vector<2x16xf32>
    %844 = math.tanh %843 : vector<2x16xf32>
    %845 = arith.mulf %840, %844 : vector<2x16xf32>
    %c0_307 = arith.constant 0 : index
    %c0_308 = arith.constant 0 : index
    %846 = vector.load %arg8[%c0_307, %c0_308] : memref<2x16xf32, #tpu.memory_space<vmem>>, vector<2x16xf32>
    tpu.vector_store %arg8[%c0_307, %c0_308], %843 {strides = array<i32>} : memref<2x16xf32, #tpu.memory_space<vmem>>, vector<2x16xf32>,
    %c0_309 = arith.constant 0 : index
    %c0_310 = arith.constant 0 : index
    %847 = vector.load %arg7[%c0_309, %c0_310] : memref<2x16xf32, #tpu.memory_space<vmem>>, vector<2x16xf32>
    tpu.vector_store %arg7[%c0_309, %c0_310], %845 {strides = array<i32>} : memref<2x16xf32, #tpu.memory_space<vmem>>, vector<2x16xf32>,
    %848 = arith.index_cast %c7_i32_292 : i32 to index
    %c0_311 = arith.constant 0 : index
    %c0_312 = arith.constant 0 : index
    %849 = vector.load %arg5[%848, %c0_311, %c0_312] : memref<8x2x16xf32, #tpu.memory_space<vmem>>, vector<1x2x16xf32>
    %850 = vector.shape_cast %849 : vector<1x2x16xf32> to vector<2x16xf32>
    %851 = vector.shape_cast %845 : vector<2x16xf32> to vector<1x2x16xf32>
    tpu.vector_store %arg5[%848, %c0_311, %c0_312], %851 {strides = array<i32>} : memref<8x2x16xf32, #tpu.memory_space<vmem>>, vector<1x2x16xf32>,
    %c7_i32_313 = arith.constant 7 : i32
    %852 = arith.subi %c7_i32_313, %c7_i32_292 : i32
    %c0_314 = arith.constant 0 : index
    %c0_315 = arith.constant 0 : index
    %853 = vector.load %arg9[%c0_314, %c0_315] : memref<2x16xf32, #tpu.memory_space<vmem>>, vector<2x16xf32>
    %c0_316 = arith.constant 0 : index
    %c0_317 = arith.constant 0 : index
    %854 = vector.load %arg10[%c0_316, %c0_317] : memref<2x16xf32, #tpu.memory_space<vmem>>, vector<2x16xf32>
    %855 = arith.index_cast %852 : i32 to index
    %c0_318 = arith.constant 0 : index
    %c0_319 = arith.constant 0 : index
    %c0_320 = arith.constant 0 : index
    %856 = vector.load %arg2[%855, %c0_318, %c0_319, %c0_320] : memref<8x4x2x16xf32, #tpu.memory_space<vmem>>, vector<1x4x2x16xf32>
    %857 = vector.shape_cast %856 : vector<1x4x2x16xf32> to vector<4x2x16xf32>
    %858 = vector.extract_strided_slice %857 {offsets = [0, 0, 0], sizes = [1, 2, 16], strides = [1, 1, 1]} : vector<4x2x16xf32> to vector<1x2x16xf32>
    %859 = vector.shape_cast %858 : vector<1x2x16xf32> to vector<2x16xf32>
    %860 = vector.extract_strided_slice %4 {offsets = [0, 0, 0], sizes = [1, 16, 16], strides = [1, 1, 1]} : vector<4x16x16xf32> to vector<1x16x16xf32>
    %861 = vector.shape_cast %860 : vector<1x16x16xf32> to vector<16x16xf32>
    %cst_321 = arith.constant dense<0.000000e+00> : vector<2x16xf32>
    %862 = tpu.matmul %853, %861, %cst_321 {dimension_numbers = #tpu.dot_dimension_numbers<[1], [0], [0], [1], [0, 0, 1, 1], [], []>} : vector<2x16xf32>, vector<16x16xf32>, vector<2x16xf32> -> vector<2x16xf32>
    %863 = arith.addf %859, %862 : vector<2x16xf32>
    %864 = vector.extract_strided_slice %857 {offsets = [1, 0, 0], sizes = [1, 2, 16], strides = [1, 1, 1]} : vector<4x2x16xf32> to vector<1x2x16xf32>
    %865 = vector.shape_cast %864 : vector<1x2x16xf32> to vector<2x16xf32>
    %866 = vector.extract_strided_slice %4 {offsets = [1, 0, 0], sizes = [1, 16, 16], strides = [1, 1, 1]} : vector<4x16x16xf32> to vector<1x16x16xf32>
    %867 = vector.shape_cast %866 : vector<1x16x16xf32> to vector<16x16xf32>
    %cst_322 = arith.constant dense<0.000000e+00> : vector<2x16xf32>
    %868 = tpu.matmul %853, %867, %cst_322 {dimension_numbers = #tpu.dot_dimension_numbers<[1], [0], [0], [1], [0, 0, 1, 1], [], []>} : vector<2x16xf32>, vector<16x16xf32>, vector<2x16xf32> -> vector<2x16xf32>
    %869 = arith.addf %865, %868 : vector<2x16xf32>
    %870 = vector.extract_strided_slice %857 {offsets = [2, 0, 0], sizes = [1, 2, 16], strides = [1, 1, 1]} : vector<4x2x16xf32> to vector<1x2x16xf32>
    %871 = vector.shape_cast %870 : vector<1x2x16xf32> to vector<2x16xf32>
    %872 = vector.extract_strided_slice %4 {offsets = [2, 0, 0], sizes = [1, 16, 16], strides = [1, 1, 1]} : vector<4x16x16xf32> to vector<1x16x16xf32>
    %873 = vector.shape_cast %872 : vector<1x16x16xf32> to vector<16x16xf32>
    %cst_323 = arith.constant dense<0.000000e+00> : vector<2x16xf32>
    %874 = tpu.matmul %853, %873, %cst_323 {dimension_numbers = #tpu.dot_dimension_numbers<[1], [0], [0], [1], [0, 0, 1, 1], [], []>} : vector<2x16xf32>, vector<16x16xf32>, vector<2x16xf32> -> vector<2x16xf32>
    %875 = arith.addf %871, %874 : vector<2x16xf32>
    %876 = vector.extract_strided_slice %857 {offsets = [3, 0, 0], sizes = [1, 2, 16], strides = [1, 1, 1]} : vector<4x2x16xf32> to vector<1x2x16xf32>
    %877 = vector.shape_cast %876 : vector<1x2x16xf32> to vector<2x16xf32>
    %878 = vector.extract_strided_slice %4 {offsets = [3, 0, 0], sizes = [1, 16, 16], strides = [1, 1, 1]} : vector<4x16x16xf32> to vector<1x16x16xf32>
    %879 = vector.shape_cast %878 : vector<1x16x16xf32> to vector<16x16xf32>
    %cst_324 = arith.constant dense<0.000000e+00> : vector<2x16xf32>
    %880 = tpu.matmul %853, %879, %cst_324 {dimension_numbers = #tpu.dot_dimension_numbers<[1], [0], [0], [1], [0, 0, 1, 1], [], []>} : vector<2x16xf32>, vector<16x16xf32>, vector<2x16xf32> -> vector<2x16xf32>
    %881 = arith.addf %877, %880 : vector<2x16xf32>
    %882 = arith.negf %863 : vector<2x16xf32>
    %883 = math.exp %882 : vector<2x16xf32>
    %cst_325 = arith.constant 1.000000e+00 : f32
    %884 = vector.broadcast %cst_325 : f32 to vector<2x16xf32>
    %885 = arith.addf %884, %883 : vector<2x16xf32>
    %886 = arith.divf %884, %885 : vector<2x16xf32>
    %887 = arith.negf %869 : vector<2x16xf32>
    %888 = math.exp %887 : vector<2x16xf32>
    %cst_326 = arith.constant 1.000000e+00 : f32
    %889 = vector.broadcast %cst_326 : f32 to vector<2x16xf32>
    %890 = arith.addf %889, %888 : vector<2x16xf32>
    %891 = arith.divf %889, %890 : vector<2x16xf32>
    %892 = math.tanh %875 : vector<2x16xf32>
    %893 = arith.negf %881 : vector<2x16xf32>
    %894 = math.exp %893 : vector<2x16xf32>
    %cst_327 = arith.constant 1.000000e+00 : f32
    %895 = vector.broadcast %cst_327 : f32 to vector<2x16xf32>
    %896 = arith.addf %895, %894 : vector<2x16xf32>
    %897 = arith.divf %895, %896 : vector<2x16xf32>
    %898 = arith.mulf %891, %854 : vector<2x16xf32>
    %899 = arith.mulf %886, %892 : vector<2x16xf32>
    %900 = arith.addf %898, %899 : vector<2x16xf32>
    %901 = math.tanh %900 : vector<2x16xf32>
    %902 = arith.mulf %897, %901 : vector<2x16xf32>
    %c0_328 = arith.constant 0 : index
    %c0_329 = arith.constant 0 : index
    %903 = vector.load %arg10[%c0_328, %c0_329] : memref<2x16xf32, #tpu.memory_space<vmem>>, vector<2x16xf32>
    tpu.vector_store %arg10[%c0_328, %c0_329], %900 {strides = array<i32>} : memref<2x16xf32, #tpu.memory_space<vmem>>, vector<2x16xf32>,
    %c0_330 = arith.constant 0 : index
    %c0_331 = arith.constant 0 : index
    %904 = vector.load %arg9[%c0_330, %c0_331] : memref<2x16xf32, #tpu.memory_space<vmem>>, vector<2x16xf32>
    tpu.vector_store %arg9[%c0_330, %c0_331], %902 {strides = array<i32>} : memref<2x16xf32, #tpu.memory_space<vmem>>, vector<2x16xf32>,
    %905 = arith.index_cast %852 : i32 to index
    %c0_332 = arith.constant 0 : index
    %c0_333 = arith.constant 0 : index
    %906 = vector.load %arg6[%905, %c0_332, %c0_333] : memref<8x2x16xf32, #tpu.memory_space<vmem>>, vector<1x2x16xf32>
    %907 = vector.shape_cast %906 : vector<1x2x16xf32> to vector<2x16xf32>
    %908 = vector.shape_cast %902 : vector<2x16xf32> to vector<1x2x16xf32>
    tpu.vector_store %arg6[%905, %c0_332, %c0_333], %908 {strides = array<i32>} : memref<8x2x16xf32, #tpu.memory_space<vmem>>, vector<1x2x16xf32>,
    %c8_i32 = arith.constant 8 : i32
    return
  }
  func.func @transform_0(%arg0: i32) -> (i32, i32, i32, i32) {
    %c0_i32 = arith.constant 0 : i32
    %c0_i32_0 = arith.constant 0 : i32
    %c0_i32_1 = arith.constant 0 : i32
    %c0_i32_2 = arith.constant 0 : i32
    return %arg0, %c0_i32, %c0_i32_0, %c0_i32_1 : i32, i32, i32, i32
  }
  func.func @transform_1(%arg0: i32) -> (i32, i32, i32, i32) {
    %c0_i32 = arith.constant 0 : i32
    %0 = arith.subi %c0_i32, %arg0 : i32
    %c0_i32_0 = arith.constant 0 : i32
    %c0_i32_1 = arith.constant 0 : i32
    %c0_i32_2 = arith.constant 0 : i32
    %c0_i32_3 = arith.constant 0 : i32
    return %0, %c0_i32_0, %c0_i32_1, %c0_i32_2 : i32, i32, i32, i32
  }
  func.func @transform_2(%arg0: i32) -> (i32, i32, i32) {
    %c0_i32 = arith.constant 0 : i32
    %c0_i32_0 = arith.constant 0 : i32
    %c0_i32_1 = arith.constant 0 : i32
    %c0_i32_2 = arith.constant 0 : i32
    return %c0_i32, %c0_i32_0, %c0_i32_1 : i32, i32, i32
  }
  func.func @transform_3(%arg0: i32) -> (i32, i32, i32) {
    %c0_i32 = arith.constant 0 : i32
    %c0_i32_0 = arith.constant 0 : i32
    %c0_i32_1 = arith.constant 0 : i32
    %c0_i32_2 = arith.constant 0 : i32
    return %c0_i32, %c0_i32_0, %c0_i32_1 : i32, i32, i32
  }
  func.func @transform_4(%arg0: i32) -> (i32, i32, i32) {
    %c0_i32 = arith.constant 0 : i32
    %c0_i32_0 = arith.constant 0 : i32
    %c0_i32_1 = arith.constant 0 : i32
    return %arg0, %c0_i32, %c0_i32_0 : i32, i32, i32
  }
  func.func @transform_5(%arg0: i32) -> (i32, i32, i32) {
    %c0_i32 = arith.constant 0 : i32
    %0 = arith.subi %c0_i32, %arg0 : i32
    %c0_i32_0 = arith.constant 0 : i32
    %c0_i32_1 = arith.constant 0 : i32
    %c0_i32_2 = arith.constant 0 : i32
    return %0, %c0_i32_0, %c0_i32_1 : i32, i32, i32
  }
}

</mosaic_0001>

<bundles_post_ra>
// kernel: subj_lstm_forward.1
= control target key start
LH: loop header
LB: loop body
LE: loop exit
PB: predicated region body
PF: predicated region fallthrough
CT: control target
= control target key end

     0   :  { %vm62_vm0 = vcmask 123904   ;;  %v6365_v0 = vmov 0.0   ;;  %vm6366_vm1 = vmmov 0   ;;  %vm89_vm2 = vcmask 130048   ;;  %s7301_s2 = inlined_call_operand.vmem [shape: f32[4,16,16], index: 2, kind: input, shape index: {}]   ;;  %s7302_s3 = inlined_call_operand.vmem [shape: f32[4,16,16], index: 3, kind: input, shape index: {}]   ;;  %s7303_s0 = inlined_call_operand.vmem [shape: f32[8,4,2,16], index: 0, kind: input, shape index: {}]   ;;  %s7304_s1 = inlined_call_operand.vmem [shape: f32[8,4,2,16], index: 1, kind: input, shape index: {}]   ;;  %s7305_s4 = inlined_call_operand.vmem [shape: f32[8,2,16], index: 4, kind: output, shape index: {0}]   ;;  %s7306_s5 = inlined_call_operand.vmem [shape: f32[8,2,16], index: 5, kind: output, shape index: {1}]  }
   0x1   :  { %5643 = vmatprep.subr.mxu0 %v6365_v0  ;;  %5650 = vmatprep.subr.mxu1 %v6365_v0  ;;  %v6402_v1 = vld [vmem:[%s7301_s2 + $0x8] sm:$0xff]  ;;  %v6407_v2 = vld [vmem:[%s7301_s2 + $0x18] sm:$0xff]  ;;  %v6412_v3 = vld [vmem:[%s7301_s2] sm:$0xff]  ;;  %63 = vst.msk [vmem:[#allocation2] sm:$0x3] %vm62_vm0, %v6365_v0 }
   0x2   :  { %64 = vst.msk [vmem:[#allocation3] sm:$0x3] %vm62_vm0, %v6365_v0  ;;  %65 = vst.msk [vmem:[#allocation4] sm:$0x3] %vm62_vm0, %v6365_v0  ;;  %5644 = vmatpush3.msra.mxu0 %v6402_v1  ;;  %5651 = vmatpush3.msra.mxu1 %v6407_v2  ;;  %v6427_v4 = vld [vmem:[%s7301_s2 + $0x10] sm:$0xff]  ;;  %v6442_v5 = vld [vmem:[%s7301_s2 + $0x28] sm:$0xff] }
   0x3   :  { %66 = vst.msk [vmem:[#allocation5] sm:$0x3] %vm62_vm0, %v6365_v0  ;;  %5645 = vmatprep.subr.mxu0 %v6365_v0  ;;  %5652 = vmatprep.subr.mxu1 %v6365_v0  ;;  %v6447_v6 = vld [vmem:[%s7301_s2 + $0x38] sm:$0xff]  ;;  %v6454_v8 = vld [vmem:[%s7301_s2 + $0x20] sm:$0xff]  ;;  %v6459_v9 = vld [vmem:[%s7301_s2 + $0x30] sm:$0xff] }
   0x4   :  { %5646 = vmatpush3.msra.mxu0 %v6412_v3  ;;  %5653 = vmatpush3.msra.mxu1 %v6427_v4  ;;  %v6474_v10 = vld [vmem:[%s7302_s3 + $0x8] sm:$0xff]  ;;  %v6479_v11 = vld [vmem:[%s7302_s3 + $0x18] sm:$0xff]  ;;  %v6488_v12 = vld [vmem:[%s7302_s3] sm:$0xff] }
   0x5   :  { %5647 = vmatprep.mubr.msk.f32.mxu0 %vm6366_vm1, %v6365_v0  ;;  %5654 = vmatprep.mubr.msk.f32.mxu1 %vm6366_vm1, %v6365_v0  ;;  %v6493_v13 = vld [vmem:[%s7302_s3 + $0x10] sm:$0xff]  ;;  %v6508_v15 = vld [vmem:[%s7302_s3 + $0x28] sm:$0xff]  ;;  %v6513_v16 = vld [vmem:[%s7302_s3 + $0x38] sm:$0xff] }
   0x6   :  { %5657 = vmatprep.subr.mxu0 %v6365_v0  ;;  %5664 = vmatprep.subr.mxu1 %v6365_v0  ;;  %v6522_v17 = vld [vmem:[%s7302_s3 + $0x20] sm:$0xff]  ;;  %v6529_v18 = vld [vmem:[%s7302_s3 + $0x30] sm:$0xff]  ;;  %v5276_v34 = vld [vmem:[%s7304_s1 + $0x38] sm:$0x3] }
   0x7   :  { %v85_v19 = vld [vmem:[%s7303_s0] sm:$0x3]  ;;  %v86_v20 = vld [vmem:[%s7303_s0 + $0x2] sm:$0x3]  ;;  %v88_v31 = vld [vmem:[%s7303_s0 + $0x6] sm:$0x3] }
   0x8   :  { %v83_v7 = vld [vmem:[#allocation2] sm:$0x3]  ;;  %v5277_v35 = vld [vmem:[%s7304_s1 + $0x3a] sm:$0x3]  ;;  %v87_v41 = vld [vmem:[%s7303_s0 + $0x4] sm:$0x3] }
   0x9   :  { %5648 = vmatmul.mubr.msk.f32.vlgmr.msra.gmra.mxu0 %vm89_vm2, %v83_v7  ;;  %5655 = vmatmul.mubr.msk.f32.vlgmr.msra.gmra.mxu1 %vm89_vm2, %v83_v7  ;;  %v405_v14 = vld [vmem:[#allocation4] sm:$0x3]  ;;  %v5279_v51 = vld [vmem:[%s7304_s1 + $0x3e] sm:$0x3]  ;;  %v5278_v58 = vld [vmem:[%s7304_s1 + $0x3c] sm:$0x3] }
   0xa   :  { %5658 = vmatpush3.msra.mxu0 %v6442_v5  ;;  %5665 = vmatpush3.msra.mxu1 %v6447_v6 }
   0xb   :  { %5659 = vmatprep.subr.mxu0 %v6365_v0  ;;  %5666 = vmatprep.subr.mxu1 %v6365_v0 }
   0xc   :  { %5660 = vmatpush3.msra.mxu0 %v6454_v8  ;;  %5667 = vmatpush3.msra.mxu1 %v6459_v9 }
   0xd   :  { %5661 = vmatprep.mubr.msk.f32.mxu0 %vm6366_vm1, %v6365_v0  ;;  %5668 = vmatprep.mubr.msk.f32.mxu1 %vm6366_vm1, %v6365_v0 }
   0xe   :  { %5671 = vmatprep.subr.mxu0 %v6365_v0  ;;  %5678 = vmatprep.subr.mxu1 %v6365_v0 }
   0xf   :  { %5662 = vmatmul.mubr.msk.f32.vlgmr.msra.gmra.mxu0 %vm89_vm2, %v83_v7  ;;  %5669 = vmatmul.mubr.msk.f32.vlgmr.msra.gmra.mxu1 %vm89_vm2, %v83_v7 }
  0x10   :  { %5672 = vmatpush3.msra.mxu0 %v6474_v10  ;;  %5679 = vmatpush3.msra.mxu1 %v6479_v11 }
  0x11   :  { %5673 = vmatprep.subr.mxu0 %v6365_v0  ;;  %5680 = vmatprep.subr.mxu1 %v6365_v0 }
  0x12   :  { %5674 = vmatpush3.msra.mxu0 %v6488_v12  ;;  %5681 = vmatpush3.msra.mxu1 %v6493_v13 }
  0x13   :  { %5675 = vmatprep.mubr.msk.f32.mxu0 %vm6366_vm1, %v6365_v0  ;;  %5682 = vmatprep.mubr.msk.f32.mxu1 %vm6366_vm1, %v6365_v0 }
  0x14   :  { %5676 = vmatmul.mubr.msk.f32.vlgmr.msra.gmra.mxu0 %vm89_vm2, %v405_v14  ;;  %5683 = vmatmul.mubr.msk.f32.vlgmr.msra.gmra.mxu1 %vm89_vm2, %v405_v14 }
  0x15   :  { %5685 = vmatprep.subr.mxu0 %v6365_v0  ;;  %5692 = vmatprep.subr.mxu1 %v6365_v0 }
  0x16   :  { %5686 = vmatpush3.msra.mxu0 %v6508_v15  ;;  %5693 = vmatpush3.msra.mxu1 %v6513_v16 }
  0x17   :  { %5687 = vmatprep.subr.mxu0 %v6365_v0  ;;  %5694 = vmatprep.subr.mxu1 %v6365_v0 }
  0x18   :  { %5688 = vmatpush3.msra.mxu0 %v6522_v17  ;;  %5689 = vmatprep.mubr.msk.f32.mxu0 %vm6366_vm1, %v6365_v0 }
  0x19   :  { %5695 = vmatpush3.msra.mxu1 %v6529_v18  ;;  %5696 = vmatprep.mubr.msk.f32.mxu1 %vm6366_vm1, %v6365_v0 }
  0x1a   :  { %5690 = vmatmul.mubr.msk.f32.vlgmr.msra.gmra.mxu0 %vm89_vm2, %v405_v14  ;;  %5697 = vmatmul.mubr.msk.f32.vlgmr.msra.gmra.mxu1 %vm89_vm2, %v405_v14 }
  0x1b   :  { %5699 = vmatprep.subr.mxu0 %v6365_v0  ;;  %5706 = vmatprep.subr.mxu1 %v6365_v0 }
  0x1c   :  { %5700 = vmatpush3.msra.mxu0 %v6402_v1  ;;  %5707 = vmatpush3.msra.mxu1 %v6407_v2 }
  0x1d   :  { %5701 = vmatprep.subr.mxu0 %v6365_v0  ;;  %5708 = vmatprep.subr.mxu1 %v6365_v0 }
  0x1e   :  { %5702 = vmatpush3.msra.mxu0 %v6412_v3  ;;  %5709 = vmatpush3.msra.mxu1 %v6427_v4 }
  0x1f   :  { %5703 = vmatprep.mubr.msk.f32.mxu0 %vm6366_vm1, %v6365_v0  ;;  %5710 = vmatprep.mubr.msk.f32.mxu1 %vm6366_vm1, %v6365_v0 }
  0x20   :  { %5713 = vmatprep.subr.mxu0 %v6365_v0  ;;  %5720 = vmatprep.subr.mxu1 %v6365_v0 }
  0xc9   :  { %v159_v21 = vpop.f32.mrf.mxu0  ;;  %v230_v22 = vpop.f32.mrf.mxu1 }
  0xca   :  { %v163_v23 = vadd.f32 %v159_v21, %v85_v19  ;;  %v234_v24 = vadd.f32 %v230_v22, %v86_v20  ;;  %v84_v20 = vld [vmem:[#allocation3] sm:$0x3] }
  0xcb   :  { %v5649_v25 = vpop.f32.mrf.mxu0  ;;  %v5656_v26 = vpop.f32.mrf.mxu1 }
  0xcc   :  { %v5273_v27 = vmul.f32 -1.442695, %v163_v23  ;;  %v5274_v28 = vmul.f32 -1.442695, %v234_v24 }
  0xce   :  { %6093 = vpow2.f32 %v5273_v27 }
  0xcf   :  { %6095 = vpow2.f32 %v5274_v28  ;;  %v301_v29 = vpop.f32.mrf.mxu0  ;;  %v372_v30 = vpop.f32.mrf.mxu1 }
  0xd0   :  { %v376_v36 = vadd.f32 %v372_v30, %v88_v31  ;;  %v305_v47 = vadd.f32 %v301_v29, %v87_v41  ;;  %v406_v29 = vld [vmem:[#allocation5] sm:$0x3] }
  0xd1   :  { %v5663_v32 = vpop.f32.mrf.mxu0  ;;  %v5670_v33 = vpop.f32.mrf.mxu1 }
  0xd2   :  { %v5275_v46 = vmul.f32 -1.442695, %v376_v36 }
  0xd4   :  { %v481_v37 = vpop.f32.mrf.mxu0  ;;  %v552_v38 = vpop.f32.mrf.mxu1 }
  0xd5   :  { %v485_v39 = vadd.f32 %v5276_v34, %v481_v37  ;;  %v556_v40 = vadd.f32 %v5277_v35, %v552_v38 }
  0xd6   :  { %v5677_v42 = vpop.f32.mrf.mxu0  ;;  %v5684_v43 = vpop.f32.mrf.mxu1 }
  0xd7   :  { %v5284_v44 = vmul.f32 -1.442695, %v485_v39  ;;  %v5285_v45 = vmul.f32 -1.442695, %v556_v40 }
  0xd9   :  { %6097 = vpow2.f32 %v5284_v44  ;;  %v5288_v44 = vld [vmem:[%s7303_s0 + $0x8] sm:$0x3] }
  0xda   :  { %6099 = vpow2.f32 %v5285_v45  ;;  %v623_v48 = vpop.f32.mrf.mxu0  ;;  %v694_v49 = vpop.f32.mrf.mxu1  ;;  %v5289_v45 = vld [vmem:[%s7303_s0 + $0xa] sm:$0x3] }
  0xdb   :  { %v6094_v50 = vpop.eup %6093  ;;  %6101 = vpow2.f32 %v5275_v46  ;;  %v698_v57 = vadd.f32 %v5279_v51, %v694_v49  ;;  %v627_v60 = vadd.f32 %v5278_v58, %v623_v48 }
  0xdc   :  { %v6096_v52 = vpop.eup %6095  ;;  %v380_v53 = vadd.f32 1.0, %v6094_v50  ;;  %v5691_v54 = vpop.f32.mrf.mxu0  ;;  %6103 = vtanh.f32 %v305_v47 }
  0xdd   :  { %v5698_v55 = vpop.f32.mrf.mxu1  ;;  %v386_v56 = vadd.f32 1.0, %v6096_v52  ;;  %v5286_v59 = vmul.f32 -1.442695, %v698_v57 }
  0xde   :  { %6105 = vrcp.f32 %v380_v53 }
  0xdf   :  { %6107 = vrcp.f32 %v386_v56  ;;  %v5291_v56 = vld [vmem:[%s7303_s0 + $0xe] sm:$0x3] }
  0xe0   :  { %6109 = vpow2.f32 %v5286_v59  ;;  %v5300_v59 = vld [vmem:[%s7304_s1 + $0x30] sm:$0x3] }
  0xe1   :  { %6111 = vtanh.f32 %v627_v60  ;;  %v5301_v60 = vld [vmem:[%s7304_s1 + $0x32] sm:$0x3] }
  0xe6   :  { %v6098_v61 = vpop.eup %6097 }
  0xe7   :  { %v6100_v62 = vpop.eup %6099  ;;  %v702_v63 = vadd.f32 1.0, %v6098_v61 }
  0xe8   :  { %v708_v7 = vadd.f32 1.0, %v6100_v62  ;;  %v6102_v14 = vpop.eup %6101 }
  0xe9   :  { %6113 = vrcp.f32 %v702_v63  ;;  %v6104_v19 = vpop.eup %6103  ;;  %v393_v24 = vadd.f32 1.0, %v6102_v14 }
  0xea   :  { %6115 = vrcp.f32 %v708_v7 }
  0xeb   :  { %v6106_v21 = vpop.eup %6105  ;;  %6117 = vrcp.f32 %v393_v24 }
  0xec   :  { %v6108_v22 = vpop.eup %6107  ;;  %v397_v23 = vmul.f32 %v6106_v21, %v6104_v19  ;;  %v5290_v19 = vld [vmem:[%s7303_s0 + $0xc] sm:$0x3] }
  0xed   :  { %v396_v25 = vmul.f32 %v6108_v22, %v84_v20  ;;  %v6110_v27 = vpop.eup %6109 }
  0xee   :  { %v6112_v28 = vpop.eup %6111  ;;  %v715_v31 = vadd.f32 1.0, %v6110_v27 }
  0xef   :  { %v398_v26 = vadd.f32 %v397_v23, %v396_v25 }
  0xf1   :  { %6119 = vtanh.f32 %v398_v26  ;;  %402 = vst.msk [vmem:[#allocation3] sm:$0x3] %vm62_vm0, %v398_v26 }
  0xf2   :  { %6121 = vrcp.f32 %v715_v31  ;;  %v5303_v31 = vld [vmem:[%s7304_s1 + $0x36] sm:$0x3] }
  0xf6   :  { %v6114_v30 = vpop.eup %6113 }
  0xf7   :  { %v6116_v32 = vpop.eup %6115  ;;  %v719_v33 = vmul.f32 %v6114_v30, %v6112_v28 }
  0xf8   :  { %v718_v34 = vmul.f32 %v6116_v32, %v406_v29  ;;  %v6118_v36 = vpop.eup %6117 }
  0xfa   :  { %v720_v35 = vadd.f32 %v719_v33, %v718_v34 }
  0xfc   :  { %6123 = vtanh.f32 %v720_v35  ;;  %723 = vst.msk [vmem:[#allocation5] sm:$0x3] %vm62_vm0, %v720_v35 }
  0xfe   :  { %v6120_v37 = vpop.eup %6119 }
  0xff   :  { %v400_v38 = vmul.f32 %v6120_v37, %v6118_v36  ;;  %v6122_v39 = vpop.eup %6121  ;;  %v5302_v36 = vld [vmem:[%s7304_s1 + $0x34] sm:$0x3] }
 0x101   :  { %403 = vst.msk [vmem:[#allocation2] sm:$0x3] %vm62_vm0, %v400_v38  ;;  %404 = vst.msk [vmem:[%s7305_s4] sm:$0x3] %vm62_vm0, %v400_v38 }
 0x108   :  { %v727_v40 = vld [vmem:[#allocation2] sm:$0x3] }
 0x109   :  { %v6124_v41 = vpop.eup %6123  ;;  %5704 = vmatmul.mubr.msk.f32.vlgmr.msra.gmra.mxu0 %vm89_vm2, %v727_v40  ;;  %5711 = vmatmul.mubr.msk.f32.vlgmr.msra.gmra.mxu1 %vm89_vm2, %v727_v40 }
 0x10a   :  { %v722_v42 = vmul.f32 %v6124_v41, %v6122_v39  ;;  %5714 = vmatpush3.msra.mxu0 %v6442_v5  ;;  %5721 = vmatpush3.msra.mxu1 %v6447_v6 }
 0x10b   :  { %5715 = vmatprep.subr.mxu0 %v6365_v0  ;;  %5722 = vmatprep.subr.mxu1 %v6365_v0 }
 0x10c   :  { %724 = vst.msk [vmem:[#allocation4] sm:$0x3] %vm62_vm0, %v722_v42  ;;  %5287 = vst.msk [vmem:[%s7306_s5 + $0xe] sm:$0x3] %vm62_vm0, %v722_v42  ;;  %5716 = vmatpush3.msra.mxu0 %v6454_v8  ;;  %5723 = vmatpush3.msra.mxu1 %v6459_v9 }
 0x10d   :  { %5717 = vmatprep.mubr.msk.f32.mxu0 %vm6366_vm1, %v6365_v0  ;;  %5724 = vmatprep.mubr.msk.f32.mxu1 %vm6366_vm1, %v6365_v0 }
 0x10e   :  { %5727 = vmatprep.subr.mxu0 %v6365_v0  ;;  %5734 = vmatprep.subr.mxu1 %v6365_v0 }
 0x10f   :  { %5718 = vmatmul.mubr.msk.f32.vlgmr.msra.gmra.mxu0 %vm89_vm2, %v727_v40  ;;  %5725 = vmatmul.mubr.msk.f32.vlgmr.msra.gmra.mxu1 %vm89_vm2, %v727_v40 }
 0x110   :  { %5728 = vmatpush3.msra.mxu0 %v6474_v10  ;;  %5735 = vmatpush3.msra.mxu1 %v6479_v11 }
 0x111   :  { %5729 = vmatprep.subr.mxu0 %v6365_v0  ;;  %5736 = vmatprep.subr.mxu1 %v6365_v0 }
 0x112   :  { %5730 = vmatpush3.msra.mxu0 %v6488_v12  ;;  %5737 = vmatpush3.msra.mxu1 %v6493_v13 }
 0x113   :  { %5731 = vmatprep.mubr.msk.f32.mxu0 %vm6366_vm1, %v6365_v0  ;;  %5738 = vmatprep.mubr.msk.f32.mxu1 %vm6366_vm1, %v6365_v0  ;;  %v1049_v43 = vld [vmem:[#allocation4] sm:$0x3] }
 0x114   :  { %5732 = vmatmul.mubr.msk.f32.vlgmr.msra.gmra.mxu0 %vm89_vm2, %v1049_v43  ;;  %5739 = vmatmul.mubr.msk.f32.vlgmr.msra.gmra.mxu1 %vm89_vm2, %v1049_v43 }
 0x115   :  { %5741 = vmatprep.subr.mxu0 %v6365_v0  ;;  %5748 = vmatprep.subr.mxu1 %v6365_v0 }
 0x116   :  { %5742 = vmatpush3.msra.mxu0 %v6508_v15  ;;  %5749 = vmatpush3.msra.mxu1 %v6513_v16 }
 0x117   :  { %5743 = vmatprep.subr.mxu0 %v6365_v0  ;;  %5750 = vmatprep.subr.mxu1 %v6365_v0 }
 0x118   :  { %5744 = vmatpush3.msra.mxu0 %v6522_v17  ;;  %5745 = vmatprep.mubr.msk.f32.mxu0 %vm6366_vm1, %v6365_v0 }
 0x119   :  { %5751 = vmatpush3.msra.mxu1 %v6529_v18  ;;  %5752 = vmatprep.mubr.msk.f32.mxu1 %vm6366_vm1, %v6365_v0 }
 0x11a   :  { %5746 = vmatmul.mubr.msk.f32.vlgmr.msra.gmra.mxu0 %vm89_vm2, %v1049_v43  ;;  %5753 = vmatmul.mubr.msk.f32.vlgmr.msra.gmra.mxu1 %vm89_vm2, %v1049_v43 }
 0x11b   :  { %5755 = vmatprep.subr.mxu0 %v6365_v0  ;;  %5762 = vmatprep.subr.mxu1 %v6365_v0 }
 0x11c   :  { %5756 = vmatpush3.msra.mxu0 %v6402_v1  ;;  %5763 = vmatpush3.msra.mxu1 %v6407_v2 }
 0x11d   :  { %5757 = vmatprep.subr.mxu0 %v6365_v0  ;;  %5764 = vmatprep.subr.mxu1 %v6365_v0 }
 0x11e   :  { %5758 = vmatpush3.msra.mxu0 %v6412_v3  ;;  %5765 = vmatpush3.msra.mxu1 %v6427_v4 }
 0x11f   :  { %5759 = vmatprep.mubr.msk.f32.mxu0 %vm6366_vm1, %v6365_v0  ;;  %5766 = vmatprep.mubr.msk.f32.mxu1 %vm6366_vm1, %v6365_v0 }
 0x120   :  { %5769 = vmatprep.subr.mxu0 %v6365_v0  ;;  %5776 = vmatprep.subr.mxu1 %v6365_v0 }
 0x1c9   :  { %v803_v46 = vpop.f32.mrf.mxu0  ;;  %v874_v47 = vpop.f32.mrf.mxu1 }
 0x1ca   :  { %v807_v48 = vadd.f32 %v5288_v44, %v803_v46  ;;  %v878_v49 = vadd.f32 %v5289_v45, %v874_v47  ;;  %v728_v47 = vld [vmem:[#allocation3] sm:$0x3] }
 0x1cb   :  { %v5705_v50 = vpop.f32.mrf.mxu0  ;;  %v5712_v51 = vpop.f32.mrf.mxu1 }
 0x1cc   :  { %v5296_v52 = vmul.f32 -1.442695, %v807_v48  ;;  %v5297_v53 = vmul.f32 -1.442695, %v878_v49 }
 0x1ce   :  { %6125 = vpow2.f32 %v5296_v52 }
 0x1cf   :  { %6127 = vpow2.f32 %v5297_v53  ;;  %v945_v54 = vpop.f32.mrf.mxu0  ;;  %v1016_v55 = vpop.f32.mrf.mxu1 }
 0x1d0   :  { %v1020_v61 = vadd.f32 %v5291_v56, %v1016_v55  ;;  %v949_v25 = vadd.f32 %v5290_v19, %v945_v54  ;;  %v1050_v56 = vld [vmem:[#allocation5] sm:$0x3] }
 0x1d1   :  { %v5719_v57 = vpop.f32.mrf.mxu0  ;;  %v5726_v58 = vpop.f32.mrf.mxu1 }
 0x1d2   :  { %v5298_v24 = vmul.f32 -1.442695, %v1020_v61 }
 0x1d4   :  { %v1125_v62 = vpop.f32.mrf.mxu0  ;;  %v1196_v63 = vpop.f32.mrf.mxu1 }
 0x1d5   :  { %v1129_v7 = vadd.f32 %v5300_v59, %v1125_v62  ;;  %v1200_v14 = vadd.f32 %v5301_v60, %v1196_v63 }
 0x1d6   :  { %v5733_v20 = vpop.f32.mrf.mxu0  ;;  %v5740_v21 = vpop.f32.mrf.mxu1 }
 0x1d7   :  { %v5308_v22 = vmul.f32 -1.442695, %v1129_v7  ;;  %v5309_v23 = vmul.f32 -1.442695, %v1200_v14 }
 0x1d9   :  { %6129 = vpow2.f32 %v5308_v22  ;;  %v5312_v22 = vld [vmem:[%s7303_s0 + $0x10] sm:$0x3] }
 0x1da   :  { %6131 = vpow2.f32 %v5309_v23  ;;  %v1267_v26 = vpop.f32.mrf.mxu0  ;;  %v1338_v27 = vpop.f32.mrf.mxu1  ;;  %v5313_v23 = vld [vmem:[%s7303_s0 + $0x12] sm:$0x3] }
 0x1db   :  { %v6126_v28 = vpop.eup %6125  ;;  %6133 = vpow2.f32 %v5298_v24  ;;  %v1342_v35 = vadd.f32 %v5303_v31, %v1338_v27  ;;  %v1271_v38 = vadd.f32 %v5302_v36, %v1267_v26 }
 0x1dc   :  { %v6128_v29 = vpop.eup %6127  ;;  %v1024_v30 = vadd.f32 1.0, %v6126_v28  ;;  %v5747_v32 = vpop.f32.mrf.mxu0  ;;  %6135 = vtanh.f32 %v949_v25 }
 0x1dd   :  { %v5754_v33 = vpop.f32.mrf.mxu1  ;;  %v1030_v34 = vadd.f32 1.0, %v6128_v29  ;;  %v5310_v37 = vmul.f32 -1.442695, %v1342_v35 }
 0x1de   :  { %6137 = vrcp.f32 %v1024_v30 }
 0x1df   :  { %6139 = vrcp.f32 %v1030_v34  ;;  %v5315_v34 = vld [vmem:[%s7303_s0 + $0x16] sm:$0x3] }
 0x1e0   :  { %6141 = vpow2.f32 %v5310_v37  ;;  %v5324_v37 = vld [vmem:[%s7304_s1 + $0x28] sm:$0x3] }
 0x1e1   :  { %6143 = vtanh.f32 %v1271_v38  ;;  %v5325_v38 = vld [vmem:[%s7304_s1 + $0x2a] sm:$0x3] }
 0x1e6   :  { %v6130_v39 = vpop.eup %6129 }
 0x1e7   :  { %v6132_v40 = vpop.eup %6131  ;;  %v1346_v41 = vadd.f32 1.0, %v6130_v39 }
 0x1e8   :  { %v1352_v42 = vadd.f32 1.0, %v6132_v40  ;;  %v6134_v43 = vpop.eup %6133 }
 0x1e9   :  { %6145 = vrcp.f32 %v1346_v41  ;;  %v6136_v44 = vpop.eup %6135  ;;  %v1037_v49 = vadd.f32 1.0, %v6134_v43 }
 0x1ea   :  { %6147 = vrcp.f32 %v1352_v42 }
 0x1eb   :  { %v6138_v45 = vpop.eup %6137  ;;  %6149 = vrcp.f32 %v1037_v49 }
 0x1ec   :  { %v6140_v46 = vpop.eup %6139  ;;  %v1041_v48 = vmul.f32 %v6138_v45, %v6136_v44  ;;  %v5314_v44 = vld [vmem:[%s7303_s0 + $0x14] sm:$0x3] }
 0x1ed   :  { %v1040_v50 = vmul.f32 %v6140_v46, %v728_v47  ;;  %v6142_v52 = vpop.eup %6141 }
 0x1ee   :  { %v6144_v53 = vpop.eup %6143  ;;  %v1359_v58 = vadd.f32 1.0, %v6142_v52 }
 0x1ef   :  { %v1042_v51 = vadd.f32 %v1041_v48, %v1040_v50 }
 0x1f1   :  { %6151 = vtanh.f32 %v1042_v51  ;;  %1045 = vst.msk [vmem:[#allocation3] sm:$0x3] %vm62_vm0, %v1042_v51 }
 0x1f2   :  { %6153 = vrcp.f32 %v1359_v58 }
 0x1f6   :  { %v6146_v54 = vpop.eup %6145 }
 0x1f7   :  { %v6148_v55 = vpop.eup %6147  ;;  %v1363_v57 = vmul.f32 %v6146_v54, %v6144_v53 }
 0x1f8   :  { %v1362_v59 = vmul.f32 %v6148_v55, %v1050_v56  ;;  %v6150_v61 = vpop.eup %6149  ;;  %v5327_v56 = vld [vmem:[%s7304_s1 + $0x2e] sm:$0x3] }
 0x1fa   :  { %v1364_v60 = vadd.f32 %v1363_v57, %v1362_v59 }
 0x1fc   :  { %6155 = vtanh.f32 %v1364_v60  ;;  %1367 = vst.msk [vmem:[#allocation5] sm:$0x3] %vm62_vm0, %v1364_v60 }
 0x1fe   :  { %v6152_v62 = vpop.eup %6151 }
 0x1ff   :  { %v1044_v63 = vmul.f32 %v6152_v62, %v6150_v61  ;;  %v6154_v7 = vpop.eup %6153  ;;  %v5326_v61 = vld [vmem:[%s7304_s1 + $0x2c] sm:$0x3] }
 0x201   :  { %1046 = vst.msk [vmem:[#allocation2] sm:$0x3] %vm62_vm0, %v1044_v63  ;;  %5299 = vst.msk [vmem:[%s7305_s4 + $0x2] sm:$0x3] %vm62_vm0, %v1044_v63 }
 0x208   :  { %v1371_v14 = vld [vmem:[#allocation2] sm:$0x3] }
 0x209   :  { %v6156_v19 = vpop.eup %6155  ;;  %5760 = vmatmul.mubr.msk.f32.vlgmr.msra.gmra.mxu0 %vm89_vm2, %v1371_v14  ;;  %5767 = vmatmul.mubr.msk.f32.vlgmr.msra.gmra.mxu1 %vm89_vm2, %v1371_v14 }
 0x20a   :  { %v1366_v20 = vmul.f32 %v6156_v19, %v6154_v7  ;;  %5770 = vmatpush3.msra.mxu0 %v6442_v5  ;;  %5777 = vmatpush3.msra.mxu1 %v6447_v6 }
 0x20b   :  { %5771 = vmatprep.subr.mxu0 %v6365_v0  ;;  %5778 = vmatprep.subr.mxu1 %v6365_v0 }
 0x20c   :  { %1368 = vst.msk [vmem:[#allocation4] sm:$0x3] %vm62_vm0, %v1366_v20  ;;  %5311 = vst.msk [vmem:[%s7306_s5 + $0xc] sm:$0x3] %vm62_vm0, %v1366_v20  ;;  %5772 = vmatpush3.msra.mxu0 %v6454_v8  ;;  %5779 = vmatpush3.msra.mxu1 %v6459_v9 }
 0x20d   :  { %5773 = vmatprep.mubr.msk.f32.mxu0 %vm6366_vm1, %v6365_v0  ;;  %5780 = vmatprep.mubr.msk.f32.mxu1 %vm6366_vm1, %v6365_v0 }
 0x20e   :  { %5783 = vmatprep.subr.mxu0 %v6365_v0  ;;  %5790 = vmatprep.subr.mxu1 %v6365_v0 }
 0x20f   :  { %5774 = vmatmul.mubr.msk.f32.vlgmr.msra.gmra.mxu0 %vm89_vm2, %v1371_v14  ;;  %5781 = vmatmul.mubr.msk.f32.vlgmr.msra.gmra.mxu1 %vm89_vm2, %v1371_v14 }
 0x210   :  { %5784 = vmatpush3.msra.mxu0 %v6474_v10  ;;  %5791 = vmatpush3.msra.mxu1 %v6479_v11 }
 0x211   :  { %5785 = vmatprep.subr.mxu0 %v6365_v0  ;;  %5792 = vmatprep.subr.mxu1 %v6365_v0 }
 0x212   :  { %5786 = vmatpush3.msra.mxu0 %v6488_v12  ;;  %5793 = vmatpush3.msra.mxu1 %v6493_v13 }
 0x213   :  { %5787 = vmatprep.mubr.msk.f32.mxu0 %vm6366_vm1, %v6365_v0  ;;  %5794 = vmatprep.mubr.msk.f32.mxu1 %vm6366_vm1, %v6365_v0  ;;  %v1693_v21 = vld [vmem:[#allocation4] sm:$0x3] }
 0x214   :  { %5788 = vmatmul.mubr.msk.f32.vlgmr.msra.gmra.mxu0 %vm89_vm2, %v1693_v21  ;;  %5795 = vmatmul.mubr.msk.f32.vlgmr.msra.gmra.mxu1 %vm89_vm2, %v1693_v21 }
 0x215   :  { %5797 = vmatprep.subr.mxu0 %v6365_v0  ;;  %5804 = vmatprep.subr.mxu1 %v6365_v0 }
 0x216   :  { %5798 = vmatpush3.msra.mxu0 %v6508_v15  ;;  %5805 = vmatpush3.msra.mxu1 %v6513_v16 }
 0x217   :  { %5799 = vmatprep.subr.mxu0 %v6365_v0  ;;  %5806 = vmatprep.subr.mxu1 %v6365_v0 }
 0x218   :  { %5800 = vmatpush3.msra.mxu0 %v6522_v17  ;;  %5801 = vmatprep.mubr.msk.f32.mxu0 %vm6366_vm1, %v6365_v0 }
 0x219   :  { %5807 = vmatpush3.msra.mxu1 %v6529_v18  ;;  %5808 = vmatprep.mubr.msk.f32.mxu1 %vm6366_vm1, %v6365_v0 }
 0x21a   :  { %5802 = vmatmul.mubr.msk.f32.vlgmr.msra.gmra.mxu0 %vm89_vm2, %v1693_v21  ;;  %5809 = vmatmul.mubr.msk.f32.vlgmr.msra.gmra.mxu1 %vm89_vm2, %v1693_v21 }
 0x21b   :  { %5811 = vmatprep.subr.mxu0 %v6365_v0  ;;  %5818 = vmatprep.subr.mxu1 %v6365_v0 }
 0x21c   :  { %5812 = vmatpush3.msra.mxu0 %v6402_v1  ;;  %5819 = vmatpush3.msra.mxu1 %v6407_v2 }
 0x21d   :  { %5813 = vmatprep.subr.mxu0 %v6365_v0  ;;  %5820 = vmatprep.subr.mxu1 %v6365_v0 }
 0x21e   :  { %5814 = vmatpush3.msra.mxu0 %v6412_v3  ;;  %5821 = vmatpush3.msra.mxu1 %v6427_v4 }
 0x21f   :  { %5815 = vmatprep.mubr.msk.f32.mxu0 %vm6366_vm1, %v6365_v0  ;;  %5822 = vmatprep.mubr.msk.f32.mxu1 %vm6366_vm1, %v6365_v0 }
 0x220   :  { %5825 = vmatprep.subr.mxu0 %v6365_v0  ;;  %5832 = vmatprep.subr.mxu1 %v6365_v0 }
 0x2c9   :  { %v1447_v24 = vpop.f32.mrf.mxu0  ;;  %v1518_v25 = vpop.f32.mrf.mxu1 }
 0x2ca   :  { %v1451_v26 = vadd.f32 %v5312_v22, %v1447_v24  ;;  %v1522_v27 = vadd.f32 %v5313_v23, %v1518_v25  ;;  %v1372_v25 = vld [vmem:[#allocation3] sm:$0x3] }
 0x2cb   :  { %v5761_v28 = vpop.f32.mrf.mxu0  ;;  %v5768_v29 = vpop.f32.mrf.mxu1 }
 0x2cc   :  { %v5320_v30 = vmul.f32 -1.442695, %v1451_v26  ;;  %v5321_v31 = vmul.f32 -1.442695, %v1522_v27 }
 0x2ce   :  { %6157 = vpow2.f32 %v5320_v30 }
 0x2cf   :  { %6159 = vpow2.f32 %v5321_v31  ;;  %v1589_v32 = vpop.f32.mrf.mxu0  ;;  %v1660_v33 = vpop.f32.mrf.mxu1 }
 0x2d0   :  { %v1664_v39 = vadd.f32 %v5315_v34, %v1660_v33  ;;  %v1593_v50 = vadd.f32 %v5314_v44, %v1589_v32  ;;  %v1694_v34 = vld [vmem:[#allocation5] sm:$0x3] }
 0x2d1   :  { %v5775_v35 = vpop.f32.mrf.mxu0  ;;  %v5782_v36 = vpop.f32.mrf.mxu1 }
 0x2d2   :  { %v5322_v49 = vmul.f32 -1.442695, %v1664_v39 }
 0x2d4   :  { %v1769_v40 = vpop.f32.mrf.mxu0  ;;  %v1840_v41 = vpop.f32.mrf.mxu1 }
 0x2d5   :  { %v1773_v42 = vadd.f32 %v5324_v37, %v1769_v40  ;;  %v1844_v43 = vadd.f32 %v5325_v38, %v1840_v41 }
 0x2d6   :  { %v5789_v45 = vpop.f32.mrf.mxu0  ;;  %v5796_v46 = vpop.f32.mrf.mxu1 }
 0x2d7   :  { %v5332_v47 = vmul.f32 -1.442695, %v1773_v42  ;;  %v5333_v48 = vmul.f32 -1.442695, %v1844_v43  ;;  %v5348_v46 = vld [vmem:[%s7304_s1 + $0x20] sm:$0x3] }
 0x2d9   :  { %6161 = vpow2.f32 %v5332_v47  ;;  %v5349_v47 = vld [vmem:[%s7304_s1 + $0x22] sm:$0x3] }
 0x2da   :  { %6163 = vpow2.f32 %v5333_v48  ;;  %v1911_v51 = vpop.f32.mrf.mxu0  ;;  %v1982_v52 = vpop.f32.mrf.mxu1 }
 0x2db   :  { %v6158_v53 = vpop.eup %6157  ;;  %6165 = vpow2.f32 %v5322_v49  ;;  %v1986_v60 = vadd.f32 %v5327_v56, %v1982_v52  ;;  %v1915_v63 = vadd.f32 %v5326_v61, %v1911_v51 }
 0x2dc   :  { %v6160_v54 = vpop.eup %6159  ;;  %v1668_v55 = vadd.f32 1.0, %v6158_v53  ;;  %v5803_v57 = vpop.f32.mrf.mxu0  ;;  %6167 = vtanh.f32 %v1593_v50  ;;  %v5338_v53 = vld [vmem:[%s7303_s0 + $0x1c] sm:$0x3] }
 0x2dd   :  { %v5810_v58 = vpop.f32.mrf.mxu1  ;;  %v1674_v59 = vadd.f32 1.0, %v6160_v54  ;;  %v5334_v62 = vmul.f32 -1.442695, %v1986_v60 }
 0x2de   :  { %6169 = vrcp.f32 %v1668_v55 }
 0x2df   :  { %6171 = vrcp.f32 %v1674_v59 }
 0x2e0   :  { %6173 = vpow2.f32 %v5334_v62 }
 0x2e1   :  { %6175 = vtanh.f32 %v1915_v63 }
 0x2e6   :  { %v6162_v7 = vpop.eup %6161 }
 0x2e7   :  { %v6164_v14 = vpop.eup %6163  ;;  %v1990_v19 = vadd.f32 1.0, %v6162_v7 }
 0x2e8   :  { %v1996_v20 = vadd.f32 1.0, %v6164_v14  ;;  %v6166_v21 = vpop.eup %6165  ;;  %v5351_v14 = vld [vmem:[%s7304_s1 + $0x26] sm:$0x3] }
 0x2e9   :  { %6177 = vrcp.f32 %v1990_v19  ;;  %v6168_v22 = vpop.eup %6167  ;;  %v1681_v27 = vadd.f32 1.0, %v6166_v21 }
 0x2ea   :  { %6179 = vrcp.f32 %v1996_v20 }
 0x2eb   :  { %v6170_v23 = vpop.eup %6169  ;;  %6181 = vrcp.f32 %v1681_v27 }
 0x2ec   :  { %v6172_v24 = vpop.eup %6171  ;;  %v1685_v26 = vmul.f32 %v6170_v23, %v6168_v22  ;;  %v5350_v23 = vld [vmem:[%s7304_s1 + $0x24] sm:$0x3] }
 0x2ed   :  { %v1684_v28 = vmul.f32 %v6172_v24, %v1372_v25  ;;  %v6174_v30 = vpop.eup %6173 }
 0x2ee   :  { %v6176_v31 = vpop.eup %6175  ;;  %v2003_v36 = vadd.f32 1.0, %v6174_v30 }
 0x2ef   :  { %v1686_v29 = vadd.f32 %v1685_v26, %v1684_v28 }
 0x2f1   :  { %6183 = vtanh.f32 %v1686_v29  ;;  %1689 = vst.msk [vmem:[#allocation3] sm:$0x3] %vm62_vm0, %v1686_v29 }
 0x2f2   :  { %6185 = vrcp.f32 %v2003_v36 }
 0x2f6   :  { %v6178_v32 = vpop.eup %6177 }
 0x2f7   :  { %v6180_v33 = vpop.eup %6179  ;;  %v2007_v35 = vmul.f32 %v6178_v32, %v6176_v31 }
 0x2f8   :  { %v2006_v37 = vmul.f32 %v6180_v33, %v1694_v34  ;;  %v6182_v39 = vpop.eup %6181  ;;  %v2016_v34 = vld [vmem:[#allocation3] sm:$0x3] }
 0x2fa   :  { %v2008_v38 = vadd.f32 %v2007_v35, %v2006_v37 }
 0x2fc   :  { %6187 = vtanh.f32 %v2008_v38  ;;  %2011 = vst.msk [vmem:[#allocation5] sm:$0x3] %vm62_vm0, %v2008_v38 }
 0x2fe   :  { %v6184_v40 = vpop.eup %6183 }
 0x2ff   :  { %v1688_v41 = vmul.f32 %v6184_v40, %v6182_v39  ;;  %v6186_v42 = vpop.eup %6185 }
 0x301   :  { %1690 = vst.msk [vmem:[#allocation2] sm:$0x3] %vm62_vm0, %v1688_v41  ;;  %5323 = vst.msk [vmem:[%s7305_s4 + $0x4] sm:$0x3] %vm62_vm0, %v1688_v41 }
 0x308   :  { %v2015_v43 = vld [vmem:[#allocation2] sm:$0x3] }
 0x309   :  { %v6188_v44 = vpop.eup %6187  ;;  %5816 = vmatmul.mubr.msk.f32.vlgmr.msra.gmra.mxu0 %vm89_vm2, %v2015_v43  ;;  %5823 = vmatmul.mubr.msk.f32.vlgmr.msra.gmra.mxu1 %vm89_vm2, %v2015_v43 }
 0x30a   :  { %v2010_v45 = vmul.f32 %v6188_v44, %v6186_v42  ;;  %5826 = vmatpush3.msra.mxu0 %v6442_v5  ;;  %5833 = vmatpush3.msra.mxu1 %v6447_v6 }
 0x30b   :  { %5827 = vmatprep.subr.mxu0 %v6365_v0  ;;  %5834 = vmatprep.subr.mxu1 %v6365_v0 }
 0x30c   :  { %2012 = vst.msk [vmem:[#allocation4] sm:$0x3] %vm62_vm0, %v2010_v45  ;;  %5335 = vst.msk [vmem:[%s7306_s5 + $0xa] sm:$0x3] %vm62_vm0, %v2010_v45  ;;  %5828 = vmatpush3.msra.mxu0 %v6454_v8  ;;  %5835 = vmatpush3.msra.mxu1 %v6459_v9 }
 0x30d   :  { %5829 = vmatprep.mubr.msk.f32.mxu0 %vm6366_vm1, %v6365_v0  ;;  %5836 = vmatprep.mubr.msk.f32.mxu1 %vm6366_vm1, %v6365_v0 }
 0x30e   :  { %5839 = vmatprep.subr.mxu0 %v6365_v0  ;;  %5846 = vmatprep.subr.mxu1 %v6365_v0 }
 0x30f   :  { %5830 = vmatmul.mubr.msk.f32.vlgmr.msra.gmra.mxu0 %vm89_vm2, %v2015_v43  ;;  %5837 = vmatmul.mubr.msk.f32.vlgmr.msra.gmra.mxu1 %vm89_vm2, %v2015_v43  ;;  %v2338_v43 = vld [vmem:[#allocation5] sm:$0x3] }
 0x310   :  { %5840 = vmatpush3.msra.mxu0 %v6474_v10  ;;  %5847 = vmatpush3.msra.mxu1 %v6479_v11 }
 0x311   :  { %5841 = vmatprep.subr.mxu0 %v6365_v0  ;;  %5848 = vmatprep.subr.mxu1 %v6365_v0 }
 0x312   :  { %5842 = vmatpush3.msra.mxu0 %v6488_v12  ;;  %5849 = vmatpush3.msra.mxu1 %v6493_v13 }
 0x313   :  { %5843 = vmatprep.mubr.msk.f32.mxu0 %vm6366_vm1, %v6365_v0  ;;  %5850 = vmatprep.mubr.msk.f32.mxu1 %vm6366_vm1, %v6365_v0  ;;  %v2337_v5 = vld [vmem:[#allocation4] sm:$0x3] }
 0x314   :  { %5844 = vmatmul.mubr.msk.f32.vlgmr.msra.gmra.mxu0 %vm89_vm2, %v2337_v5  ;;  %5851 = vmatmul.mubr.msk.f32.vlgmr.msra.gmra.mxu1 %vm89_vm2, %v2337_v5 }
 0x315   :  { %5853 = vmatprep.subr.mxu0 %v6365_v0  ;;  %5860 = vmatprep.subr.mxu1 %v6365_v0 }
 0x316   :  { %5854 = vmatpush3.msra.mxu0 %v6508_v15  ;;  %5861 = vmatpush3.msra.mxu1 %v6513_v16  ;;  %v5339_v16 = vld [vmem:[%s7303_s0 + $0x1e] sm:$0x3] }
 0x317   :  { %5855 = vmatprep.subr.mxu0 %v6365_v0  ;;  %5862 = vmatprep.subr.mxu1 %v6365_v0 }
 0x318   :  { %5856 = vmatpush3.msra.mxu0 %v6522_v17  ;;  %5857 = vmatprep.mubr.msk.f32.mxu0 %vm6366_vm1, %v6365_v0 }
 0x319   :  { %5863 = vmatpush3.msra.mxu1 %v6529_v18  ;;  %5864 = vmatprep.mubr.msk.f32.mxu1 %vm6366_vm1, %v6365_v0 }
 0x31a   :  { %5858 = vmatmul.mubr.msk.f32.vlgmr.msra.gmra.mxu0 %vm89_vm2, %v2337_v5  ;;  %5865 = vmatmul.mubr.msk.f32.vlgmr.msra.gmra.mxu1 %vm89_vm2, %v2337_v5 }
 0x31b   :  { %5867 = vmatprep.subr.mxu0 %v6365_v0  ;;  %5874 = vmatprep.subr.mxu1 %v6365_v0 }
 0x31c   :  { %5868 = vmatpush3.msra.mxu0 %v6402_v1  ;;  %5875 = vmatpush3.msra.mxu1 %v6407_v2  ;;  %v5336_v1 = vld [vmem:[%s7303_s0 + $0x18] sm:$0x3]  ;;  %v5337_v2 = vld [vmem:[%s7303_s0 + $0x1a] sm:$0x3] }
 0x31d   :  { %5869 = vmatprep.subr.mxu0 %v6365_v0  ;;  %5876 = vmatprep.subr.mxu1 %v6365_v0 }
 0x31e   :  { %5870 = vmatpush3.msra.mxu0 %v6412_v3  ;;  %5877 = vmatpush3.msra.mxu1 %v6427_v4 }
 0x31f   :  { %5871 = vmatprep.mubr.msk.f32.mxu0 %vm6366_vm1, %v6365_v0  ;;  %5878 = vmatprep.mubr.msk.f32.mxu1 %vm6366_vm1, %v6365_v0 }
 0x320   :  { %5881 = vmatprep.subr.mxu0 %v6365_v0  ;;  %5888 = vmatprep.subr.mxu1 %v6365_v0 }
 0x3c9   :  { %v2091_v3 = vpop.f32.mrf.mxu0  ;;  %v2162_v4 = vpop.f32.mrf.mxu1 }
 0x3ca   :  { %v2095_v6 = vadd.f32 %v5336_v1, %v2091_v3  ;;  %v2166_v8 = vadd.f32 %v5337_v2, %v2162_v4 }
 0x3cb   :  { %v5817_v9 = vpop.f32.mrf.mxu0  ;;  %v5824_v10 = vpop.f32.mrf.mxu1 }
 0x3cc   :  { %v5344_v11 = vmul.f32 -1.442695, %v2095_v6  ;;  %v5345_v12 = vmul.f32 -1.442695, %v2166_v8 }
 0x3ce   :  { %6189 = vpow2.f32 %v5344_v11  ;;  %v6867_v11 = vld [vmem:[%s7301_s2 + $0x28] sm:$0xff] }
 0x3cf   :  { %6191 = vpow2.f32 %v5345_v12  ;;  %v2233_v13 = vpop.f32.mrf.mxu0  ;;  %v2304_v15 = vpop.f32.mrf.mxu1  ;;  %v6873_v12 = vld [vmem:[%s7301_s2 + $0x38] sm:$0xff] }
 0x3d0   :  { %v2308_v48 = vadd.f32 %v5339_v16, %v2304_v15  ;;  %v2237_v59 = vadd.f32 %v5338_v53, %v2233_v13  ;;  %v6886_v13 = vld [vmem:[%s7301_s2 + $0x20] sm:$0xff]  ;;  %v6892_v15 = vld [vmem:[%s7301_s2 + $0x30] sm:$0xff]  ;;  %v6906_v16 = vld [vmem:[%s7302_s3 + $0x8] sm:$0xff] }
 0x3d1   :  { %v5831_v17 = vpop.f32.mrf.mxu0  ;;  %v5838_v18 = vpop.f32.mrf.mxu1  ;;  %v6980_v53 = vld [vmem:[%s7301_s2 + $0x18] sm:$0xff] }
 0x3d2   :  { %v5346_v58 = vmul.f32 -1.442695, %v2308_v48  ;;  %v6912_v17 = vld [vmem:[%s7302_s3 + $0x18] sm:$0xff]  ;;  %v6920_v18 = vld [vmem:[%s7302_s3] sm:$0xff]  ;;  %v6940_v48 = vld [vmem:[%s7302_s3 + $0x28] sm:$0xff] }
 0x3d4   :  { %v2413_v49 = vpop.f32.mrf.mxu0  ;;  %v2484_v50 = vpop.f32.mrf.mxu1 }
 0x3d5   :  { %v2417_v51 = vadd.f32 %v5348_v46, %v2413_v49  ;;  %v2488_v52 = vadd.f32 %v5349_v47, %v2484_v50  ;;  %v6926_v46 = vld [vmem:[%s7302_s3 + $0x10] sm:$0xff]  ;;  %v6946_v49 = vld [vmem:[%s7302_s3 + $0x38] sm:$0xff]  ;;  %v6954_v50 = vld [vmem:[%s7302_s3 + $0x20] sm:$0xff] }
 0x3d6   :  { %v5845_v54 = vpop.f32.mrf.mxu0  ;;  %v5852_v55 = vpop.f32.mrf.mxu1 }
 0x3d7   :  { %v5356_v56 = vmul.f32 -1.442695, %v2417_v51  ;;  %v5357_v57 = vmul.f32 -1.442695, %v2488_v52  ;;  %v6962_v51 = vld [vmem:[%s7302_s3 + $0x30] sm:$0xff]  ;;  %v6974_v52 = vld [vmem:[%s7301_s2 + $0x8] sm:$0xff] }
 0x3d8   :  { %v6988_v54 = vld [vmem:[%s7301_s2] sm:$0xff]  ;;  %v6994_v55 = vld [vmem:[%s7301_s2 + $0x10] sm:$0xff] }
 0x3d9   :  { %6193 = vpow2.f32 %v5356_v56  ;;  %v5360_v56 = vld [vmem:[%s7303_s0 + $0x20] sm:$0x3] }
 0x3da   :  { %6195 = vpow2.f32 %v5357_v57  ;;  %v2555_v60 = vpop.f32.mrf.mxu0  ;;  %v2626_v61 = vpop.f32.mrf.mxu1  ;;  %v5361_v57 = vld [vmem:[%s7303_s0 + $0x22] sm:$0x3] }
 0x3db   :  { %v6190_v62 = vpop.eup %6189  ;;  %6197 = vpow2.f32 %v5346_v58  ;;  %v2630_v22 = vadd.f32 %v5351_v14, %v2626_v61  ;;  %v2559_v25 = vadd.f32 %v5350_v23, %v2555_v60 }
 0x3dc   :  { %v6192_v63 = vpop.eup %6191  ;;  %v2312_v7 = vadd.f32 1.0, %v6190_v62  ;;  %v5859_v19 = vpop.f32.mrf.mxu0  ;;  %6199 = vtanh.f32 %v2237_v59 }
 0x3dd   :  { %v5866_v20 = vpop.f32.mrf.mxu1  ;;  %v2318_v21 = vadd.f32 1.0, %v6192_v63  ;;  %v5358_v24 = vmul.f32 -1.442695, %v2630_v22 }
 0x3de   :  { %6201 = vrcp.f32 %v2312_v7 }
 0x3df   :  { %6203 = vrcp.f32 %v2318_v21  ;;  %v5363_v21 = vld [vmem:[%s7303_s0 + $0x26] sm:$0x3] }
 0x3e0   :  { %6205 = vpow2.f32 %v5358_v24  ;;  %v5372_v24 = vld [vmem:[%s7304_s1 + $0x18] sm:$0x3] }
 0x3e1   :  { %6207 = vtanh.f32 %v2559_v25  ;;  %v5373_v25 = vld [vmem:[%s7304_s1 + $0x1a] sm:$0x3] }
 0x3e6   :  { %v6194_v26 = vpop.eup %6193 }
 0x3e7   :  { %v6196_v27 = vpop.eup %6195  ;;  %v2634_v28 = vadd.f32 1.0, %v6194_v26 }
 0x3e8   :  { %v2640_v29 = vadd.f32 1.0, %v6196_v27  ;;  %v6198_v30 = vpop.eup %6197 }
 0x3e9   :  { %6209 = vrcp.f32 %v2634_v28  ;;  %v6200_v31 = vpop.eup %6199  ;;  %v2325_v36 = vadd.f32 1.0, %v6198_v30 }
 0x3ea   :  { %6211 = vrcp.f32 %v2640_v29 }
 0x3eb   :  { %v6202_v32 = vpop.eup %6201  ;;  %6213 = vrcp.f32 %v2325_v36 }
 0x3ec   :  { %v6204_v33 = vpop.eup %6203  ;;  %v2329_v35 = vmul.f32 %v6202_v32, %v6200_v31  ;;  %v5362_v31 = vld [vmem:[%s7303_s0 + $0x24] sm:$0x3] }
 0x3ed   :  { %v2328_v37 = vmul.f32 %v6204_v33, %v2016_v34  ;;  %v6206_v39 = vpop.eup %6205 }
 0x3ee   :  { %v6208_v40 = vpop.eup %6207  ;;  %v2647_v45 = vadd.f32 1.0, %v6206_v39 }
 0x3ef   :  { %v2330_v38 = vadd.f32 %v2329_v35, %v2328_v37 }
 0x3f1   :  { %6215 = vtanh.f32 %v2330_v38  ;;  %2333 = vst.msk [vmem:[#allocation3] sm:$0x3] %vm62_vm0, %v2330_v38 }
 0x3f2   :  { %6217 = vrcp.f32 %v2647_v45 }
 0x3f6   :  { %v6210_v41 = vpop.eup %6209 }
 0x3f7   :  { %v6212_v42 = vpop.eup %6211  ;;  %v2651_v44 = vmul.f32 %v6210_v41, %v6208_v40 }
 0x3f8   :  { %v2650_v5 = vmul.f32 %v6212_v42, %v2338_v43  ;;  %v6214_v2 = vpop.eup %6213  ;;  %v5375_v43 = vld [vmem:[%s7304_s1 + $0x1e] sm:$0x3] }
 0x3fa   :  { %v2652_v1 = vadd.f32 %v2651_v44, %v2650_v5 }
 0x3fc   :  { %6219 = vtanh.f32 %v2652_v1  ;;  %2655 = vst.msk [vmem:[#allocation5] sm:$0x3] %vm62_vm0, %v2652_v1 }
 0x3fe   :  { %v6216_v3 = vpop.eup %6215 }
 0x3ff   :  { %v2332_v4 = vmul.f32 %v6216_v3, %v6214_v2  ;;  %v6218_v6 = vpop.eup %6217  ;;  %v5374_v2 = vld [vmem:[%s7304_s1 + $0x1c] sm:$0x3] }
 0x401   :  { %2334 = vst.msk [vmem:[#allocation2] sm:$0x3] %vm62_vm0, %v2332_v4  ;;  %5347 = vst.msk [vmem:[%s7305_s4 + $0x6] sm:$0x3] %vm62_vm0, %v2332_v4 }
 0x408   :  { %v2659_v8 = vld [vmem:[#allocation2] sm:$0x3] }
 0x409   :  { %v6220_v9 = vpop.eup %6219  ;;  %5872 = vmatmul.mubr.msk.f32.vlgmr.msra.gmra.mxu0 %vm89_vm2, %v2659_v8  ;;  %5879 = vmatmul.mubr.msk.f32.vlgmr.msra.gmra.mxu1 %vm89_vm2, %v2659_v8 }
 0x40a   :  { %v2654_v10 = vmul.f32 %v6220_v9, %v6218_v6  ;;  %5882 = vmatpush3.msra.mxu0 %v6867_v11  ;;  %5889 = vmatpush3.msra.mxu1 %v6873_v12 }
 0x40b   :  { %5883 = vmatprep.subr.mxu0 %v6365_v0  ;;  %5890 = vmatprep.subr.mxu1 %v6365_v0 }
 0x40c   :  { %2656 = vst.msk [vmem:[#allocation4] sm:$0x3] %vm62_vm0, %v2654_v10  ;;  %5359 = vst.msk [vmem:[%s7306_s5 + $0x8] sm:$0x3] %vm62_vm0, %v2654_v10  ;;  %5884 = vmatpush3.msra.mxu0 %v6886_v13  ;;  %5891 = vmatpush3.msra.mxu1 %v6892_v15 }
 0x40d   :  { %5885 = vmatprep.mubr.msk.f32.mxu0 %vm6366_vm1, %v6365_v0  ;;  %5892 = vmatprep.mubr.msk.f32.mxu1 %vm6366_vm1, %v6365_v0 }
 0x40e   :  { %5895 = vmatprep.subr.mxu0 %v6365_v0  ;;  %5902 = vmatprep.subr.mxu1 %v6365_v0 }
 0x40f   :  { %5886 = vmatmul.mubr.msk.f32.vlgmr.msra.gmra.mxu0 %vm89_vm2, %v2659_v8  ;;  %5893 = vmatmul.mubr.msk.f32.vlgmr.msra.gmra.mxu1 %vm89_vm2, %v2659_v8 }
 0x410   :  { %5896 = vmatpush3.msra.mxu0 %v6906_v16  ;;  %5903 = vmatpush3.msra.mxu1 %v6912_v17 }
 0x411   :  { %5897 = vmatprep.subr.mxu0 %v6365_v0  ;;  %5904 = vmatprep.subr.mxu1 %v6365_v0 }
 0x412   :  { %5898 = vmatpush3.msra.mxu0 %v6920_v18  ;;  %5905 = vmatpush3.msra.mxu1 %v6926_v46 }
 0x413   :  { %5899 = vmatprep.mubr.msk.f32.mxu0 %vm6366_vm1, %v6365_v0  ;;  %5906 = vmatprep.mubr.msk.f32.mxu1 %vm6366_vm1, %v6365_v0  ;;  %v2981_v47 = vld [vmem:[#allocation4] sm:$0x3] }
 0x414   :  { %5900 = vmatmul.mubr.msk.f32.vlgmr.msra.gmra.mxu0 %vm89_vm2, %v2981_v47  ;;  %5907 = vmatmul.mubr.msk.f32.vlgmr.msra.gmra.mxu1 %vm89_vm2, %v2981_v47 }
 0x415   :  { %5909 = vmatprep.subr.mxu0 %v6365_v0  ;;  %5916 = vmatprep.subr.mxu1 %v6365_v0 }
 0x416   :  { %5910 = vmatpush3.msra.mxu0 %v6940_v48  ;;  %5917 = vmatpush3.msra.mxu1 %v6946_v49 }
 0x417   :  { %5911 = vmatprep.subr.mxu0 %v6365_v0  ;;  %5918 = vmatprep.subr.mxu1 %v6365_v0 }
 0x418   :  { %5912 = vmatpush3.msra.mxu0 %v6954_v50  ;;  %5913 = vmatprep.mubr.msk.f32.mxu0 %vm6366_vm1, %v6365_v0 }
 0x419   :  { %5919 = vmatpush3.msra.mxu1 %v6962_v51  ;;  %5920 = vmatprep.mubr.msk.f32.mxu1 %vm6366_vm1, %v6365_v0 }
 0x41a   :  { %5914 = vmatmul.mubr.msk.f32.vlgmr.msra.gmra.mxu0 %vm89_vm2, %v2981_v47  ;;  %5921 = vmatmul.mubr.msk.f32.vlgmr.msra.gmra.mxu1 %vm89_vm2, %v2981_v47 }
 0x41b   :  { %5923 = vmatprep.subr.mxu0 %v6365_v0  ;;  %5930 = vmatprep.subr.mxu1 %v6365_v0 }
 0x41c   :  { %5924 = vmatpush3.msra.mxu0 %v6974_v52  ;;  %5931 = vmatpush3.msra.mxu1 %v6980_v53 }
 0x41d   :  { %5925 = vmatprep.subr.mxu0 %v6365_v0  ;;  %5932 = vmatprep.subr.mxu1 %v6365_v0 }
 0x41e   :  { %5926 = vmatpush3.msra.mxu0 %v6988_v54  ;;  %5933 = vmatpush3.msra.mxu1 %v6994_v55 }
 0x41f   :  { %5927 = vmatprep.mubr.msk.f32.mxu0 %vm6366_vm1, %v6365_v0  ;;  %5934 = vmatprep.mubr.msk.f32.mxu1 %vm6366_vm1, %v6365_v0 }
 0x420   :  { %5937 = vmatprep.subr.mxu0 %v6365_v0  ;;  %5944 = vmatprep.subr.mxu1 %v6365_v0 }
 0x4c9   :  { %v2735_v58 = vpop.f32.mrf.mxu0  ;;  %v2806_v59 = vpop.f32.mrf.mxu1 }
 0x4ca   :  { %v2739_v60 = vadd.f32 %v5360_v56, %v2735_v58  ;;  %v2810_v61 = vadd.f32 %v5361_v57, %v2806_v59  ;;  %v2660_v59 = vld [vmem:[#allocation3] sm:$0x3] }
 0x4cb   :  { %v5873_v62 = vpop.f32.mrf.mxu0  ;;  %v5880_v63 = vpop.f32.mrf.mxu1 }
 0x4cc   :  { %v5368_v7 = vmul.f32 -1.442695, %v2739_v60  ;;  %v5369_v14 = vmul.f32 -1.442695, %v2810_v61 }
 0x4ce   :  { %6221 = vpow2.f32 %v5368_v7 }
 0x4cf   :  { %6223 = vpow2.f32 %v5369_v14  ;;  %v2877_v19 = vpop.f32.mrf.mxu0  ;;  %v2948_v20 = vpop.f32.mrf.mxu1 }
 0x4d0   :  { %v2952_v26 = vadd.f32 %v5363_v21, %v2948_v20  ;;  %v2881_v37 = vadd.f32 %v5362_v31, %v2877_v19  ;;  %v2982_v21 = vld [vmem:[#allocation5] sm:$0x3] }
 0x4d1   :  { %v5887_v22 = vpop.f32.mrf.mxu0  ;;  %v5894_v23 = vpop.f32.mrf.mxu1 }
 0x4d2   :  { %v5370_v36 = vmul.f32 -1.442695, %v2952_v26 }
 0x4d4   :  { %v3057_v27 = vpop.f32.mrf.mxu0  ;;  %v3128_v28 = vpop.f32.mrf.mxu1 }
 0x4d5   :  { %v3061_v29 = vadd.f32 %v5372_v24, %v3057_v27  ;;  %v3132_v30 = vadd.f32 %v5373_v25, %v3128_v28 }
 0x4d6   :  { %v5901_v32 = vpop.f32.mrf.mxu0  ;;  %v5908_v33 = vpop.f32.mrf.mxu1 }
 0x4d7   :  { %v5380_v34 = vmul.f32 -1.442695, %v3061_v29  ;;  %v5381_v35 = vmul.f32 -1.442695, %v3132_v30 }
 0x4d9   :  { %6225 = vpow2.f32 %v5380_v34  ;;  %v5384_v34 = vld [vmem:[%s7303_s0 + $0x28] sm:$0x3] }
 0x4da   :  { %6227 = vpow2.f32 %v5381_v35  ;;  %v3199_v38 = vpop.f32.mrf.mxu0  ;;  %v3270_v39 = vpop.f32.mrf.mxu1  ;;  %v5385_v35 = vld [vmem:[%s7303_s0 + $0x2a] sm:$0x3] }
 0x4db   :  { %v6222_v40 = vpop.eup %6221  ;;  %6229 = vpow2.f32 %v5370_v36  ;;  %v3274_v1 = vadd.f32 %v5375_v43, %v3270_v39  ;;  %v3203_v4 = vadd.f32 %v5374_v2, %v3199_v38 }
 0x4dc   :  { %v6224_v41 = vpop.eup %6223  ;;  %v2956_v42 = vadd.f32 1.0, %v6222_v40  ;;  %v5915_v44 = vpop.f32.mrf.mxu0  ;;  %6231 = vtanh.f32 %v2881_v37 }
 0x4dd   :  { %v5922_v45 = vpop.f32.mrf.mxu1  ;;  %v2962_v5 = vadd.f32 1.0, %v6224_v41  ;;  %v5382_v3 = vmul.f32 -1.442695, %v3274_v1 }
 0x4de   :  { %6233 = vrcp.f32 %v2956_v42 }
 0x4df   :  { %6235 = vrcp.f32 %v2962_v5  ;;  %v5387_v5 = vld [vmem:[%s7303_s0 + $0x2e] sm:$0x3] }
 0x4e0   :  { %6237 = vpow2.f32 %v5382_v3  ;;  %v5396_v3 = vld [vmem:[%s7304_s1 + $0x10] sm:$0x3] }
 0x4e1   :  { %6239 = vtanh.f32 %v3203_v4  ;;  %v5397_v4 = vld [vmem:[%s7304_s1 + $0x12] sm:$0x3] }
 0x4e6   :  { %v6226_v6 = vpop.eup %6225 }
 0x4e7   :  { %v6228_v8 = vpop.eup %6227  ;;  %v3278_v9 = vadd.f32 1.0, %v6226_v6 }
 0x4e8   :  { %v3284_v10 = vadd.f32 1.0, %v6228_v8  ;;  %v6230_v47 = vpop.eup %6229 }
 0x4e9   :  { %6241 = vrcp.f32 %v3278_v9  ;;  %v6232_v56 = vpop.eup %6231  ;;  %v2969_v61 = vadd.f32 1.0, %v6230_v47 }
 0x4ea   :  { %6243 = vrcp.f32 %v3284_v10 }
 0x4eb   :  { %v6234_v57 = vpop.eup %6233  ;;  %6245 = vrcp.f32 %v2969_v61 }
 0x4ec   :  { %v6236_v58 = vpop.eup %6235  ;;  %v2973_v60 = vmul.f32 %v6234_v57, %v6232_v56  ;;  %v5386_v56 = vld [vmem:[%s7303_s0 + $0x2c] sm:$0x3] }
 0x4ed   :  { %v2972_v62 = vmul.f32 %v6236_v58, %v2660_v59  ;;  %v6238_v7 = vpop.eup %6237 }
 0x4ee   :  { %v6240_v14 = vpop.eup %6239  ;;  %v3291_v23 = vadd.f32 1.0, %v6238_v7 }
 0x4ef   :  { %v2974_v63 = vadd.f32 %v2973_v60, %v2972_v62 }
 0x4f1   :  { %6247 = vtanh.f32 %v2974_v63  ;;  %2977 = vst.msk [vmem:[#allocation3] sm:$0x3] %vm62_vm0, %v2974_v63 }
 0x4f2   :  { %6249 = vrcp.f32 %v3291_v23 }
 0x4f6   :  { %v6242_v19 = vpop.eup %6241 }
 0x4f7   :  { %v6244_v20 = vpop.eup %6243  ;;  %v3295_v22 = vmul.f32 %v6242_v19, %v6240_v14 }
 0x4f8   :  { %v3294_v24 = vmul.f32 %v6244_v20, %v2982_v21  ;;  %v6246_v26 = vpop.eup %6245  ;;  %v5399_v21 = vld [vmem:[%s7304_s1 + $0x16] sm:$0x3] }
 0x4fa   :  { %v3296_v25 = vadd.f32 %v3295_v22, %v3294_v24 }
 0x4fc   :  { %6251 = vtanh.f32 %v3296_v25  ;;  %3299 = vst.msk [vmem:[#allocation5] sm:$0x3] %vm62_vm0, %v3296_v25 }
 0x4fe   :  { %v6248_v27 = vpop.eup %6247 }
 0x4ff   :  { %v2976_v28 = vmul.f32 %v6248_v27, %v6246_v26  ;;  %v6250_v29 = vpop.eup %6249  ;;  %v5398_v26 = vld [vmem:[%s7304_s1 + $0x14] sm:$0x3] }
 0x501   :  { %5371 = vst.msk [vmem:[%s7305_s4 + $0x8] sm:$0x3] %vm62_vm0, %v2976_v28  ;;  %2978 = vst.msk [vmem:[#allocation2] sm:$0x3] %vm62_vm0, %v2976_v28 }
 0x508   :  { %v3303_v30 = vld [vmem:[#allocation2] sm:$0x3] }
 0x509   :  { %v6252_v31 = vpop.eup %6251  ;;  %5928 = vmatmul.mubr.msk.f32.vlgmr.msra.gmra.mxu0 %vm89_vm2, %v3303_v30  ;;  %5935 = vmatmul.mubr.msk.f32.vlgmr.msra.gmra.mxu1 %vm89_vm2, %v3303_v30 }
 0x50a   :  { %v3298_v32 = vmul.f32 %v6252_v31, %v6250_v29  ;;  %5938 = vmatpush3.msra.mxu0 %v6867_v11  ;;  %5945 = vmatpush3.msra.mxu1 %v6873_v12 }
 0x50b   :  { %5939 = vmatprep.subr.mxu0 %v6365_v0  ;;  %5946 = vmatprep.subr.mxu1 %v6365_v0 }
 0x50c   :  { %5383 = vst.msk [vmem:[%s7306_s5 + $0x6] sm:$0x3] %vm62_vm0, %v3298_v32  ;;  %3300 = vst.msk [vmem:[#allocation4] sm:$0x3] %vm62_vm0, %v3298_v32  ;;  %5940 = vmatpush3.msra.mxu0 %v6886_v13  ;;  %5947 = vmatpush3.msra.mxu1 %v6892_v15 }
 0x50d   :  { %5941 = vmatprep.mubr.msk.f32.mxu0 %vm6366_vm1, %v6365_v0  ;;  %5948 = vmatprep.mubr.msk.f32.mxu1 %vm6366_vm1, %v6365_v0 }
 0x50e   :  { %5951 = vmatprep.subr.mxu0 %v6365_v0  ;;  %5958 = vmatprep.subr.mxu1 %v6365_v0 }
 0x50f   :  { %5942 = vmatmul.mubr.msk.f32.vlgmr.msra.gmra.mxu0 %vm89_vm2, %v3303_v30  ;;  %5949 = vmatmul.mubr.msk.f32.vlgmr.msra.gmra.mxu1 %vm89_vm2, %v3303_v30 }
 0x510   :  { %5952 = vmatpush3.msra.mxu0 %v6906_v16  ;;  %5959 = vmatpush3.msra.mxu1 %v6912_v17 }
 0x511   :  { %5953 = vmatprep.subr.mxu0 %v6365_v0  ;;  %5960 = vmatprep.subr.mxu1 %v6365_v0 }
 0x512   :  { %5954 = vmatpush3.msra.mxu0 %v6920_v18  ;;  %5961 = vmatpush3.msra.mxu1 %v6926_v46 }
 0x513   :  { %5955 = vmatprep.mubr.msk.f32.mxu0 %vm6366_vm1, %v6365_v0  ;;  %5962 = vmatprep.mubr.msk.f32.mxu1 %vm6366_vm1, %v6365_v0  ;;  %v3625_v33 = vld [vmem:[#allocation4] sm:$0x3] }
 0x514   :  { %5956 = vmatmul.mubr.msk.f32.vlgmr.msra.gmra.mxu0 %vm89_vm2, %v3625_v33  ;;  %5963 = vmatmul.mubr.msk.f32.vlgmr.msra.gmra.mxu1 %vm89_vm2, %v3625_v33 }
 0x515   :  { %5965 = vmatprep.subr.mxu0 %v6365_v0  ;;  %5972 = vmatprep.subr.mxu1 %v6365_v0 }
 0x516   :  { %5966 = vmatpush3.msra.mxu0 %v6940_v48  ;;  %5973 = vmatpush3.msra.mxu1 %v6946_v49 }
 0x517   :  { %5967 = vmatprep.subr.mxu0 %v6365_v0  ;;  %5974 = vmatprep.subr.mxu1 %v6365_v0 }
 0x518   :  { %5968 = vmatpush3.msra.mxu0 %v6954_v50  ;;  %5969 = vmatprep.mubr.msk.f32.mxu0 %vm6366_vm1, %v6365_v0 }
 0x519   :  { %5975 = vmatpush3.msra.mxu1 %v6962_v51  ;;  %5976 = vmatprep.mubr.msk.f32.mxu1 %vm6366_vm1, %v6365_v0 }
 0x51a   :  { %5970 = vmatmul.mubr.msk.f32.vlgmr.msra.gmra.mxu0 %vm89_vm2, %v3625_v33  ;;  %5977 = vmatmul.mubr.msk.f32.vlgmr.msra.gmra.mxu1 %vm89_vm2, %v3625_v33 }
 0x51b   :  { %5979 = vmatprep.subr.mxu0 %v6365_v0  ;;  %5986 = vmatprep.subr.mxu1 %v6365_v0 }
 0x51c   :  { %5980 = vmatpush3.msra.mxu0 %v6974_v52  ;;  %5987 = vmatpush3.msra.mxu1 %v6980_v53 }
 0x51d   :  { %5981 = vmatprep.subr.mxu0 %v6365_v0  ;;  %5988 = vmatprep.subr.mxu1 %v6365_v0 }
 0x51e   :  { %5982 = vmatpush3.msra.mxu0 %v6988_v54  ;;  %5989 = vmatpush3.msra.mxu1 %v6994_v55 }
 0x51f   :  { %5983 = vmatprep.mubr.msk.f32.mxu0 %vm6366_vm1, %v6365_v0  ;;  %5990 = vmatprep.mubr.msk.f32.mxu1 %vm6366_vm1, %v6365_v0 }
 0x520   :  { %5993 = vmatprep.subr.mxu0 %v6365_v0  ;;  %6000 = vmatprep.subr.mxu1 %v6365_v0 }
 0x5c9   :  { %v3379_v36 = vpop.f32.mrf.mxu0  ;;  %v3450_v37 = vpop.f32.mrf.mxu1 }
 0x5ca   :  { %v3383_v38 = vadd.f32 %v5384_v34, %v3379_v36  ;;  %v3454_v39 = vadd.f32 %v5385_v35, %v3450_v37  ;;  %v3304_v37 = vld [vmem:[#allocation3] sm:$0x3] }
 0x5cb   :  { %v5929_v40 = vpop.f32.mrf.mxu0  ;;  %v5936_v41 = vpop.f32.mrf.mxu1 }
 0x5cc   :  { %v5392_v42 = vmul.f32 -1.442695, %v3383_v38  ;;  %v5393_v43 = vmul.f32 -1.442695, %v3454_v39 }
 0x5ce   :  { %6253 = vpow2.f32 %v5392_v42 }
 0x5cf   :  { %6255 = vpow2.f32 %v5393_v43  ;;  %v3521_v44 = vpop.f32.mrf.mxu0  ;;  %v3592_v45 = vpop.f32.mrf.mxu1 }
 0x5d0   :  { %v3596_v6 = vadd.f32 %v5387_v5, %v3592_v45  ;;  %v3525_v62 = vadd.f32 %v5386_v56, %v3521_v44  ;;  %v3626_v5 = vld [vmem:[#allocation5] sm:$0x3] }
 0x5d1   :  { %v5943_v1 = vpop.f32.mrf.mxu0  ;;  %v5950_v2 = vpop.f32.mrf.mxu1 }
 0x5d2   :  { %v5394_v61 = vmul.f32 -1.442695, %v3596_v6 }
 0x5d4   :  { %v3701_v8 = vpop.f32.mrf.mxu0  ;;  %v3772_v9 = vpop.f32.mrf.mxu1 }
 0x5d5   :  { %v3705_v10 = vadd.f32 %v5396_v3, %v3701_v8  ;;  %v3776_v47 = vadd.f32 %v5397_v4, %v3772_v9 }
 0x5d6   :  { %v5957_v57 = vpop.f32.mrf.mxu0  ;;  %v5964_v58 = vpop.f32.mrf.mxu1 }
 0x5d7   :  { %v5404_v59 = vmul.f32 -1.442695, %v3705_v10  ;;  %v5405_v60 = vmul.f32 -1.442695, %v3776_v47 }
 0x5d9   :  { %6257 = vpow2.f32 %v5404_v59 }
 0x5da   :  { %6259 = vpow2.f32 %v5405_v60  ;;  %v3843_v63 = vpop.f32.mrf.mxu0  ;;  %v3914_v7 = vpop.f32.mrf.mxu1 }
 0x5db   :  { %v6254_v14 = vpop.eup %6253  ;;  %6261 = vpow2.f32 %v5394_v61  ;;  %v3918_v25 = vadd.f32 %v5399_v21, %v3914_v7  ;;  %v3847_v28 = vadd.f32 %v5398_v26, %v3843_v63 }
 0x5dc   :  { %v6256_v19 = vpop.eup %6255  ;;  %v3600_v20 = vadd.f32 1.0, %v6254_v14  ;;  %v5971_v22 = vpop.f32.mrf.mxu0  ;;  %6263 = vtanh.f32 %v3525_v62 }
 0x5dd   :  { %v5978_v23 = vpop.f32.mrf.mxu1  ;;  %v3606_v24 = vadd.f32 1.0, %v6256_v19  ;;  %v5406_v27 = vmul.f32 -1.442695, %v3918_v25 }
 0x5de   :  { %6265 = vrcp.f32 %v3600_v20  ;;  %v5411_v20 = vld [vmem:[%s7303_s0 + $0x36] sm:$0x3]  ;;  %v5420_v23 = vld [vmem:[%s7304_s1 + $0x8] sm:$0x3] }
 0x5df   :  { %6267 = vrcp.f32 %v3606_v24  ;;  %v5421_v24 = vld [vmem:[%s7304_s1 + $0xa] sm:$0x3] }
 0x5e0   :  { %6269 = vpow2.f32 %v5406_v27 }
 0x5e1   :  { %6271 = vtanh.f32 %v3847_v28 }
 0x5e6   :  { %v6258_v29 = vpop.eup %6257 }
 0x5e7   :  { %v6260_v30 = vpop.eup %6259  ;;  %v3922_v31 = vadd.f32 1.0, %v6258_v29 }
 0x5e8   :  { %v3928_v32 = vadd.f32 1.0, %v6260_v30  ;;  %v6262_v33 = vpop.eup %6261  ;;  %v5410_v30 = vld [vmem:[%s7303_s0 + $0x34] sm:$0x3] }
 0x5e9   :  { %6273 = vrcp.f32 %v3922_v31  ;;  %v6264_v34 = vpop.eup %6263  ;;  %v3613_v39 = vadd.f32 1.0, %v6262_v33 }
 0x5ea   :  { %6275 = vrcp.f32 %v3928_v32 }
 0x5eb   :  { %v6266_v35 = vpop.eup %6265  ;;  %6277 = vrcp.f32 %v3613_v39 }
 0x5ec   :  { %v6268_v36 = vpop.eup %6267  ;;  %v3617_v38 = vmul.f32 %v6266_v35, %v6264_v34 }
 0x5ed   :  { %v3616_v40 = vmul.f32 %v6268_v36, %v3304_v37  ;;  %v6270_v42 = vpop.eup %6269 }
 0x5ee   :  { %v6272_v43 = vpop.eup %6271  ;;  %v3935_v2 = vadd.f32 1.0, %v6270_v42  ;;  %v5423_v42 = vld [vmem:[%s7304_s1 + $0xe] sm:$0x3] }
 0x5ef   :  { %v3618_v41 = vadd.f32 %v3617_v38, %v3616_v40 }
 0x5f1   :  { %6279 = vtanh.f32 %v3618_v41  ;;  %3621 = vst.msk [vmem:[#allocation3] sm:$0x3] %vm62_vm0, %v3618_v41 }
 0x5f2   :  { %6281 = vrcp.f32 %v3935_v2 }
 0x5f6   :  { %v6274_v44 = vpop.eup %6273 }
 0x5f7   :  { %v6276_v45 = vpop.eup %6275  ;;  %v3939_v1 = vmul.f32 %v6274_v44, %v6272_v43 }
 0x5f8   :  { %v3938_v3 = vmul.f32 %v6276_v45, %v3626_v5  ;;  %v6278_v6 = vpop.eup %6277 }
 0x5fa   :  { %v3940_v4 = vadd.f32 %v3939_v1, %v3938_v3  ;;  %v5422_v1 = vld [vmem:[%s7304_s1 + $0xc] sm:$0x3] }
 0x5fc   :  { %6283 = vtanh.f32 %v3940_v4  ;;  %3943 = vst.msk [vmem:[#allocation5] sm:$0x3] %vm62_vm0, %v3940_v4 }
 0x5fe   :  { %v6280_v8 = vpop.eup %6279 }
 0x5ff   :  { %v3620_v9 = vmul.f32 %v6280_v8, %v6278_v6  ;;  %v6282_v10 = vpop.eup %6281 }
 0x601   :  { %5395 = vst.msk [vmem:[%s7305_s4 + $0xa] sm:$0x3] %vm62_vm0, %v3620_v9  ;;  %3622 = vst.msk [vmem:[#allocation2] sm:$0x3] %vm62_vm0, %v3620_v9 }
 0x608   :  { %v3947_v47 = vld [vmem:[#allocation2] sm:$0x3] }
 0x609   :  { %v6284_v56 = vpop.eup %6283  ;;  %5984 = vmatmul.mubr.msk.f32.vlgmr.msra.gmra.mxu0 %vm89_vm2, %v3947_v47  ;;  %5991 = vmatmul.mubr.msk.f32.vlgmr.msra.gmra.mxu1 %vm89_vm2, %v3947_v47 }
 0x60a   :  { %v3942_v57 = vmul.f32 %v6284_v56, %v6282_v10  ;;  %5994 = vmatpush3.msra.mxu0 %v6867_v11  ;;  %6001 = vmatpush3.msra.mxu1 %v6873_v12 }
 0x60b   :  { %5995 = vmatprep.subr.mxu0 %v6365_v0  ;;  %6002 = vmatprep.subr.mxu1 %v6365_v0 }
 0x60c   :  { %5407 = vst.msk [vmem:[%s7306_s5 + $0x4] sm:$0x3] %vm62_vm0, %v3942_v57  ;;  %3944 = vst.msk [vmem:[#allocation4] sm:$0x3] %vm62_vm0, %v3942_v57  ;;  %5996 = vmatpush3.msra.mxu0 %v6886_v13  ;;  %6003 = vmatpush3.msra.mxu1 %v6892_v15 }
 0x60d   :  { %5997 = vmatprep.mubr.msk.f32.mxu0 %vm6366_vm1, %v6365_v0  ;;  %6004 = vmatprep.mubr.msk.f32.mxu1 %vm6366_vm1, %v6365_v0 }
 0x60e   :  { %6007 = vmatprep.subr.mxu0 %v6365_v0  ;;  %6014 = vmatprep.subr.mxu1 %v6365_v0 }
 0x60f   :  { %5998 = vmatmul.mubr.msk.f32.vlgmr.msra.gmra.mxu0 %vm89_vm2, %v3947_v47  ;;  %6005 = vmatmul.mubr.msk.f32.vlgmr.msra.gmra.mxu1 %vm89_vm2, %v3947_v47 }
 0x610   :  { %6008 = vmatpush3.msra.mxu0 %v6906_v16  ;;  %6015 = vmatpush3.msra.mxu1 %v6912_v17 }
 0x611   :  { %6009 = vmatprep.subr.mxu0 %v6365_v0  ;;  %6016 = vmatprep.subr.mxu1 %v6365_v0 }
 0x612   :  { %6010 = vmatpush3.msra.mxu0 %v6920_v18  ;;  %6017 = vmatpush3.msra.mxu1 %v6926_v46 }
 0x613   :  { %6011 = vmatprep.mubr.msk.f32.mxu0 %vm6366_vm1, %v6365_v0  ;;  %6018 = vmatprep.mubr.msk.f32.mxu1 %vm6366_vm1, %v6365_v0  ;;  %v4269_v58 = vld [vmem:[#allocation4] sm:$0x3] }
 0x614   :  { %6012 = vmatmul.mubr.msk.f32.vlgmr.msra.gmra.mxu0 %vm89_vm2, %v4269_v58  ;;  %6019 = vmatmul.mubr.msk.f32.vlgmr.msra.gmra.mxu1 %vm89_vm2, %v4269_v58 }
 0x615   :  { %6021 = vmatprep.subr.mxu0 %v6365_v0  ;;  %6028 = vmatprep.subr.mxu1 %v6365_v0 }
 0x616   :  { %6022 = vmatpush3.msra.mxu0 %v6940_v48  ;;  %6029 = vmatpush3.msra.mxu1 %v6946_v49 }
 0x617   :  { %6023 = vmatprep.subr.mxu0 %v6365_v0  ;;  %6030 = vmatprep.subr.mxu1 %v6365_v0 }
 0x618   :  { %6024 = vmatpush3.msra.mxu0 %v6954_v50  ;;  %6025 = vmatprep.mubr.msk.f32.mxu0 %vm6366_vm1, %v6365_v0 }
 0x619   :  { %6031 = vmatpush3.msra.mxu1 %v6962_v51  ;;  %6032 = vmatprep.mubr.msk.f32.mxu1 %vm6366_vm1, %v6365_v0 }
 0x61a   :  { %6026 = vmatmul.mubr.msk.f32.vlgmr.msra.gmra.mxu0 %vm89_vm2, %v4269_v58  ;;  %6033 = vmatmul.mubr.msk.f32.vlgmr.msra.gmra.mxu1 %vm89_vm2, %v4269_v58  ;;  %v3948_v58 = vld [vmem:[#allocation3] sm:$0x3] }
 0x61b   :  { %6035 = vmatprep.subr.mxu0 %v6365_v0  ;;  %6042 = vmatprep.subr.mxu1 %v6365_v0 }
 0x61c   :  { %6036 = vmatpush3.msra.mxu0 %v6974_v52  ;;  %6043 = vmatpush3.msra.mxu1 %v6980_v53  ;;  %v5408_v52 = vld [vmem:[%s7303_s0 + $0x30] sm:$0x3]  ;;  %v5409_v53 = vld [vmem:[%s7303_s0 + $0x32] sm:$0x3] }
 0x61d   :  { %6037 = vmatprep.subr.mxu0 %v6365_v0  ;;  %6044 = vmatprep.subr.mxu1 %v6365_v0 }
 0x61e   :  { %6038 = vmatpush3.msra.mxu0 %v6988_v54  ;;  %6045 = vmatpush3.msra.mxu1 %v6994_v55 }
 0x61f   :  { %6039 = vmatprep.mubr.msk.f32.mxu0 %vm6366_vm1, %v6365_v0  ;;  %6046 = vmatprep.mubr.msk.f32.mxu1 %vm6366_vm1, %v6365_v0 }
 0x620   :  { %6049 = vmatprep.subr.mxu0 %v6365_v0  ;;  %6056 = vmatprep.subr.mxu1 %v6365_v0 }
 0x6c9   :  { %v4023_v54 = vpop.f32.mrf.mxu0  ;;  %v4094_v55 = vpop.f32.mrf.mxu1 }
 0x6ca   :  { %v4027_v59 = vadd.f32 %v5408_v52, %v4023_v54  ;;  %v4098_v60 = vadd.f32 %v5409_v53, %v4094_v55 }
 0x6cb   :  { %v5985_v61 = vpop.f32.mrf.mxu0  ;;  %v5992_v62 = vpop.f32.mrf.mxu1 }
 0x6cc   :  { %v5416_v63 = vmul.f32 -1.442695, %v4027_v59  ;;  %v5417_v7 = vmul.f32 -1.442695, %v4098_v60 }
 0x6ce   :  { %6285 = vpow2.f32 %v5416_v63  ;;  %v4270_v63 = vld [vmem:[#allocation5] sm:$0x3] }
 0x6cf   :  { %6287 = vpow2.f32 %v5417_v7  ;;  %v4165_v14 = vpop.f32.mrf.mxu0  ;;  %v4236_v19 = vpop.f32.mrf.mxu1 }
 0x6d0   :  { %v4240_v25 = vadd.f32 %v5411_v20, %v4236_v19  ;;  %v4169_v36 = vadd.f32 %v5410_v30, %v4165_v14 }
 0x6d1   :  { %v5999_v21 = vpop.f32.mrf.mxu0  ;;  %v6006_v22 = vpop.f32.mrf.mxu1 }
 0x6d2   :  { %v5418_v35 = vmul.f32 -1.442695, %v4240_v25 }
 0x6d4   :  { %v4345_v26 = vpop.f32.mrf.mxu0  ;;  %v4416_v27 = vpop.f32.mrf.mxu1 }
 0x6d5   :  { %v4349_v28 = vadd.f32 %v5420_v23, %v4345_v26  ;;  %v4420_v29 = vadd.f32 %v5421_v24, %v4416_v27 }
 0x6d6   :  { %v6013_v31 = vpop.f32.mrf.mxu0  ;;  %v6020_v32 = vpop.f32.mrf.mxu1 }
 0x6d7   :  { %v5428_v33 = vmul.f32 -1.442695, %v4349_v28  ;;  %v5429_v34 = vmul.f32 -1.442695, %v4420_v29  ;;  %v5435_v28 = vld [vmem:[%s7303_s0 + $0x3e] sm:$0x3] }
 0x6d8   :  { %v4915_v31 = vld [vmem:[%s7304_s1] sm:$0x3]  ;;  %v4916_v32 = vld [vmem:[%s7304_s1 + $0x2] sm:$0x3] }
 0x6d9   :  { %6289 = vpow2.f32 %v5428_v33 }
 0x6da   :  { %6291 = vpow2.f32 %v5429_v34  ;;  %v4487_v37 = vpop.f32.mrf.mxu0  ;;  %v4558_v38 = vpop.f32.mrf.mxu1 }
 0x6db   :  { %v6286_v39 = vpop.eup %6285  ;;  %6293 = vpow2.f32 %v5418_v35  ;;  %v4562_v5 = vadd.f32 %v5423_v42, %v4558_v38  ;;  %v4491_v3 = vadd.f32 %v5422_v1, %v4487_v37  ;;  %v5434_v38 = vld [vmem:[%s7303_s0 + $0x3c] sm:$0x3] }
 0x6dc   :  { %v6288_v40 = vpop.eup %6287  ;;  %v4244_v41 = vadd.f32 1.0, %v6286_v39  ;;  %v6027_v43 = vpop.f32.mrf.mxu0  ;;  %6295 = vtanh.f32 %v4169_v36 }
 0x6dd   :  { %v6034_v44 = vpop.f32.mrf.mxu1  ;;  %v4250_v45 = vadd.f32 1.0, %v6288_v40  ;;  %v5430_v2 = vmul.f32 -1.442695, %v4562_v5 }
 0x6de   :  { %6297 = vrcp.f32 %v4244_v41 }
 0x6df   :  { %6299 = vrcp.f32 %v4250_v45 }
 0x6e0   :  { %6301 = vpow2.f32 %v5430_v2 }
 0x6e1   :  { %6303 = vtanh.f32 %v4491_v3 }
 0x6e6   :  { %v6290_v4 = vpop.eup %6289 }
 0x6e7   :  { %v6292_v6 = vpop.eup %6291  ;;  %v4566_v8 = vadd.f32 1.0, %v6290_v4  ;;  %v4918_v4 = vld [vmem:[%s7304_s1 + $0x6] sm:$0x3] }
 0x6e8   :  { %v4572_v9 = vadd.f32 1.0, %v6292_v6  ;;  %v6294_v10 = vpop.eup %6293 }
 0x6e9   :  { %6305 = vrcp.f32 %v4566_v8  ;;  %v6296_v47 = vpop.eup %6295  ;;  %v4257_v53 = vadd.f32 1.0, %v6294_v10 }
 0x6ea   :  { %6307 = vrcp.f32 %v4572_v9 }
 0x6eb   :  { %v6298_v56 = vpop.eup %6297  ;;  %6309 = vrcp.f32 %v4257_v53 }
 0x6ec   :  { %v6300_v57 = vpop.eup %6299  ;;  %v4261_v52 = vmul.f32 %v6298_v56, %v6296_v47  ;;  %v4917_v47 = vld [vmem:[%s7304_s1 + $0x4] sm:$0x3] }
 0x6ed   :  { %v4260_v54 = vmul.f32 %v6300_v57, %v3948_v58  ;;  %v6302_v59 = vpop.eup %6301 }
 0x6ee   :  { %v6304_v60 = vpop.eup %6303  ;;  %v4579_v14 = vadd.f32 1.0, %v6302_v59 }
 0x6ef   :  { %v4262_v55 = vadd.f32 %v4261_v52, %v4260_v54 }
 0x6f1   :  { %6311 = vtanh.f32 %v4262_v55  ;;  %4265 = vst.msk [vmem:[#allocation3] sm:$0x3] %vm62_vm0, %v4262_v55 }
 0x6f2   :  { %6313 = vrcp.f32 %v4579_v14 }
 0x6f6   :  { %v6306_v61 = vpop.eup %6305 }
 0x6f7   :  { %v6308_v62 = vpop.eup %6307  ;;  %v4583_v7 = vmul.f32 %v6306_v61, %v6304_v60 }
 0x6f8   :  { %v4582_v19 = vmul.f32 %v6308_v62, %v4270_v63  ;;  %v6310_v21 = vpop.eup %6309  ;;  %v4592_v62 = vld [vmem:[#allocation3] sm:$0x3] }
 0x6fa   :  { %v4584_v20 = vadd.f32 %v4583_v7, %v4582_v19 }
 0x6fc   :  { %6315 = vtanh.f32 %v4584_v20  ;;  %4587 = vst.msk [vmem:[#allocation5] sm:$0x3] %vm62_vm0, %v4584_v20 }
 0x6fe   :  { %v6312_v22 = vpop.eup %6311 }
 0x6ff   :  { %v4264_v23 = vmul.f32 %v6312_v22, %v6310_v21  ;;  %v6314_v24 = vpop.eup %6313 }
 0x701   :  { %5419 = vst.msk [vmem:[%s7305_s4 + $0xc] sm:$0x3] %vm62_vm0, %v4264_v23  ;;  %4266 = vst.msk [vmem:[#allocation2] sm:$0x3] %vm62_vm0, %v4264_v23 }
 0x708   :  { %v4591_v25 = vld [vmem:[#allocation2] sm:$0x3] }
 0x709   :  { %v6316_v26 = vpop.eup %6315  ;;  %6040 = vmatmul.mubr.msk.f32.vlgmr.msra.gmra.mxu0 %vm89_vm2, %v4591_v25  ;;  %6047 = vmatmul.mubr.msk.f32.vlgmr.msra.gmra.mxu1 %vm89_vm2, %v4591_v25 }
 0x70a   :  { %v4586_v27 = vmul.f32 %v6316_v26, %v6314_v24  ;;  %6050 = vmatpush3.msra.mxu0 %v6867_v11  ;;  %6057 = vmatpush3.msra.mxu1 %v6873_v12  ;;  %v5432_v12 = vld [vmem:[%s7303_s0 + $0x38] sm:$0x3]  ;;  %v4914_v24 = vld [vmem:[#allocation5] sm:$0x3] }
 0x70b   :  { %6051 = vmatprep.subr.mxu0 %v6365_v0  ;;  %6058 = vmatprep.subr.mxu1 %v6365_v0 }
 0x70c   :  { %5431 = vst.msk [vmem:[%s7306_s5 + $0x2] sm:$0x3] %vm62_vm0, %v4586_v27  ;;  %4588 = vst.msk [vmem:[#allocation4] sm:$0x3] %vm62_vm0, %v4586_v27  ;;  %6052 = vmatpush3.msra.mxu0 %v6886_v13  ;;  %6059 = vmatpush3.msra.mxu1 %v6892_v15  ;;  %v5433_v13 = vld [vmem:[%s7303_s0 + $0x3a] sm:$0x3] }
 0x70d   :  { %6053 = vmatprep.mubr.msk.f32.mxu0 %vm6366_vm1, %v6365_v0  ;;  %6060 = vmatprep.mubr.msk.f32.mxu1 %vm6366_vm1, %v6365_v0 }
 0x70e   :  { %6063 = vmatprep.subr.mxu0 %v6365_v0  ;;  %6070 = vmatprep.subr.mxu1 %v6365_v0 }
 0x70f   :  { %6054 = vmatmul.mubr.msk.f32.vlgmr.msra.gmra.mxu0 %vm89_vm2, %v4591_v25  ;;  %6061 = vmatmul.mubr.msk.f32.vlgmr.msra.gmra.mxu1 %vm89_vm2, %v4591_v25 }
 0x710   :  { %6064 = vmatpush3.msra.mxu0 %v6906_v16  ;;  %6071 = vmatpush3.msra.mxu1 %v6912_v17 }
 0x711   :  { %6065 = vmatprep.subr.mxu0 %v6365_v0  ;;  %6072 = vmatprep.subr.mxu1 %v6365_v0 }
 0x712   :  { %6066 = vmatpush3.msra.mxu0 %v6920_v18  ;;  %6073 = vmatpush3.msra.mxu1 %v6926_v46 }
 0x713   :  { %6067 = vmatprep.mubr.msk.f32.mxu0 %vm6366_vm1, %v6365_v0  ;;  %6074 = vmatprep.mubr.msk.f32.mxu1 %vm6366_vm1, %v6365_v0  ;;  %v4913_v11 = vld [vmem:[#allocation4] sm:$0x3] }
 0x714   :  { %6068 = vmatmul.mubr.msk.f32.vlgmr.msra.gmra.mxu0 %vm89_vm2, %v4913_v11  ;;  %6075 = vmatmul.mubr.msk.f32.vlgmr.msra.gmra.mxu1 %vm89_vm2, %v4913_v11 }
 0x715   :  { %6077 = vmatprep.subr.mxu0 %v6365_v0  ;;  %6084 = vmatprep.subr.mxu1 %v6365_v0 }
 0x716   :  { %6078 = vmatpush3.msra.mxu0 %v6940_v48  ;;  %6085 = vmatpush3.msra.mxu1 %v6946_v49 }
 0x717   :  { %6079 = vmatprep.subr.mxu0 %v6365_v0  ;;  %6086 = vmatprep.subr.mxu1 %v6365_v0 }
 0x718   :  { %6080 = vmatpush3.msra.mxu0 %v6954_v50  ;;  %6081 = vmatprep.mubr.msk.f32.mxu0 %vm6366_vm1, %v6365_v0 }
 0x719   :  { %6087 = vmatpush3.msra.mxu1 %v6962_v51  ;;  %6088 = vmatprep.mubr.msk.f32.mxu1 %vm6366_vm1, %v6365_v0 }
 0x71a   :  { %6082 = vmatmul.mubr.msk.f32.vlgmr.msra.gmra.mxu0 %vm89_vm2, %v4913_v11  ;;  %6089 = vmatmul.mubr.msk.f32.vlgmr.msra.gmra.mxu1 %vm89_vm2, %v4913_v11 }
 0x7c9   :  { %v4667_v15 = vpop.f32.mrf.mxu0  ;;  %v4738_v16 = vpop.f32.mrf.mxu1 }
 0x7ca   :  { %v4671_v17 = vadd.f32 %v5432_v12, %v4667_v15  ;;  %v4742_v18 = vadd.f32 %v5433_v13, %v4738_v16 }
 0x7cb   :  { %v6041_v46 = vpop.f32.mrf.mxu0  ;;  %v6048_v48 = vpop.f32.mrf.mxu1 }
 0x7cc   :  { %v5440_v49 = vmul.f32 -1.442695, %v4671_v17  ;;  %v5441_v0 = vmul.f32 -1.442695, %v4742_v18 }
 0x7ce   :  { %6317 = vpow2.f32 %v5440_v49 }
 0x7cf   :  { %6319 = vpow2.f32 %v5441_v0  ;;  %v4809_v50 = vpop.f32.mrf.mxu0  ;;  %v4880_v51 = vpop.f32.mrf.mxu1 }
 0x7d0   :  { %v4884_v33 = vadd.f32 %v5435_v28, %v4880_v51  ;;  %v4813_v44 = vadd.f32 %v5434_v38, %v4809_v50 }
 0x7d1   :  { %v6055_v29 = vpop.f32.mrf.mxu0  ;;  %v6062_v30 = vpop.f32.mrf.mxu1 }
 0x7d2   :  { %v5442_v43 = vmul.f32 -1.442695, %v4884_v33 }
 0x7d4   :  { %v4988_v34 = vpop.f32.mrf.mxu0  ;;  %v5059_v35 = vpop.f32.mrf.mxu1 }
 0x7d5   :  { %v4992_v36 = vadd.f32 %v4988_v34, %v4915_v31  ;;  %v5063_v37 = vadd.f32 %v5059_v35, %v4916_v32 }
 0x7d6   :  { %v6069_v39 = vpop.f32.mrf.mxu0  ;;  %v6076_v40 = vpop.f32.mrf.mxu1 }
 0x7d7   :  { %v5448_v41 = vmul.f32 -1.442695, %v4992_v36  ;;  %v5449_v42 = vmul.f32 -1.442695, %v5063_v37 }
 0x7d9   :  { %6321 = vpow2.f32 %v5448_v41 }
 0x7da   :  { %6323 = vpow2.f32 %v5449_v42  ;;  %v5130_v45 = vpop.f32.mrf.mxu0  ;;  %v5201_v5 = vpop.f32.mrf.mxu1 }
 0x7db   :  { %v6318_v1 = vpop.eup %6317  ;;  %6325 = vpow2.f32 %v5442_v43  ;;  %v5205_v10 = vadd.f32 %v5201_v5, %v4918_v4  ;;  %v5134_v57 = vadd.f32 %v5130_v45, %v4917_v47 }
 0x7dc   :  { %v6320_v2 = vpop.eup %6319  ;;  %v4888_v3 = vadd.f32 1.0, %v6318_v1  ;;  %v6083_v6 = vpop.f32.mrf.mxu0  ;;  %6327 = vtanh.f32 %v4813_v44 }
 0x7dd   :  { %v6090_v8 = vpop.f32.mrf.mxu1  ;;  %v4894_v9 = vadd.f32 1.0, %v6320_v2  ;;  %v5450_v56 = vmul.f32 -1.442695, %v5205_v10 }
 0x7de   :  { %6329 = vrcp.f32 %v4888_v3 }
 0x7df   :  { %6331 = vrcp.f32 %v4894_v9 }
 0x7e0   :  { %6333 = vpow2.f32 %v5450_v56 }
 0x7e1   :  { %6335 = vtanh.f32 %v5134_v57 }
 0x7e6   :  { %v6322_v58 = vpop.eup %6321 }
 0x7e7   :  { %v6324_v52 = vpop.eup %6323  ;;  %v5209_v53 = vadd.f32 1.0, %v6322_v58 }
 0x7e8   :  { %v5215_v54 = vadd.f32 1.0, %v6324_v52  ;;  %v6326_v55 = vpop.eup %6325 }
 0x7e9   :  { %6337 = vrcp.f32 %v5209_v53  ;;  %v6328_v59 = vpop.eup %6327  ;;  %v4901_v7 = vadd.f32 1.0, %v6326_v55 }
 0x7ea   :  { %6339 = vrcp.f32 %v5215_v54 }
 0x7eb   :  { %v6330_v60 = vpop.eup %6329  ;;  %6341 = vrcp.f32 %v4901_v7 }
 0x7ec   :  { %v6332_v61 = vpop.eup %6331  ;;  %v4905_v63 = vmul.f32 %v6330_v60, %v6328_v59 }
 0x7ed   :  { %v4904_v14 = vmul.f32 %v6332_v61, %v4592_v62  ;;  %v6334_v20 = vpop.eup %6333 }
 0x7ee   :  { %v6336_v21 = vpop.eup %6335  ;;  %v5222_v26 = vadd.f32 1.0, %v6334_v20 }
 0x7ef   :  { %v4906_v19 = vadd.f32 %v4905_v63, %v4904_v14 }
 0x7f1   :  { %6343 = vtanh.f32 %v4906_v19  ;;  %4909 = vst.msk [vmem:[#allocation3] sm:$0x3] %vm62_vm0, %v4906_v19 }
 0x7f2   :  { %6345 = vrcp.f32 %v5222_v26 }
 0x7f6   :  { %v6338_v22 = vpop.eup %6337 }
 0x7f7   :  { %v6340_v23 = vpop.eup %6339  ;;  %v5226_v25 = vmul.f32 %v6338_v22, %v6336_v21 }
 0x7f8   :  { %v5225_v27 = vmul.f32 %v6340_v23, %v4914_v24  ;;  %v6342_v12 = vpop.eup %6341 }
 0x7fa   :  { %v5227_v11 = vadd.f32 %v5226_v25, %v5225_v27 }
 0x7fc   :  { %6347 = vtanh.f32 %v5227_v11  ;;  %5230 = vst.msk [vmem:[#allocation5] sm:$0x3] %vm62_vm0, %v5227_v11 }
 0x7fe   :  { %v6344_v13 = vpop.eup %6343 }
 0x7ff   :  { %v4908_v15 = vmul.f32 %v6344_v13, %v6342_v12  ;;  %v6346_v16 = vpop.eup %6345 }
 0x801   :  { %4910 = vst.msk [vmem:[#allocation2] sm:$0x3] %vm62_vm0, %v4908_v15  ;;  %5443 = vst.msk [vmem:[%s7305_s4 + $0xe] sm:$0x3] %vm62_vm0, %v4908_v15 }
 0x809   :  { %v6348_v17 = vpop.eup %6347 }
 0x80a   :  { %v5229_v18 = vmul.f32 %v6348_v17, %v6346_v16 }
 0x80c   :  { %5231 = vst.msk [vmem:[#allocation4] sm:$0x3] %vm62_vm0, %v5229_v18  ;;  %5232 = vst.msk [vmem:[%s7306_s5] sm:$0x3] %vm62_vm0, %v5229_v18 }

</bundles_post_ra>
